<compile_context>
chip_gen: v7x
topology: tpu7x:2x2x1
jax: 0.10.0
libtpu: 0.0.40
codegen_flags: <defaults>
</compile_context>

<pallas_src>
import functools
import math

import jax
import jax.numpy as jnp
from jax import lax
from jax.experimental import pallas as pl
from jax.experimental.pallas import tpu as pltpu


# ----------------------------- Pallas kernels ------------------------------ #

def _gemm_bias_act_kernel(w_ref, x_ref, b_ref, o_ref, *, act):
    # w_ref: (N, K)  x_ref: (K, tm)  b_ref: (N, 1)  o_ref: (N, tm)
    acc = jnp.dot(w_ref[...], x_ref[...], preferred_element_type=jnp.float32)
    acc = acc + b_ref[...]                      # (N, 1) broadcasts along lanes
    if act == "relu":
        acc = jnp.maximum(acc, 0.0)
    elif act == "sigmoid":
        acc = 1.0 / (1.0 + jnp.exp(-acc))
    o_ref[...] = acc.astype(o_ref.dtype)


def gemm_t_bias_act(w_t, x_t, b, act="none", tm_max=1920):
    """out[N, M] = act(w_t[N, K] @ x_t[K, M] + b[N, 1]), M tiled into lanes."""
    N, K = w_t.shape
    K2, M = x_t.shape
    assert K == K2
    if M <= tm_max:
        tm = M                           # single full block, no padding
        Mp = M
    else:
        tm = None
        for cand in range(tm_max, 127, -128):   # multiple of 128 dividing M
            if M % cand == 0:
                tm = cand
                break
        if tm is None:
            tm = tm_max
        Mp = ((M + tm - 1) // tm) * tm
    xp = x_t if Mp == M else jnp.pad(x_t, ((0, 0), (0, Mp - M)))
    out = pl.pallas_call(
        functools.partial(_gemm_bias_act_kernel, act=act),
        out_shape=jax.ShapeDtypeStruct((N, Mp), jnp.float32),
        grid=(Mp // tm,),
        in_specs=[
            pl.BlockSpec((N, K), lambda i: (0, 0)),    # W^T resident
            pl.BlockSpec((K, tm), lambda i: (0, i)),   # M-tile, lane-dense
            pl.BlockSpec((N, 1), lambda i: (0, 0)),    # bias
        ],
        out_specs=pl.BlockSpec((N, tm), lambda i: (0, i)),
        compiler_params=pltpu.CompilerParams(dimension_semantics=("parallel",)),
    )(w_t, xp, b.reshape(N, 1))
    return out if Mp == M else out[:, :M]


def _maxpool4_kernel(x_ref, o_ref):
    # x_ref: (4, L) -- the four 2x2-window slabs, flattened lane-dense.
    x = x_ref[...]
    a = jnp.maximum(x[0:1, :], x[1:2, :])
    b = jnp.maximum(x[2:3, :], x[3:4, :])
    o_ref[...] = jnp.maximum(a, b)


def maxpool_2x2_cm(x):
    """2x2/2 max-pool on channel-major (C, B, H, W) activations (H, W even)."""
    C, B, H, W = x.shape
    Ho, Wo = H // 2, W // 2
    L = C * B * Ho * Wo
    slabs = jnp.stack(
        [x[:, :, 0::2, 0::2].reshape(L),
         x[:, :, 0::2, 1::2].reshape(L),
         x[:, :, 1::2, 0::2].reshape(L),
         x[:, :, 1::2, 1::2].reshape(L)], axis=0)          # (4, L)
    out = pl.pallas_call(
        _maxpool4_kernel,
        out_shape=jax.ShapeDtypeStruct((1, L), x.dtype),
        grid=(1,),
        in_specs=[pl.BlockSpec((4, L), lambda i: (0, 0))],
        out_specs=pl.BlockSpec((1, L), lambda i: (0, 0)),
    )(slabs)
    return out.reshape(C, B, Ho, Wo)


def _tail_kernel(col4_ref, w4_ref, b4_ref, w5_ref, b5_ref, w6_ref, b6_ref,
                 o_ref):
    # Fused: conv4 (as 4 per-position GEMMs) + ReLU + 2x2 pool (max over the
    # 4 positions) + st2_fc1 + ReLU + st2_fc2 + sigmoid.
    m = None
    for p in range(4):
        y = jnp.dot(w4_ref[...], col4_ref[p],
                    preferred_element_type=jnp.float32) + b4_ref[...]
        y = jnp.maximum(y, 0.0)
        m = y if m is None else jnp.maximum(m, y)          # (32, B)
    y5 = jnp.dot(w5_ref[...], m, preferred_element_type=jnp.float32) + b5_ref[...]
    y5 = jnp.maximum(y5, 0.0)                              # (16, B)
    y6 = jnp.dot(w6_ref[...], y5, preferred_element_type=jnp.float32) + b6_ref[...]
    o_ref[...] = 1.0 / (1.0 + jnp.exp(-y6))                # (1, B)


# ------------------------------- conv wrapper ------------------------------ #

def conv2d_relu_cm(x, w_pt, b, stride, pad):
    """Conv2d + ReLU on channel-major input.

    x: (Cin, B, H, W), w_pt: (Cout, Cin, KH, KW).  im2col is built directly in
    (K, M) layout so the Pallas GEMM is lane-dense in M.
    """
    Cin, B, H, W = x.shape
    Cout, Cin2, KH, KW = w_pt.shape
    assert Cin == Cin2
    xp = jnp.pad(x, ((0, 0), (0, 0), (pad, pad), (pad, pad)))
    Ho = (H + 2 * pad - KH) // stride + 1
    Wo = (W + 2 * pad - KW) // stride + 1
    # TODO(synk): the stride-2 patch gather (im2col) stays as XLA glue; fusing
    # it into the kernel needs strided in-VMEM access that BlockSpecs can't
    # express cleanly.
    slabs = []
    for ky in range(KH):
        for kx in range(KW):
            slabs.append(
                xp[:, :, ky:ky + stride * Ho:stride, kx:kx + stride * Wo:stride])
    # (KH*KW, Cin, B, Ho, Wo) -> (K, M) with K ordered (ky, kx, ci)
    col = jnp.stack(slabs, axis=0).reshape(KH * KW * Cin, B * Ho * Wo)
    w_t = jnp.transpose(w_pt, (0, 2, 3, 1)).reshape(Cout, KH * KW * Cin)
    y = gemm_t_bias_act(w_t, col, b, act="relu")           # (Cout, M)
    return y.reshape(Cout, B, Ho, Wo)


def tail_fused(x, params):
    """conv4 + ReLU + pool + st2_fc1 + ReLU + st2_fc2 + sigmoid, one kernel.

    x: (16, B, 4, 4) channel-major output of the third pool.
    """
    Cin, B, H, W = x.shape
    KH = KW = 3
    Ho = Wo = 2
    K4 = KH * KW * Cin                                      # 144
    pos_cols = []
    for oy in range(Ho):
        for ox in range(Wo):
            taps = [x[:, :, oy + ky, ox + kx] for ky in range(KH)
                    for kx in range(KW)]                    # each (Cin, B)
            pos_cols.append(jnp.stack(taps, axis=0).reshape(K4, B))
    col4 = jnp.stack(pos_cols, axis=0)                      # (4, K4, B)

    w4_t = jnp.transpose(params["conv4_w"], (0, 2, 3, 1)).reshape(32, K4)
    b4 = params["conv4_b"].reshape(32, 1)
    w5_t = params["st2_fc1_w"].reshape(16, 32)
    b5 = params["st2_fc1_b"].reshape(16, 1)
    w6_t = params["st2_fc2_w"].reshape(1, 16)
    b6 = params["st2_fc2_b"].reshape(1, 1)

    out = pl.pallas_call(
        _tail_kernel,
        out_shape=jax.ShapeDtypeStruct((1, B), jnp.float32),
        grid=(1,),
        in_specs=[
            pl.BlockSpec((4, K4, B), lambda i: (0, 0, 0)),
            pl.BlockSpec((32, K4), lambda i: (0, 0)),
            pl.BlockSpec((32, 1), lambda i: (0, 0)),
            pl.BlockSpec((16, 32), lambda i: (0, 0)),
            pl.BlockSpec((16, 1), lambda i: (0, 0)),
            pl.BlockSpec((1, 16), lambda i: (0, 0)),
            pl.BlockSpec((1, 1), lambda i: (0, 0)),
        ],
        out_specs=pl.BlockSpec((1, B), lambda i: (0, 0)),
    )(col4, w4_t, b4, w5_t, b5, w6_t, b6)
    return out.T                                            # (B, 1)


# --------------------------------- EONSS ----------------------------------- #

def init_params(key):
    """Deterministic synthetic init matching the PyTorch __init__ shapes:
    weight ~ N(0, sqrt(2 / (kh*kw*cout))), bias ~ U(-1/sqrt(fan_in), 1/sqrt(fan_in))."""
    specs = [
        ("conv1", 4, 3, 5, 5),
        ("conv2", 8, 4, 5, 5),
        ("conv3", 16, 8, 5, 5),
        ("conv4", 32, 16, 3, 3),
        ("st2_fc1", 16, 32, 1, 1),
        ("st2_fc2", 1, 16, 1, 1),
    ]
    keys = jax.random.split(key, 2 * len(specs))
    p = {}
    for i, (name, cout, cin, kh, kw) in enumerate(specs):
        n = kh * kw * cout
        p[name + "_w"] = (jax.random.normal(keys[2 * i], (cout, cin, kh, kw),
                                            jnp.float32) * math.sqrt(2.0 / n))
        bound = 1.0 / math.sqrt(cin * kh * kw)
        p[name + "_b"] = jax.random.uniform(keys[2 * i + 1], (cout,),
                                            jnp.float32, -bound, bound)
    return p


def eonss_forward(params, x_nchw):
    # Channel-major layout (C, B, H, W): spatial/batch in lanes everywhere.
    x = jnp.transpose(x_nchw, (1, 0, 2, 3))
    x = maxpool_2x2_cm(conv2d_relu_cm(x, params["conv1_w"], params["conv1_b"], 2, 2))
    x = maxpool_2x2_cm(conv2d_relu_cm(x, params["conv2_w"], params["conv2_b"], 2, 2))
    x = maxpool_2x2_cm(conv2d_relu_cm(x, params["conv3_w"], params["conv3_b"], 2, 2))
    # conv4 + pool + st2_fc1 + st2_fc2 + sigmoid fused in a single kernel
    return tail_fused(x, params)                            # (B, 1)


def eonss_reference(params, x_nchw):
    """Pure-JAX reference (mirrors the PyTorch forward)."""
    def conv(x, w, b, stride, pad):
        y = lax.conv_general_dilated(
            x, w, (stride, stride), [(pad, pad), (pad, pad)],
            dimension_numbers=("NCHW", "OIHW", "NCHW"),
            precision=lax.Precision.HIGHEST)
        return y + b.reshape(1, -1, 1, 1)

    def pool(x):
        return lax.reduce_window(x, -jnp.inf, lax.max,
                                 (1, 1, 2, 2), (1, 1, 2, 2), "VALID")

    x = x_nchw
    x = pool(jax.nn.relu(conv(x, params["conv1_w"], params["conv1_b"], 2, 2)))
    x = pool(jax.nn.relu(conv(x, params["conv2_w"], params["conv2_b"], 2, 2)))
    x = pool(jax.nn.relu(conv(x, params["conv3_w"], params["conv3_b"], 2, 2)))
    x = pool(jax.nn.relu(conv(x, params["conv4_w"], params["conv4_b"], 1, 0)))
    y2 = jax.nn.relu(conv(x, params["st2_fc1_w"], params["st2_fc1_b"], 1, 0))
    s = conv(y2, params["st2_fc2_w"], params["st2_fc2_b"], 1, 0)
    return jax.nn.sigmoid(s.reshape(x.shape[0], -1))


if __name__ == "__main__":
    key = jax.random.PRNGKey(0)
    kp, kx = jax.random.split(key)
    params = init_params(kp)

    # Smallest practical input for this architecture: three stride-2 conv+pool
    # stages followed by a 3x3 VALID conv + pool require H,W >= 235; use 240.
    x = jax.random.normal(kx, (2, 3, 240, 240), jnp.float32)

    out = jax.block_until_ready(jax.jit(eonss_forward)(params, x))
    ref = jax.block_until_ready(jax.jit(eonss_reference)(params, x))

    assert out.shape == (2, 1), out.shape
    max_diff = float(jnp.max(jnp.abs(out - ref)))
    assert max_diff < 1e-3, f"mismatch vs reference: {max_diff}"

    print("KERNEL_OK")
</pallas_src>

<mosaic_0001>
module attributes {stable_mosaic.version = 11 : i64} {
  func.func @_gemm_bias_act_kernel(%arg0: i32, %arg1: memref<4x75xf32, #tpu.memory_space<vmem>>, %arg2: memref<75x1920xf32, #tpu.memory_space<vmem>>, %arg3: memref<4x1xf32, #tpu.memory_space<vmem>>, %arg4: memref<4x1920xf32, #tpu.memory_space<vmem>>) attributes {dimension_semantics = [#tpu.dimension_semantics<parallel>], iteration_bounds = array<i64: 15>, scalar_prefetch = 0 : i64, scratch_operands = 0 : i64, tpu.core_type = #tpu.core_type<tc>, window_params = [{pipeline_mode = #tpu.pipeline_mode<synchronous>, transform_indices = @transform_0, window_bounds = array<i64: 4, 75>}, {transform_indices = @transform_1, window_bounds = array<i64: 75, 1920>}, {pipeline_mode = #tpu.pipeline_mode<synchronous>, transform_indices = @transform_2, window_bounds = array<i64: 4, 1>}, {transform_indices = @transform_3, window_bounds = array<i64: 4, 1920>}]} {
    %c0 = arith.constant 0 : index
    %c0_0 = arith.constant 0 : index
    %0 = vector.load %arg1[%c0, %c0_0] : memref<4x75xf32, #tpu.memory_space<vmem>>, vector<4x75xf32>
    %c0_1 = arith.constant 0 : index
    %c0_2 = arith.constant 0 : index
    %1 = vector.load %arg2[%c0_1, %c0_2] : memref<75x1920xf32, #tpu.memory_space<vmem>>, vector<75x1920xf32>
    %cst = arith.constant dense<0.000000e+00> : vector<4x1920xf32>
    %2 = tpu.matmul %0, %1, %cst {dimension_numbers = #tpu.dot_dimension_numbers<[1], [0], [0], [1], [0, 0, 1, 1], [], []>} : vector<4x75xf32>, vector<75x1920xf32>, vector<4x1920xf32> -> vector<4x1920xf32>
    %c0_3 = arith.constant 0 : index
    %c0_4 = arith.constant 0 : index
    %3 = vector.load %arg3[%c0_3, %c0_4] : memref<4x1xf32, #tpu.memory_space<vmem>>, vector<4x1xf32>
    %4 = vector.broadcast %3 : vector<4x1xf32> to vector<4x1920xf32>
    %5 = arith.addf %2, %4 : vector<4x1920xf32>
    %cst_5 = arith.constant 0.000000e+00 : f32
    %6 = vector.broadcast %cst_5 : f32 to vector<4x1920xf32>
    %7 = arith.maximumf %5, %6 : vector<4x1920xf32>
    %c0_6 = arith.constant 0 : index
    %c0_7 = arith.constant 0 : index
    %8 = vector.load %arg4[%c0_6, %c0_7] : memref<4x1920xf32, #tpu.memory_space<vmem>>, vector<4x1920xf32>
    tpu.vector_store %arg4[%c0_6, %c0_7], %7 {strides = array<i32>} : memref<4x1920xf32, #tpu.memory_space<vmem>>, vector<4x1920xf32>,
    return
  }
  func.func @transform_0(%arg0: i32) -> (i32, i32) {
    %c0_i32 = arith.constant 0 : i32
    %c0_i32_0 = arith.constant 0 : i32
    %c0_i32_1 = arith.constant 0 : i32
    return %c0_i32, %c0_i32_0 : i32, i32
  }
  func.func @transform_1(%arg0: i32) -> (i32, i32) {
    %c0_i32 = arith.constant 0 : i32
    %c0_i32_0 = arith.constant 0 : i32
    return %c0_i32, %arg0 : i32, i32
  }
  func.func @transform_2(%arg0: i32) -> (i32, i32) {
    %c0_i32 = arith.constant 0 : i32
    %c0_i32_0 = arith.constant 0 : i32
    %c0_i32_1 = arith.constant 0 : i32
    return %c0_i32, %c0_i32_0 : i32, i32
  }
  func.func @transform_3(%arg0: i32) -> (i32, i32) {
    %c0_i32 = arith.constant 0 : i32
    %c0_i32_0 = arith.constant 0 : i32
    return %c0_i32, %arg0 : i32, i32
  }
}

module attributes {stable_mosaic.version = 11 : i64} {
  func.func @_maxpool4_kernel(%arg0: i32, %arg1: memref<4x28800xf32, #tpu.memory_space<vmem>>, %arg2: memref<1x28800xf32, #tpu.memory_space<vmem>>) attributes {dimension_semantics = [#tpu.dimension_semantics<arbitrary>], iteration_bounds = array<i64: 1>, scalar_prefetch = 0 : i64, scratch_operands = 0 : i64, tpu.core_type = #tpu.core_type<tc>, window_params = [{pipeline_mode = #tpu.pipeline_mode<synchronous>, transform_indices = @transform_0, window_bounds = array<i64: 4, 28800>}, {pipeline_mode = #tpu.pipeline_mode<synchronous>, transform_indices = @transform_1, window_bounds = array<i64: 1, 28800>}]} {
    %c0 = arith.constant 0 : index
    %c0_0 = arith.constant 0 : index
    %0 = vector.load %arg1[%c0, %c0_0] : memref<4x28800xf32, #tpu.memory_space<vmem>>, vector<4x28800xf32>
    %1 = vector.extract_strided_slice %0 {offsets = [0, 0], sizes = [1, 28800], strides = [1, 1]} : vector<4x28800xf32> to vector<1x28800xf32>
    %2 = vector.extract_strided_slice %0 {offsets = [1, 0], sizes = [1, 28800], strides = [1, 1]} : vector<4x28800xf32> to vector<1x28800xf32>
    %3 = arith.maximumf %1, %2 : vector<1x28800xf32>
    %4 = vector.extract_strided_slice %0 {offsets = [2, 0], sizes = [1, 28800], strides = [1, 1]} : vector<4x28800xf32> to vector<1x28800xf32>
    %5 = vector.extract_strided_slice %0 {offsets = [3, 0], sizes = [1, 28800], strides = [1, 1]} : vector<4x28800xf32> to vector<1x28800xf32>
    %6 = arith.maximumf %4, %5 : vector<1x28800xf32>
    %7 = arith.maximumf %3, %6 : vector<1x28800xf32>
    %c0_1 = arith.constant 0 : index
    %c0_2 = arith.constant 0 : index
    %8 = vector.load %arg2[%c0_1, %c0_2] : memref<1x28800xf32, #tpu.memory_space<vmem>>, vector<1x28800xf32>
    tpu.vector_store %arg2[%c0_1, %c0_2], %7 {strides = array<i32>} : memref<1x28800xf32, #tpu.memory_space<vmem>>, vector<1x28800xf32>,
    return
  }
  func.func @transform_0(%arg0: i32) -> (i32, i32) {
    %c0_i32 = arith.constant 0 : i32
    %c0_i32_0 = arith.constant 0 : i32
    %c0_i32_1 = arith.constant 0 : i32
    return %c0_i32, %c0_i32_0 : i32, i32
  }
  func.func @transform_1(%arg0: i32) -> (i32, i32) {
    %c0_i32 = arith.constant 0 : i32
    %c0_i32_0 = arith.constant 0 : i32
    %c0_i32_1 = arith.constant 0 : i32
    return %c0_i32, %c0_i32_0 : i32, i32
  }
}

module attributes {stable_mosaic.version = 11 : i64} {
  func.func @_gemm_bias_act_kernel(%arg0: i32, %arg1: memref<8x100xf32, #tpu.memory_space<vmem>>, %arg2: memref<100x1800xf32, #tpu.memory_space<vmem>>, %arg3: memref<8x1xf32, #tpu.memory_space<vmem>>, %arg4: memref<8x1800xf32, #tpu.memory_space<vmem>>) attributes {dimension_semantics = [#tpu.dimension_semantics<parallel>], iteration_bounds = array<i64: 1>, scalar_prefetch = 0 : i64, scratch_operands = 0 : i64, tpu.core_type = #tpu.core_type<tc>, window_params = [{pipeline_mode = #tpu.pipeline_mode<synchronous>, transform_indices = @transform_0, window_bounds = array<i64: 8, 100>}, {transform_indices = @transform_1, window_bounds = array<i64: 100, 1800>}, {pipeline_mode = #tpu.pipeline_mode<synchronous>, transform_indices = @transform_2, window_bounds = array<i64: 8, 1>}, {transform_indices = @transform_3, window_bounds = array<i64: 8, 1800>}]} {
    %c0 = arith.constant 0 : index
    %c0_0 = arith.constant 0 : index
    %0 = vector.load %arg1[%c0, %c0_0] : memref<8x100xf32, #tpu.memory_space<vmem>>, vector<8x100xf32>
    %c0_1 = arith.constant 0 : index
    %c0_2 = arith.constant 0 : index
    %1 = vector.load %arg2[%c0_1, %c0_2] : memref<100x1800xf32, #tpu.memory_space<vmem>>, vector<100x1800xf32>
    %cst = arith.constant dense<0.000000e+00> : vector<8x1800xf32>
    %2 = tpu.matmul %0, %1, %cst {dimension_numbers = #tpu.dot_dimension_numbers<[1], [0], [0], [1], [0, 0, 1, 1], [], []>} : vector<8x100xf32>, vector<100x1800xf32>, vector<8x1800xf32> -> vector<8x1800xf32>
    %c0_3 = arith.constant 0 : index
    %c0_4 = arith.constant 0 : index
    %3 = vector.load %arg3[%c0_3, %c0_4] : memref<8x1xf32, #tpu.memory_space<vmem>>, vector<8x1xf32>
    %4 = vector.broadcast %3 : vector<8x1xf32> to vector<8x1800xf32>
    %5 = arith.addf %2, %4 : vector<8x1800xf32>
    %cst_5 = arith.constant 0.000000e+00 : f32
    %6 = vector.broadcast %cst_5 : f32 to vector<8x1800xf32>
    %7 = arith.maximumf %5, %6 : vector<8x1800xf32>
    %c0_6 = arith.constant 0 : index
    %c0_7 = arith.constant 0 : index
    %8 = vector.load %arg4[%c0_6, %c0_7] : memref<8x1800xf32, #tpu.memory_space<vmem>>, vector<8x1800xf32>
    tpu.vector_store %arg4[%c0_6, %c0_7], %7 {strides = array<i32>} : memref<8x1800xf32, #tpu.memory_space<vmem>>, vector<8x1800xf32>,
    return
  }
  func.func @transform_0(%arg0: i32) -> (i32, i32) {
    %c0_i32 = arith.constant 0 : i32
    %c0_i32_0 = arith.constant 0 : i32
    %c0_i32_1 = arith.constant 0 : i32
    return %c0_i32, %c0_i32_0 : i32, i32
  }
  func.func @transform_1(%arg0: i32) -> (i32, i32) {
    %c0_i32 = arith.constant 0 : i32
    %c0_i32_0 = arith.constant 0 : i32
    return %c0_i32, %arg0 : i32, i32
  }
  func.func @transform_2(%arg0: i32) -> (i32, i32) {
    %c0_i32 = arith.constant 0 : i32
    %c0_i32_0 = arith.constant 0 : i32
    %c0_i32_1 = arith.constant 0 : i32
    return %c0_i32, %c0_i32_0 : i32, i32
  }
  func.func @transform_3(%arg0: i32) -> (i32, i32) {
    %c0_i32 = arith.constant 0 : i32
    %c0_i32_0 = arith.constant 0 : i32
    return %c0_i32, %arg0 : i32, i32
  }
}

module attributes {stable_mosaic.version = 11 : i64} {
  func.func @_maxpool4_kernel(%arg0: i32, %arg1: memref<4x3600xf32, #tpu.memory_space<vmem>>, %arg2: memref<1x3600xf32, #tpu.memory_space<vmem>>) attributes {dimension_semantics = [#tpu.dimension_semantics<arbitrary>], iteration_bounds = array<i64: 1>, scalar_prefetch = 0 : i64, scratch_operands = 0 : i64, tpu.core_type = #tpu.core_type<tc>, window_params = [{pipeline_mode = #tpu.pipeline_mode<synchronous>, transform_indices = @transform_0, window_bounds = array<i64: 4, 3600>}, {pipeline_mode = #tpu.pipeline_mode<synchronous>, transform_indices = @transform_1, window_bounds = array<i64: 1, 3600>}]} {
    %c0 = arith.constant 0 : index
    %c0_0 = arith.constant 0 : index
    %0 = vector.load %arg1[%c0, %c0_0] : memref<4x3600xf32, #tpu.memory_space<vmem>>, vector<4x3600xf32>
    %1 = vector.extract_strided_slice %0 {offsets = [0, 0], sizes = [1, 3600], strides = [1, 1]} : vector<4x3600xf32> to vector<1x3600xf32>
    %2 = vector.extract_strided_slice %0 {offsets = [1, 0], sizes = [1, 3600], strides = [1, 1]} : vector<4x3600xf32> to vector<1x3600xf32>
    %3 = arith.maximumf %1, %2 : vector<1x3600xf32>
    %4 = vector.extract_strided_slice %0 {offsets = [2, 0], sizes = [1, 3600], strides = [1, 1]} : vector<4x3600xf32> to vector<1x3600xf32>
    %5 = vector.extract_strided_slice %0 {offsets = [3, 0], sizes = [1, 3600], strides = [1, 1]} : vector<4x3600xf32> to vector<1x3600xf32>
    %6 = arith.maximumf %4, %5 : vector<1x3600xf32>
    %7 = arith.maximumf %3, %6 : vector<1x3600xf32>
    %c0_1 = arith.constant 0 : index
    %c0_2 = arith.constant 0 : index
    %8 = vector.load %arg2[%c0_1, %c0_2] : memref<1x3600xf32, #tpu.memory_space<vmem>>, vector<1x3600xf32>
    tpu.vector_store %arg2[%c0_1, %c0_2], %7 {strides = array<i32>} : memref<1x3600xf32, #tpu.memory_space<vmem>>, vector<1x3600xf32>,
    return
  }
  func.func @transform_0(%arg0: i32) -> (i32, i32) {
    %c0_i32 = arith.constant 0 : i32
    %c0_i32_0 = arith.constant 0 : i32
    %c0_i32_1 = arith.constant 0 : i32
    return %c0_i32, %c0_i32_0 : i32, i32
  }
  func.func @transform_1(%arg0: i32) -> (i32, i32) {
    %c0_i32 = arith.constant 0 : i32
    %c0_i32_0 = arith.constant 0 : i32
    %c0_i32_1 = arith.constant 0 : i32
    return %c0_i32, %c0_i32_0 : i32, i32
  }
}

module attributes {stable_mosaic.version = 11 : i64} {
  func.func @_gemm_bias_act_kernel(%arg0: i32, %arg1: memref<16x200xf32, #tpu.memory_space<vmem>>, %arg2: memref<200x128xf32, #tpu.memory_space<vmem>>, %arg3: memref<16x1xf32, #tpu.memory_space<vmem>>, %arg4: memref<16x128xf32, #tpu.memory_space<vmem>>) attributes {dimension_semantics = [#tpu.dimension_semantics<parallel>], iteration_bounds = array<i64: 1>, scalar_prefetch = 0 : i64, scratch_operands = 0 : i64, tpu.core_type = #tpu.core_type<tc>, window_params = [{pipeline_mode = #tpu.pipeline_mode<synchronous>, transform_indices = @transform_0, window_bounds = array<i64: 16, 200>}, {transform_indices = @transform_1, window_bounds = array<i64: 200, 128>}, {pipeline_mode = #tpu.pipeline_mode<synchronous>, transform_indices = @transform_2, window_bounds = array<i64: 16, 1>}, {transform_indices = @transform_3, window_bounds = array<i64: 16, 128>}]} {
    %c0 = arith.constant 0 : index
    %c0_0 = arith.constant 0 : index
    %0 = vector.load %arg1[%c0, %c0_0] : memref<16x200xf32, #tpu.memory_space<vmem>>, vector<16x200xf32>
    %c0_1 = arith.constant 0 : index
    %c0_2 = arith.constant 0 : index
    %1 = vector.load %arg2[%c0_1, %c0_2] : memref<200x128xf32, #tpu.memory_space<vmem>>, vector<200x128xf32>
    %cst = arith.constant dense<0.000000e+00> : vector<16x128xf32>
    %2 = tpu.matmul %0, %1, %cst {dimension_numbers = #tpu.dot_dimension_numbers<[1], [0], [0], [1], [0, 0, 1, 1], [], []>} : vector<16x200xf32>, vector<200x128xf32>, vector<16x128xf32> -> vector<16x128xf32>
    %c0_3 = arith.constant 0 : index
    %c0_4 = arith.constant 0 : index
    %3 = vector.load %arg3[%c0_3, %c0_4] : memref<16x1xf32, #tpu.memory_space<vmem>>, vector<16x1xf32>
    %4 = vector.broadcast %3 : vector<16x1xf32> to vector<16x128xf32>
    %5 = arith.addf %2, %4 : vector<16x128xf32>
    %cst_5 = arith.constant 0.000000e+00 : f32
    %6 = vector.broadcast %cst_5 : f32 to vector<16x128xf32>
    %7 = arith.maximumf %5, %6 : vector<16x128xf32>
    %c0_6 = arith.constant 0 : index
    %c0_7 = arith.constant 0 : index
    %8 = vector.load %arg4[%c0_6, %c0_7] : memref<16x128xf32, #tpu.memory_space<vmem>>, vector<16x128xf32>
    tpu.vector_store %arg4[%c0_6, %c0_7], %7 {strides = array<i32>} : memref<16x128xf32, #tpu.memory_space<vmem>>, vector<16x128xf32>,
    return
  }
  func.func @transform_0(%arg0: i32) -> (i32, i32) {
    %c0_i32 = arith.constant 0 : i32
    %c0_i32_0 = arith.constant 0 : i32
    %c0_i32_1 = arith.constant 0 : i32
    return %c0_i32, %c0_i32_0 : i32, i32
  }
  func.func @transform_1(%arg0: i32) -> (i32, i32) {
    %c0_i32 = arith.constant 0 : i32
    %c0_i32_0 = arith.constant 0 : i32
    return %c0_i32, %arg0 : i32, i32
  }
  func.func @transform_2(%arg0: i32) -> (i32, i32) {
    %c0_i32 = arith.constant 0 : i32
    %c0_i32_0 = arith.constant 0 : i32
    %c0_i32_1 = arith.constant 0 : i32
    return %c0_i32, %c0_i32_0 : i32, i32
  }
  func.func @transform_3(%arg0: i32) -> (i32, i32) {
    %c0_i32 = arith.constant 0 : i32
    %c0_i32_0 = arith.constant 0 : i32
    return %c0_i32, %arg0 : i32, i32
  }
}

module attributes {stable_mosaic.version = 11 : i64} {
  func.func @_maxpool4_kernel(%arg0: i32, %arg1: memref<4x512xf32, #tpu.memory_space<vmem>>, %arg2: memref<1x512xf32, #tpu.memory_space<vmem>>) attributes {dimension_semantics = [#tpu.dimension_semantics<arbitrary>], iteration_bounds = array<i64: 1>, scalar_prefetch = 0 : i64, scratch_operands = 0 : i64, tpu.core_type = #tpu.core_type<tc>, window_params = [{pipeline_mode = #tpu.pipeline_mode<synchronous>, transform_indices = @transform_0, window_bounds = array<i64: 4, 512>}, {pipeline_mode = #tpu.pipeline_mode<synchronous>, transform_indices = @transform_1, window_bounds = array<i64: 1, 512>}]} {
    %c0 = arith.constant 0 : index
    %c0_0 = arith.constant 0 : index
    %0 = vector.load %arg1[%c0, %c0_0] : memref<4x512xf32, #tpu.memory_space<vmem>>, vector<4x512xf32>
    %1 = vector.extract_strided_slice %0 {offsets = [0, 0], sizes = [1, 512], strides = [1, 1]} : vector<4x512xf32> to vector<1x512xf32>
    %2 = vector.extract_strided_slice %0 {offsets = [1, 0], sizes = [1, 512], strides = [1, 1]} : vector<4x512xf32> to vector<1x512xf32>
    %3 = arith.maximumf %1, %2 : vector<1x512xf32>
    %4 = vector.extract_strided_slice %0 {offsets = [2, 0], sizes = [1, 512], strides = [1, 1]} : vector<4x512xf32> to vector<1x512xf32>
    %5 = vector.extract_strided_slice %0 {offsets = [3, 0], sizes = [1, 512], strides = [1, 1]} : vector<4x512xf32> to vector<1x512xf32>
    %6 = arith.maximumf %4, %5 : vector<1x512xf32>
    %7 = arith.maximumf %3, %6 : vector<1x512xf32>
    %c0_1 = arith.constant 0 : index
    %c0_2 = arith.constant 0 : index
    %8 = vector.load %arg2[%c0_1, %c0_2] : memref<1x512xf32, #tpu.memory_space<vmem>>, vector<1x512xf32>
    tpu.vector_store %arg2[%c0_1, %c0_2], %7 {strides = array<i32>} : memref<1x512xf32, #tpu.memory_space<vmem>>, vector<1x512xf32>,
    return
  }
  func.func @transform_0(%arg0: i32) -> (i32, i32) {
    %c0_i32 = arith.constant 0 : i32
    %c0_i32_0 = arith.constant 0 : i32
    %c0_i32_1 = arith.constant 0 : i32
    return %c0_i32, %c0_i32_0 : i32, i32
  }
  func.func @transform_1(%arg0: i32) -> (i32, i32) {
    %c0_i32 = arith.constant 0 : i32
    %c0_i32_0 = arith.constant 0 : i32
    %c0_i32_1 = arith.constant 0 : i32
    return %c0_i32, %c0_i32_0 : i32, i32
  }
}

module attributes {stable_mosaic.version = 11 : i64} {
  func.func @_tail_kernel(%arg0: i32, %arg1: memref<4x144x2xf32, #tpu.memory_space<vmem>>, %arg2: memref<32x144xf32, #tpu.memory_space<vmem>>, %arg3: memref<32x1xf32, #tpu.memory_space<vmem>>, %arg4: memref<16x32xf32, #tpu.memory_space<vmem>>, %arg5: memref<16x1xf32, #tpu.memory_space<vmem>>, %arg6: memref<1x16xf32, #tpu.memory_space<vmem>>, %arg7: memref<1x1xf32, #tpu.memory_space<vmem>>, %arg8: memref<1x2xf32, #tpu.memory_space<vmem>>) attributes {dimension_semantics = [#tpu.dimension_semantics<arbitrary>], iteration_bounds = array<i64: 1>, scalar_prefetch = 0 : i64, scratch_operands = 0 : i64, tpu.core_type = #tpu.core_type<tc>, window_params = [{pipeline_mode = #tpu.pipeline_mode<synchronous>, transform_indices = @transform_0, window_bounds = array<i64: 4, 144, 2>}, {pipeline_mode = #tpu.pipeline_mode<synchronous>, transform_indices = @transform_1, window_bounds = array<i64: 32, 144>}, {pipeline_mode = #tpu.pipeline_mode<synchronous>, transform_indices = @transform_2, window_bounds = array<i64: 32, 1>}, {pipeline_mode = #tpu.pipeline_mode<synchronous>, transform_indices = @transform_3, window_bounds = array<i64: 16, 32>}, {pipeline_mode = #tpu.pipeline_mode<synchronous>, transform_indices = @transform_4, window_bounds = array<i64: 16, 1>}, {pipeline_mode = #tpu.pipeline_mode<synchronous>, transform_indices = @transform_5, window_bounds = array<i64: 1, 16>}, {pipeline_mode = #tpu.pipeline_mode<synchronous>, transform_indices = @transform_6, window_bounds = array<i64: 1, 1>}, {pipeline_mode = #tpu.pipeline_mode<synchronous>, transform_indices = @transform_7, window_bounds = array<i64: 1, 2>}]} {
    %c0 = arith.constant 0 : index
    %c0_0 = arith.constant 0 : index
    %0 = vector.load %arg2[%c0, %c0_0] : memref<32x144xf32, #tpu.memory_space<vmem>>, vector<32x144xf32>
    %c0_1 = arith.constant 0 : index
    %c0_2 = arith.constant 0 : index
    %c0_3 = arith.constant 0 : index
    %1 = vector.load %arg1[%c0_1, %c0_2, %c0_3] : memref<4x144x2xf32, #tpu.memory_space<vmem>>, vector<1x144x2xf32>
    %2 = vector.shape_cast %1 : vector<1x144x2xf32> to vector<144x2xf32>
    %cst = arith.constant dense<0.000000e+00> : vector<32x2xf32>
    %3 = tpu.matmul %0, %2, %cst {dimension_numbers = #tpu.dot_dimension_numbers<[1], [0], [0], [1], [0, 0, 1, 1], [], []>} : vector<32x144xf32>, vector<144x2xf32>, vector<32x2xf32> -> vector<32x2xf32>
    %c0_4 = arith.constant 0 : index
    %c0_5 = arith.constant 0 : index
    %4 = vector.load %arg3[%c0_4, %c0_5] : memref<32x1xf32, #tpu.memory_space<vmem>>, vector<32x1xf32>
    %5 = vector.broadcast %4 : vector<32x1xf32> to vector<32x2xf32>
    %6 = arith.addf %3, %5 : vector<32x2xf32>
    %cst_6 = arith.constant 0.000000e+00 : f32
    %7 = vector.broadcast %cst_6 : f32 to vector<32x2xf32>
    %8 = arith.maximumf %6, %7 : vector<32x2xf32>
    %c0_7 = arith.constant 0 : index
    %c0_8 = arith.constant 0 : index
    %9 = vector.load %arg2[%c0_7, %c0_8] : memref<32x144xf32, #tpu.memory_space<vmem>>, vector<32x144xf32>
    %c1 = arith.constant 1 : index
    %c0_9 = arith.constant 0 : index
    %c0_10 = arith.constant 0 : index
    %10 = vector.load %arg1[%c1, %c0_9, %c0_10] : memref<4x144x2xf32, #tpu.memory_space<vmem>>, vector<1x144x2xf32>
    %11 = vector.shape_cast %10 : vector<1x144x2xf32> to vector<144x2xf32>
    %cst_11 = arith.constant dense<0.000000e+00> : vector<32x2xf32>
    %12 = tpu.matmul %9, %11, %cst_11 {dimension_numbers = #tpu.dot_dimension_numbers<[1], [0], [0], [1], [0, 0, 1, 1], [], []>} : vector<32x144xf32>, vector<144x2xf32>, vector<32x2xf32> -> vector<32x2xf32>
    %c0_12 = arith.constant 0 : index
    %c0_13 = arith.constant 0 : index
    %13 = vector.load %arg3[%c0_12, %c0_13] : memref<32x1xf32, #tpu.memory_space<vmem>>, vector<32x1xf32>
    %14 = vector.broadcast %13 : vector<32x1xf32> to vector<32x2xf32>
    %15 = arith.addf %12, %14 : vector<32x2xf32>
    %cst_14 = arith.constant 0.000000e+00 : f32
    %16 = vector.broadcast %cst_14 : f32 to vector<32x2xf32>
    %17 = arith.maximumf %15, %16 : vector<32x2xf32>
    %18 = arith.maximumf %8, %17 : vector<32x2xf32>
    %c0_15 = arith.constant 0 : index
    %c0_16 = arith.constant 0 : index
    %19 = vector.load %arg2[%c0_15, %c0_16] : memref<32x144xf32, #tpu.memory_space<vmem>>, vector<32x144xf32>
    %c2 = arith.constant 2 : index
    %c0_17 = arith.constant 0 : index
    %c0_18 = arith.constant 0 : index
    %20 = vector.load %arg1[%c2, %c0_17, %c0_18] : memref<4x144x2xf32, #tpu.memory_space<vmem>>, vector<1x144x2xf32>
    %21 = vector.shape_cast %20 : vector<1x144x2xf32> to vector<144x2xf32>
    %cst_19 = arith.constant dense<0.000000e+00> : vector<32x2xf32>
    %22 = tpu.matmul %19, %21, %cst_19 {dimension_numbers = #tpu.dot_dimension_numbers<[1], [0], [0], [1], [0, 0, 1, 1], [], []>} : vector<32x144xf32>, vector<144x2xf32>, vector<32x2xf32> -> vector<32x2xf32>
    %c0_20 = arith.constant 0 : index
    %c0_21 = arith.constant 0 : index
    %23 = vector.load %arg3[%c0_20, %c0_21] : memref<32x1xf32, #tpu.memory_space<vmem>>, vector<32x1xf32>
    %24 = vector.broadcast %23 : vector<32x1xf32> to vector<32x2xf32>
    %25 = arith.addf %22, %24 : vector<32x2xf32>
    %cst_22 = arith.constant 0.000000e+00 : f32
    %26 = vector.broadcast %cst_22 : f32 to vector<32x2xf32>
    %27 = arith.maximumf %25, %26 : vector<32x2xf32>
    %28 = arith.maximumf %18, %27 : vector<32x2xf32>
    %c0_23 = arith.constant 0 : index
    %c0_24 = arith.constant 0 : index
    %29 = vector.load %arg2[%c0_23, %c0_24] : memref<32x144xf32, #tpu.memory_space<vmem>>, vector<32x144xf32>
    %c3 = arith.constant 3 : index
    %c0_25 = arith.constant 0 : index
    %c0_26 = arith.constant 0 : index
    %30 = vector.load %arg1[%c3, %c0_25, %c0_26] : memref<4x144x2xf32, #tpu.memory_space<vmem>>, vector<1x144x2xf32>
    %31 = vector.shape_cast %30 : vector<1x144x2xf32> to vector<144x2xf32>
    %cst_27 = arith.constant dense<0.000000e+00> : vector<32x2xf32>
    %32 = tpu.matmul %29, %31, %cst_27 {dimension_numbers = #tpu.dot_dimension_numbers<[1], [0], [0], [1], [0, 0, 1, 1], [], []>} : vector<32x144xf32>, vector<144x2xf32>, vector<32x2xf32> -> vector<32x2xf32>
    %c0_28 = arith.constant 0 : index
    %c0_29 = arith.constant 0 : index
    %33 = vector.load %arg3[%c0_28, %c0_29] : memref<32x1xf32, #tpu.memory_space<vmem>>, vector<32x1xf32>
    %34 = vector.broadcast %33 : vector<32x1xf32> to vector<32x2xf32>
    %35 = arith.addf %32, %34 : vector<32x2xf32>
    %cst_30 = arith.constant 0.000000e+00 : f32
    %36 = vector.broadcast %cst_30 : f32 to vector<32x2xf32>
    %37 = arith.maximumf %35, %36 : vector<32x2xf32>
    %38 = arith.maximumf %28, %37 : vector<32x2xf32>
    %c0_31 = arith.constant 0 : index
    %c0_32 = arith.constant 0 : index
    %39 = vector.load %arg4[%c0_31, %c0_32] : memref<16x32xf32, #tpu.memory_space<vmem>>, vector<16x32xf32>
    %cst_33 = arith.constant dense<0.000000e+00> : vector<16x2xf32>
    %40 = tpu.matmul %39, %38, %cst_33 {dimension_numbers = #tpu.dot_dimension_numbers<[1], [0], [0], [1], [0, 0, 1, 1], [], []>} : vector<16x32xf32>, vector<32x2xf32>, vector<16x2xf32> -> vector<16x2xf32>
    %c0_34 = arith.constant 0 : index
    %c0_35 = arith.constant 0 : index
    %41 = vector.load %arg5[%c0_34, %c0_35] : memref<16x1xf32, #tpu.memory_space<vmem>>, vector<16x1xf32>
    %42 = vector.broadcast %41 : vector<16x1xf32> to vector<16x2xf32>
    %43 = arith.addf %40, %42 : vector<16x2xf32>
    %cst_36 = arith.constant 0.000000e+00 : f32
    %44 = vector.broadcast %cst_36 : f32 to vector<16x2xf32>
    %45 = arith.maximumf %43, %44 : vector<16x2xf32>
    %c0_37 = arith.constant 0 : index
    %c0_38 = arith.constant 0 : index
    %46 = vector.load %arg6[%c0_37, %c0_38] : memref<1x16xf32, #tpu.memory_space<vmem>>, vector<1x16xf32>
    %cst_39 = arith.constant dense<0.000000e+00> : vector<1x2xf32>
    %47 = tpu.matmul %46, %45, %cst_39 {dimension_numbers = #tpu.dot_dimension_numbers<[1], [0], [0], [1], [0, 0, 1, 1], [], []>} : vector<1x16xf32>, vector<16x2xf32>, vector<1x2xf32> -> vector<1x2xf32>
    %c0_40 = arith.constant 0 : index
    %c0_41 = arith.constant 0 : index
    %48 = vector.load %arg7[%c0_40, %c0_41] : memref<1x1xf32, #tpu.memory_space<vmem>>, vector<1x1xf32>
    %49 = vector.broadcast %48 : vector<1x1xf32> to vector<1x2xf32>
    %50 = arith.addf %47, %49 : vector<1x2xf32>
    %cst_42 = arith.constant 0.000000e+00 : f32
    %51 = vector.broadcast %cst_42 : f32 to vector<1x2xf32>
    %52 = arith.subf %51, %50 : vector<1x2xf32>
    %53 = math.exp %52 : vector<1x2xf32>
    %cst_43 = arith.constant 1.000000e+00 : f32
    %54 = vector.broadcast %cst_43 : f32 to vector<1x2xf32>
    %55 = arith.addf %54, %53 : vector<1x2xf32>
    %cst_44 = arith.constant 1.000000e+00 : f32
    %56 = vector.broadcast %cst_44 : f32 to vector<1x2xf32>
    %57 = arith.divf %56, %55 : vector<1x2xf32>
    %c0_45 = arith.constant 0 : index
    %c0_46 = arith.constant 0 : index
    %58 = vector.load %arg8[%c0_45, %c0_46] : memref<1x2xf32, #tpu.memory_space<vmem>>, vector<1x2xf32>
    tpu.vector_store %arg8[%c0_45, %c0_46], %57 {strides = array<i32>} : memref<1x2xf32, #tpu.memory_space<vmem>>, vector<1x2xf32>,
    return
  }
  func.func @transform_0(%arg0: i32) -> (i32, i32, i32) {
    %c0_i32 = arith.constant 0 : i32
    %c0_i32_0 = arith.constant 0 : i32
    %c0_i32_1 = arith.constant 0 : i32
    %c0_i32_2 = arith.constant 0 : i32
    return %c0_i32, %c0_i32_0, %c0_i32_1 : i32, i32, i32
  }
  func.func @transform_1(%arg0: i32) -> (i32, i32) {
    %c0_i32 = arith.constant 0 : i32
    %c0_i32_0 = arith.constant 0 : i32
    %c0_i32_1 = arith.constant 0 : i32
    return %c0_i32, %c0_i32_0 : i32, i32
  }
  func.func @transform_2(%arg0: i32) -> (i32, i32) {
    %c0_i32 = arith.constant 0 : i32
    %c0_i32_0 = arith.constant 0 : i32
    %c0_i32_1 = arith.constant 0 : i32
    return %c0_i32, %c0_i32_0 : i32, i32
  }
  func.func @transform_3(%arg0: i32) -> (i32, i32) {
    %c0_i32 = arith.constant 0 : i32
    %c0_i32_0 = arith.constant 0 : i32
    %c0_i32_1 = arith.constant 0 : i32
    return %c0_i32, %c0_i32_0 : i32, i32
  }
  func.func @transform_4(%arg0: i32) -> (i32, i32) {
    %c0_i32 = arith.constant 0 : i32
    %c0_i32_0 = arith.constant 0 : i32
    %c0_i32_1 = arith.constant 0 : i32
    return %c0_i32, %c0_i32_0 : i32, i32
  }
  func.func @transform_5(%arg0: i32) -> (i32, i32) {
    %c0_i32 = arith.constant 0 : i32
    %c0_i32_0 = arith.constant 0 : i32
    %c0_i32_1 = arith.constant 0 : i32
    return %c0_i32, %c0_i32_0 : i32, i32
  }
  func.func @transform_6(%arg0: i32) -> (i32, i32) {
    %c0_i32 = arith.constant 0 : i32
    %c0_i32_0 = arith.constant 0 : i32
    %c0_i32_1 = arith.constant 0 : i32
    return %c0_i32, %c0_i32_0 : i32, i32
  }
  func.func @transform_7(%arg0: i32) -> (i32, i32) {
    %c0_i32 = arith.constant 0 : i32
    %c0_i32_0 = arith.constant 0 : i32
    %c0_i32_1 = arith.constant 0 : i32
    return %c0_i32, %c0_i32_0 : i32, i32
  }
}

</mosaic_0001>

<bundles_post_ra>
// kernel: eonss_forward.7
= control target key start
LH: loop header
LB: loop body
LE: loop exit
PB: predicated region body
PF: predicated region fallthrough
CT: control target
= control target key end

     0   :  { %s1696_s12 = smov 0   ;;  %s1698_s13 = smov 0   ;;  %s2280_s0 = inlined_call_operand.vmem [shape: f32[4,75], index: 0, kind: input, shape index: {}]   ;;  %s2281_s1 = inlined_call_operand.vmem [shape: f32[75,28800], index: 1, kind: input, shape index: {}]   ;;  %s2282_s2 = inlined_call_operand.vmem [shape: f32[4,1], index: 2, kind: input, shape index: {}]   ;;  %s2283_s3 = inlined_call_operand.vmem [shape: f32[4,28800], index: 3, kind: output, shape index: {}]  }
   0x1   :  { %s1700_s14 = smov 0  }
   0x2 LB: > { %s1378_s15 = sadd.s32 4294967295, %s1669_s14   ;;  %s1713_s16 = sadd.s32 1, %s1669_s14   ;;  %s1669_s14 = sphi %s1700_s14, %s2288_s14   ;;  %s1665_s13 = sphi %s1698_s13, %s2287_s13   ;;  %s1661_s12 = sphi %s1696_s12, %s2286_s12  }
   0x3   : > { %s38_s17 = ssub.s32 %s1669_s14, %s1713_s16  ;;  %s41_s18 = sadd.s32 1, %s1665_s13 }
   0x4   : > { %p39_p0 = scmp.eq.s32.totalorder %s38_s17, 0  ;;  %p48_p1 = scmp.ne.s32.totalorder %s1665_s13, %s1661_s12 }
   0x5   : > { %p49_p2 = scmp.eq.s32.totalorder %s1669_s14, 0  ;;  %p1381_p4 = scmp.ge.s32.totalorder %s1669_s14, 15 }
   0x6   : > { %s1722_s19 = scalar_select %p39_p0, %s1665_s13, %s41_s18  }
   0x7   : > { %p50_p3 = por %p49_p2, %p48_p1  ;;  %127 = sbr.rel (%p1381_p4) target bundleno = 94 (0x5e), region = 24 }
   0xe   : > { %130 = sbr.rel (!%p50_p3) target bundleno = 94 (0x5e), region = 28  ;;  %s132_s20 = sand.u32 (%p50_p3), 1, %s1665_s13  }
   0xf   : > { %s1410_s21 = smul.u32 (%p50_p3), 120, %s1669_s14 }
  0x10   : > { %s1615_s22 = smul.u32 (%p50_p3), 1200, %s132_s20 }
  0x11   : > { %s1730_s25 = scalar_lea.vmem (%p50_p3), %s2281_s1, %s1410_s21 }
  0x12   : > { %v150_v0 = vld [vmem:[%s1730_s25] sm:$0xff] (%p50_p3)  ;;  %v152_v1 = vld [vmem:[%s1730_s25 + $0x8] sm:$0xff] (%p50_p3)  ;;  %v154_v2 = vld [vmem:[%s1730_s25 + $0x10] sm:$0xff] (%p50_p3)  ;;  %s1735_s26 = scalar_lea.vmem (%p50_p3), [#allocation2], %s1615_s22 }
  0x13   : > { %151 = vst [vmem:[%s1735_s26] sm:$0xff] (%p50_p3), %v150_v0  ;;  %153 = vst [vmem:[%s1735_s26 + $0x8] sm:$0xff] (%p50_p3), %v152_v1  ;;  %v156_v3 = vld [vmem:[%s1730_s25 + $0x18] sm:$0xff] (%p50_p3)  ;;  %v158_v4 = vld [vmem:[%s1730_s25 + $0x20] sm:$0xff] (%p50_p3) }
  0x14   : > { %155 = vst [vmem:[%s1735_s26 + $0x10] sm:$0xff] (%p50_p3), %v154_v2  ;;  %v160_v5 = vld [vmem:[%s1730_s25 + $0x28] sm:$0xff] (%p50_p3)  ;;  %157 = vst [vmem:[%s1735_s26 + $0x18] sm:$0xff] (%p50_p3), %v156_v3  ;;  %v162_v6 = vld [vmem:[%s1730_s25 + $0x30] sm:$0xff] (%p50_p3) }
  0x15   : > { %159 = vst [vmem:[%s1735_s26 + $0x20] sm:$0xff] %v158_v4  ;;  %161 = vst [vmem:[%s1735_s26 + $0x28] sm:$0xff] %v160_v5  ;;  %v164_v7 = vld [vmem:[%s1730_s25 + $0x38] sm:$0xff]  ;;  %v166_v8 = vld [vmem:[%s1730_s25 + $0x40] sm:$0xff] }
  0x16   : > { %163 = vst [vmem:[%s1735_s26 + $0x30] sm:$0xff] %v162_v6  ;;  %165 = vst [vmem:[%s1735_s26 + $0x38] sm:$0xff] %v164_v7  ;;  %v168_v9 = vld [vmem:[%s1730_s25 + $0x48] sm:$0xff]  ;;  %v170_v10 = vld [vmem:[%s1730_s25 + $0x50] sm:$0xff] }
  0x17   : > { %167 = vst [vmem:[%s1735_s26 + $0x40] sm:$0xff] %v166_v8  ;;  %v172_v11 = vld [vmem:[%s1730_s25 + $0x58] sm:$0xff]  ;;  %169 = vst [vmem:[%s1735_s26 + $0x48] sm:$0xff] %v168_v9  ;;  %v174_v12 = vld [vmem:[%s1730_s25 + $0x60] sm:$0xff] }
  0x18   : > { %171 = vst [vmem:[%s1735_s26 + $0x50] sm:$0xff] %v170_v10  ;;  %173 = vst [vmem:[%s1735_s26 + $0x58] sm:$0xff] %v172_v11  ;;  %v176_v13 = vld [vmem:[%s1730_s25 + $0x68] sm:$0xff]  ;;  %v178_v14 = vld [vmem:[%s1730_s25 + $0x70] sm:$0xff] }
  0x19   : > { %175 = vst [vmem:[%s1735_s26 + $0x60] sm:$0xff] %v174_v12  ;;  %177 = vst [vmem:[%s1735_s26 + $0x68] sm:$0xff] %v176_v13  ;;  %v180_v15 = vld [vmem:[%s1730_s25 + $0x708] sm:$0xff]  ;;  %v182_v16 = vld [vmem:[%s1730_s25 + $0x710] sm:$0xff] }
  0x1a   : > { %179 = vst [vmem:[%s1735_s26 + $0x70] sm:$0xff] %v178_v14  ;;  %v184_v17 = vld [vmem:[%s1730_s25 + $0x718] sm:$0xff]  ;;  %181 = vst [vmem:[%s1735_s26 + $0x78] sm:$0xff] %v180_v15  ;;  %v186_v18 = vld [vmem:[%s1730_s25 + $0x720] sm:$0xff] }
  0x1b   : > { %183 = vst [vmem:[%s1735_s26 + $0x80] sm:$0xff] %v182_v16  ;;  %185 = vst [vmem:[%s1735_s26 + $0x88] sm:$0xff] %v184_v17  ;;  %v188_v19 = vld [vmem:[%s1730_s25 + $0x728] sm:$0xff]  ;;  %v190_v20 = vld [vmem:[%s1730_s25 + $0x730] sm:$0xff] }
  0x1c   : > { %187 = vst [vmem:[%s1735_s26 + $0x90] sm:$0xff] %v186_v18  ;;  %189 = vst [vmem:[%s1735_s26 + $0x98] sm:$0xff] %v188_v19  ;;  %v192_v21 = vld [vmem:[%s1730_s25 + $0x738] sm:$0xff]  ;;  %v194_v22 = vld [vmem:[%s1730_s25 + $0x740] sm:$0xff] }
  0x1d   : > { %191 = vst [vmem:[%s1735_s26 + $0xa0] sm:$0xff] %v190_v20  ;;  %v196_v23 = vld [vmem:[%s1730_s25 + $0x748] sm:$0xff]  ;;  %193 = vst [vmem:[%s1735_s26 + $0xa8] sm:$0xff] %v192_v21  ;;  %v198_v24 = vld [vmem:[%s1730_s25 + $0x750] sm:$0xff] }
  0x1e   : > { %195 = vst [vmem:[%s1735_s26 + $0xb0] sm:$0xff] %v194_v22  ;;  %197 = vst [vmem:[%s1735_s26 + $0xb8] sm:$0xff] %v196_v23  ;;  %v200_v25 = vld [vmem:[%s1730_s25 + $0x758] sm:$0xff]  ;;  %v202_v26 = vld [vmem:[%s1730_s25 + $0x760] sm:$0xff] }
  0x1f   : > { %199 = vst [vmem:[%s1735_s26 + $0xc0] sm:$0xff] %v198_v24  ;;  %201 = vst [vmem:[%s1735_s26 + $0xc8] sm:$0xff] %v200_v25  ;;  %v204_v27 = vld [vmem:[%s1730_s25 + $0x768] sm:$0xff]  ;;  %v206_v28 = vld [vmem:[%s1730_s25 + $0x770] sm:$0xff] }
  0x20   : > { %203 = vst [vmem:[%s1735_s26 + $0xd0] sm:$0xff] %v202_v26  ;;  %v208_v29 = vld [vmem:[%s1730_s25 + $0x778] sm:$0xff]  ;;  %205 = vst [vmem:[%s1735_s26 + $0xd8] sm:$0xff] %v204_v27  ;;  %v210_v30 = vld [vmem:[%s1730_s25 + $0xe10] sm:$0xff] }
  0x21   : > { %207 = vst [vmem:[%s1735_s26 + $0xe0] sm:$0xff] %v206_v28  ;;  %209 = vst [vmem:[%s1735_s26 + $0xe8] sm:$0xff] %v208_v29  ;;  %v212_v31 = vld [vmem:[%s1730_s25 + $0xe18] sm:$0xff]  ;;  %v214_v32 = vld [vmem:[%s1730_s25 + $0xe20] sm:$0xff] }
  0x22   : > { %211 = vst [vmem:[%s1735_s26 + $0xf0] sm:$0xff] %v210_v30  ;;  %213 = vst [vmem:[%s1735_s26 + $0xf8] sm:$0xff] %v212_v31  ;;  %v216_v33 = vld [vmem:[%s1730_s25 + $0xe28] sm:$0xff]  ;;  %v218_v34 = vld [vmem:[%s1730_s25 + $0xe30] sm:$0xff] }
  0x23   : > { %215 = vst [vmem:[%s1735_s26 + $0x100] sm:$0xff] %v214_v32  ;;  %v220_v35 = vld [vmem:[%s1730_s25 + $0xe38] sm:$0xff]  ;;  %217 = vst [vmem:[%s1735_s26 + $0x108] sm:$0xff] %v216_v33  ;;  %v222_v36 = vld [vmem:[%s1730_s25 + $0xe40] sm:$0xff] }
  0x24   : > { %219 = vst [vmem:[%s1735_s26 + $0x110] sm:$0xff] %v218_v34  ;;  %221 = vst [vmem:[%s1735_s26 + $0x118] sm:$0xff] %v220_v35  ;;  %v224_v37 = vld [vmem:[%s1730_s25 + $0xe48] sm:$0xff]  ;;  %v226_v38 = vld [vmem:[%s1730_s25 + $0xe50] sm:$0xff] }
  0x25   : > { %223 = vst [vmem:[%s1735_s26 + $0x120] sm:$0xff] %v222_v36  ;;  %225 = vst [vmem:[%s1735_s26 + $0x128] sm:$0xff] %v224_v37  ;;  %v228_v39 = vld [vmem:[%s1730_s25 + $0xe58] sm:$0xff]  ;;  %v230_v40 = vld [vmem:[%s1730_s25 + $0xe60] sm:$0xff] }
  0x26   : > { %227 = vst [vmem:[%s1735_s26 + $0x130] sm:$0xff] %v226_v38  ;;  %v232_v41 = vld [vmem:[%s1730_s25 + $0xe68] sm:$0xff]  ;;  %229 = vst [vmem:[%s1735_s26 + $0x138] sm:$0xff] %v228_v39  ;;  %v234_v42 = vld [vmem:[%s1730_s25 + $0xe70] sm:$0xff] }
  0x27   : > { %231 = vst [vmem:[%s1735_s26 + $0x140] sm:$0xff] %v230_v40  ;;  %233 = vst [vmem:[%s1735_s26 + $0x148] sm:$0xff] %v232_v41  ;;  %v236_v43 = vld [vmem:[%s1730_s25 + $0xe78] sm:$0xff]  ;;  %v238_v44 = vld [vmem:[%s1730_s25 + $0xe80] sm:$0xff] }
  0x28   : > { %235 = vst [vmem:[%s1735_s26 + $0x150] sm:$0xff] %v234_v42  ;;  %237 = vst [vmem:[%s1735_s26 + $0x158] sm:$0xff] %v236_v43  ;;  %v240_v45 = vld [vmem:[%s1730_s25 + $0x1518] sm:$0xff]  ;;  %v242_v46 = vld [vmem:[%s1730_s25 + $0x1520] sm:$0xff] }
  0x29   : > { %239 = vst [vmem:[%s1735_s26 + $0x160] sm:$0xff] %v238_v44  ;;  %v244_v47 = vld [vmem:[%s1730_s25 + $0x1528] sm:$0xff]  ;;  %241 = vst [vmem:[%s1735_s26 + $0x168] sm:$0xff] %v240_v45  ;;  %v246_v48 = vld [vmem:[%s1730_s25 + $0x1530] sm:$0xff] }
  0x2a   : > { %243 = vst [vmem:[%s1735_s26 + $0x170] sm:$0xff] %v242_v46  ;;  %245 = vst [vmem:[%s1735_s26 + $0x178] sm:$0xff] %v244_v47  ;;  %v248_v49 = vld [vmem:[%s1730_s25 + $0x1538] sm:$0xff]  ;;  %v250_v50 = vld [vmem:[%s1730_s25 + $0x1540] sm:$0xff] }
  0x2b   : > { %247 = vst [vmem:[%s1735_s26 + $0x180] sm:$0xff] %v246_v48  ;;  %249 = vst [vmem:[%s1735_s26 + $0x188] sm:$0xff] %v248_v49  ;;  %v252_v51 = vld [vmem:[%s1730_s25 + $0x1548] sm:$0xff]  ;;  %v254_v52 = vld [vmem:[%s1730_s25 + $0x1550] sm:$0xff] }
  0x2c   : > { %251 = vst [vmem:[%s1735_s26 + $0x190] sm:$0xff] %v250_v50  ;;  %v256_v53 = vld [vmem:[%s1730_s25 + $0x1558] sm:$0xff]  ;;  %253 = vst [vmem:[%s1735_s26 + $0x198] sm:$0xff] %v252_v51  ;;  %v258_v54 = vld [vmem:[%s1730_s25 + $0x1560] sm:$0xff] }
  0x2d   : > { %255 = vst [vmem:[%s1735_s26 + $0x1a0] sm:$0xff] %v254_v52  ;;  %257 = vst [vmem:[%s1735_s26 + $0x1a8] sm:$0xff] %v256_v53  ;;  %v260_v55 = vld [vmem:[%s1730_s25 + $0x1568] sm:$0xff]  ;;  %v262_v56 = vld [vmem:[%s1730_s25 + $0x1570] sm:$0xff] }
  0x2e   : > { %259 = vst [vmem:[%s1735_s26 + $0x1b0] sm:$0xff] %v258_v54  ;;  %261 = vst [vmem:[%s1735_s26 + $0x1b8] sm:$0xff] %v260_v55  ;;  %v264_v57 = vld [vmem:[%s1730_s25 + $0x1578] sm:$0xff]  ;;  %v266_v58 = vld [vmem:[%s1730_s25 + $0x1580] sm:$0xff] }
  0x2f   : > { %263 = vst [vmem:[%s1735_s26 + $0x1c0] sm:$0xff] %v262_v56  ;;  %v268_v59 = vld [vmem:[%s1730_s25 + $0x1588] sm:$0xff]  ;;  %265 = vst [vmem:[%s1735_s26 + $0x1c8] sm:$0xff] %v264_v57  ;;  %v270_v60 = vld [vmem:[%s1730_s25 + $0x1c20] sm:$0xff] }
  0x30   : > { %267 = vst [vmem:[%s1735_s26 + $0x1d0] sm:$0xff] %v266_v58  ;;  %269 = vst [vmem:[%s1735_s26 + $0x1d8] sm:$0xff] %v268_v59  ;;  %v272_v61 = vld [vmem:[%s1730_s25 + $0x1c28] sm:$0xff]  ;;  %v274_v62 = vld [vmem:[%s1730_s25 + $0x1c30] sm:$0xff] }
  0x31   : > { %271 = vst [vmem:[%s1735_s26 + $0x1e0] sm:$0xff] %v270_v60  ;;  %273 = vst [vmem:[%s1735_s26 + $0x1e8] sm:$0xff] %v272_v61  ;;  %v276_v63 = vld [vmem:[%s1730_s25 + $0x1c38] sm:$0xff]  ;;  %v278_v0 = vld [vmem:[%s1730_s25 + $0x1c40] sm:$0xff] }
  0x32   : > { %275 = vst [vmem:[%s1735_s26 + $0x1f0] sm:$0xff] %v274_v62  ;;  %v280_v1 = vld [vmem:[%s1730_s25 + $0x1c48] sm:$0xff]  ;;  %277 = vst [vmem:[%s1735_s26 + $0x1f8] sm:$0xff] %v276_v63  ;;  %v282_v2 = vld [vmem:[%s1730_s25 + $0x1c50] sm:$0xff] }
  0x33   : > { %279 = vst [vmem:[%s1735_s26 + $0x200] sm:$0xff] %v278_v0  ;;  %281 = vst [vmem:[%s1735_s26 + $0x208] sm:$0xff] %v280_v1  ;;  %v284_v3 = vld [vmem:[%s1730_s25 + $0x1c58] sm:$0xff]  ;;  %v286_v4 = vld [vmem:[%s1730_s25 + $0x1c60] sm:$0xff] }
  0x34   : > { %283 = vst [vmem:[%s1735_s26 + $0x210] sm:$0xff] %v282_v2  ;;  %285 = vst [vmem:[%s1735_s26 + $0x218] sm:$0xff] %v284_v3  ;;  %v288_v5 = vld [vmem:[%s1730_s25 + $0x1c68] sm:$0xff]  ;;  %v290_v6 = vld [vmem:[%s1730_s25 + $0x1c70] sm:$0xff] }
  0x35   : > { %287 = vst [vmem:[%s1735_s26 + $0x220] sm:$0xff] %v286_v4  ;;  %v292_v7 = vld [vmem:[%s1730_s25 + $0x1c78] sm:$0xff]  ;;  %289 = vst [vmem:[%s1735_s26 + $0x228] sm:$0xff] %v288_v5  ;;  %v294_v8 = vld [vmem:[%s1730_s25 + $0x1c80] sm:$0xff] }
  0x36   : > { %291 = vst [vmem:[%s1735_s26 + $0x230] sm:$0xff] %v290_v6  ;;  %293 = vst [vmem:[%s1735_s26 + $0x238] sm:$0xff] %v292_v7  ;;  %v296_v9 = vld [vmem:[%s1730_s25 + $0x1c88] sm:$0xff]  ;;  %v298_v10 = vld [vmem:[%s1730_s25 + $0x1c90] sm:$0xff] }
  0x37   : > { %295 = vst [vmem:[%s1735_s26 + $0x240] sm:$0xff] %v294_v8  ;;  %297 = vst [vmem:[%s1735_s26 + $0x248] sm:$0xff] %v296_v9  ;;  %v300_v11 = vld [vmem:[%s1730_s25 + $0x2328] sm:$0xff]  ;;  %v302_v12 = vld [vmem:[%s1730_s25 + $0x2330] sm:$0xff] }
  0x38   : > { %299 = vst [vmem:[%s1735_s26 + $0x250] sm:$0xff] %v298_v10  ;;  %v304_v13 = vld [vmem:[%s1730_s25 + $0x2338] sm:$0xff]  ;;  %301 = vst [vmem:[%s1735_s26 + $0x258] sm:$0xff] %v300_v11  ;;  %v306_v14 = vld [vmem:[%s1730_s25 + $0x2340] sm:$0xff] }
  0x39   : > { %303 = vst [vmem:[%s1735_s26 + $0x260] sm:$0xff] %v302_v12  ;;  %305 = vst [vmem:[%s1735_s26 + $0x268] sm:$0xff] %v304_v13  ;;  %v308_v15 = vld [vmem:[%s1730_s25 + $0x2348] sm:$0xff]  ;;  %v310_v16 = vld [vmem:[%s1730_s25 + $0x2350] sm:$0xff] }
  0x3a   : > { %307 = vst [vmem:[%s1735_s26 + $0x270] sm:$0xff] %v306_v14  ;;  %309 = vst [vmem:[%s1735_s26 + $0x278] sm:$0xff] %v308_v15  ;;  %v312_v17 = vld [vmem:[%s1730_s25 + $0x2358] sm:$0xff]  ;;  %v314_v18 = vld [vmem:[%s1730_s25 + $0x2360] sm:$0xff] }
  0x3b   : > { %311 = vst [vmem:[%s1735_s26 + $0x280] sm:$0xff] %v310_v16  ;;  %v316_v19 = vld [vmem:[%s1730_s25 + $0x2368] sm:$0xff]  ;;  %313 = vst [vmem:[%s1735_s26 + $0x288] sm:$0xff] %v312_v17  ;;  %v318_v20 = vld [vmem:[%s1730_s25 + $0x2370] sm:$0xff] }
  0x3c   : > { %315 = vst [vmem:[%s1735_s26 + $0x290] sm:$0xff] %v314_v18  ;;  %317 = vst [vmem:[%s1735_s26 + $0x298] sm:$0xff] %v316_v19  ;;  %v320_v21 = vld [vmem:[%s1730_s25 + $0x2378] sm:$0xff]  ;;  %v322_v22 = vld [vmem:[%s1730_s25 + $0x2380] sm:$0xff] }
  0x3d   : > { %319 = vst [vmem:[%s1735_s26 + $0x2a0] sm:$0xff] %v318_v20  ;;  %321 = vst [vmem:[%s1735_s26 + $0x2a8] sm:$0xff] %v320_v21  ;;  %v324_v23 = vld [vmem:[%s1730_s25 + $0x2388] sm:$0xff]  ;;  %v326_v24 = vld [vmem:[%s1730_s25 + $0x2390] sm:$0xff] }
  0x3e   : > { %323 = vst [vmem:[%s1735_s26 + $0x2b0] sm:$0xff] %v322_v22  ;;  %v328_v25 = vld [vmem:[%s1730_s25 + $0x2398] sm:$0xff]  ;;  %325 = vst [vmem:[%s1735_s26 + $0x2b8] sm:$0xff] %v324_v23  ;;  %v330_v26 = vld [vmem:[%s1730_s25 + $0x2a30] sm:$0xff] }
  0x3f   : > { %327 = vst [vmem:[%s1735_s26 + $0x2c0] sm:$0xff] %v326_v24  ;;  %329 = vst [vmem:[%s1735_s26 + $0x2c8] sm:$0xff] %v328_v25  ;;  %v332_v27 = vld [vmem:[%s1730_s25 + $0x2a38] sm:$0xff]  ;;  %v334_v28 = vld [vmem:[%s1730_s25 + $0x2a40] sm:$0xff] }
  0x40   : > { %331 = vst [vmem:[%s1735_s26 + $0x2d0] sm:$0xff] %v330_v26  ;;  %333 = vst [vmem:[%s1735_s26 + $0x2d8] sm:$0xff] %v332_v27  ;;  %v336_v29 = vld [vmem:[%s1730_s25 + $0x2a48] sm:$0xff]  ;;  %v338_v30 = vld [vmem:[%s1730_s25 + $0x2a50] sm:$0xff] }
  0x41   : > { %335 = vst [vmem:[%s1735_s26 + $0x2e0] sm:$0xff] %v334_v28  ;;  %v340_v31 = vld [vmem:[%s1730_s25 + $0x2a58] sm:$0xff]  ;;  %337 = vst [vmem:[%s1735_s26 + $0x2e8] sm:$0xff] %v336_v29  ;;  %v342_v32 = vld [vmem:[%s1730_s25 + $0x2a60] sm:$0xff] }
  0x42   : > { %339 = vst [vmem:[%s1735_s26 + $0x2f0] sm:$0xff] %v338_v30  ;;  %341 = vst [vmem:[%s1735_s26 + $0x2f8] sm:$0xff] %v340_v31  ;;  %v344_v33 = vld [vmem:[%s1730_s25 + $0x2a68] sm:$0xff]  ;;  %v346_v34 = vld [vmem:[%s1730_s25 + $0x2a70] sm:$0xff] }
  0x43   : > { %343 = vst [vmem:[%s1735_s26 + $0x300] sm:$0xff] %v342_v32  ;;  %345 = vst [vmem:[%s1735_s26 + $0x308] sm:$0xff] %v344_v33  ;;  %v348_v35 = vld [vmem:[%s1730_s25 + $0x2a78] sm:$0xff]  ;;  %v350_v36 = vld [vmem:[%s1730_s25 + $0x2a80] sm:$0xff] }
  0x44   : > { %347 = vst [vmem:[%s1735_s26 + $0x310] sm:$0xff] %v346_v34  ;;  %v352_v37 = vld [vmem:[%s1730_s25 + $0x2a88] sm:$0xff]  ;;  %349 = vst [vmem:[%s1735_s26 + $0x318] sm:$0xff] %v348_v35  ;;  %v354_v38 = vld [vmem:[%s1730_s25 + $0x2a90] sm:$0xff] }
  0x45   : > { %351 = vst [vmem:[%s1735_s26 + $0x320] sm:$0xff] %v350_v36  ;;  %353 = vst [vmem:[%s1735_s26 + $0x328] sm:$0xff] %v352_v37  ;;  %v356_v39 = vld [vmem:[%s1730_s25 + $0x2a98] sm:$0xff]  ;;  %v358_v40 = vld [vmem:[%s1730_s25 + $0x2aa0] sm:$0xff] }
  0x46   : > { %355 = vst [vmem:[%s1735_s26 + $0x330] sm:$0xff] %v354_v38  ;;  %357 = vst [vmem:[%s1735_s26 + $0x338] sm:$0xff] %v356_v39  ;;  %v360_v41 = vld [vmem:[%s1730_s25 + $0x3138] sm:$0xff]  ;;  %v362_v42 = vld [vmem:[%s1730_s25 + $0x3140] sm:$0xff] }
  0x47   : > { %359 = vst [vmem:[%s1735_s26 + $0x340] sm:$0xff] %v358_v40  ;;  %v364_v43 = vld [vmem:[%s1730_s25 + $0x3148] sm:$0xff]  ;;  %361 = vst [vmem:[%s1735_s26 + $0x348] sm:$0xff] %v360_v41  ;;  %v366_v44 = vld [vmem:[%s1730_s25 + $0x3150] sm:$0xff] }
  0x48   : > { %363 = vst [vmem:[%s1735_s26 + $0x350] sm:$0xff] %v362_v42  ;;  %365 = vst [vmem:[%s1735_s26 + $0x358] sm:$0xff] %v364_v43  ;;  %v368_v45 = vld [vmem:[%s1730_s25 + $0x3158] sm:$0xff]  ;;  %v370_v46 = vld [vmem:[%s1730_s25 + $0x3160] sm:$0xff] }
  0x49   : > { %367 = vst [vmem:[%s1735_s26 + $0x360] sm:$0xff] %v366_v44  ;;  %369 = vst [vmem:[%s1735_s26 + $0x368] sm:$0xff] %v368_v45  ;;  %v372_v47 = vld [vmem:[%s1730_s25 + $0x3168] sm:$0xff]  ;;  %v374_v48 = vld [vmem:[%s1730_s25 + $0x3170] sm:$0xff] }
  0x4a   : > { %371 = vst [vmem:[%s1735_s26 + $0x370] sm:$0xff] %v370_v46  ;;  %v376_v49 = vld [vmem:[%s1730_s25 + $0x3178] sm:$0xff]  ;;  %373 = vst [vmem:[%s1735_s26 + $0x378] sm:$0xff] %v372_v47  ;;  %v378_v50 = vld [vmem:[%s1730_s25 + $0x3180] sm:$0xff] }
  0x4b   : > { %375 = vst [vmem:[%s1735_s26 + $0x380] sm:$0xff] %v374_v48  ;;  %377 = vst [vmem:[%s1735_s26 + $0x388] sm:$0xff] %v376_v49  ;;  %v380_v51 = vld [vmem:[%s1730_s25 + $0x3188] sm:$0xff]  ;;  %v382_v52 = vld [vmem:[%s1730_s25 + $0x3190] sm:$0xff] }
  0x4c   : > { %379 = vst [vmem:[%s1735_s26 + $0x390] sm:$0xff] %v378_v50  ;;  %381 = vst [vmem:[%s1735_s26 + $0x398] sm:$0xff] %v380_v51  ;;  %v384_v53 = vld [vmem:[%s1730_s25 + $0x3198] sm:$0xff]  ;;  %v386_v54 = vld [vmem:[%s1730_s25 + $0x31a0] sm:$0xff] }
  0x4d   : > { %383 = vst [vmem:[%s1735_s26 + $0x3a0] sm:$0xff] %v382_v52  ;;  %v388_v55 = vld [vmem:[%s1730_s25 + $0x31a8] sm:$0xff]  ;;  %385 = vst [vmem:[%s1735_s26 + $0x3a8] sm:$0xff] %v384_v53  ;;  %v390_v56 = vld [vmem:[%s1730_s25 + $0x3840] sm:$0xff] }
  0x4e   : > { %387 = vst [vmem:[%s1735_s26 + $0x3b0] sm:$0xff] %v386_v54  ;;  %389 = vst [vmem:[%s1735_s26 + $0x3b8] sm:$0xff] %v388_v55  ;;  %v392_v57 = vld [vmem:[%s1730_s25 + $0x3848] sm:$0xff]  ;;  %v394_v58 = vld [vmem:[%s1730_s25 + $0x3850] sm:$0xff] }
  0x4f   : > { %391 = vst [vmem:[%s1735_s26 + $0x3c0] sm:$0xff] %v390_v56  ;;  %393 = vst [vmem:[%s1735_s26 + $0x3c8] sm:$0xff] %v392_v57  ;;  %v396_v59 = vld [vmem:[%s1730_s25 + $0x3858] sm:$0xff]  ;;  %v398_v60 = vld [vmem:[%s1730_s25 + $0x3860] sm:$0xff] }
  0x50   : > { %395 = vst [vmem:[%s1735_s26 + $0x3d0] sm:$0xff] %v394_v58  ;;  %v400_v61 = vld [vmem:[%s1730_s25 + $0x3868] sm:$0xff]  ;;  %397 = vst [vmem:[%s1735_s26 + $0x3d8] sm:$0xff] %v396_v59  ;;  %v402_v62 = vld [vmem:[%s1730_s25 + $0x3870] sm:$0xff] }
  0x51   : > { %399 = vst [vmem:[%s1735_s26 + $0x3e0] sm:$0xff] %v398_v60  ;;  %401 = vst [vmem:[%s1735_s26 + $0x3e8] sm:$0xff] %v400_v61  ;;  %v404_v63 = vld [vmem:[%s1730_s25 + $0x3878] sm:$0xff]  ;;  %v406_v0 = vld [vmem:[%s1730_s25 + $0x3880] sm:$0xff] }
  0x52   : > { %403 = vst [vmem:[%s1735_s26 + $0x3f0] sm:$0xff] %v402_v62  ;;  %405 = vst [vmem:[%s1735_s26 + $0x3f8] sm:$0xff] %v404_v63  ;;  %v408_v1 = vld [vmem:[%s1730_s25 + $0x3888] sm:$0xff]  ;;  %v410_v2 = vld [vmem:[%s1730_s25 + $0x3890] sm:$0xff] }
  0x53   : > { %407 = vst [vmem:[%s1735_s26 + $0x400] sm:$0xff] %v406_v0  ;;  %v412_v3 = vld [vmem:[%s1730_s25 + $0x3898] sm:$0xff]  ;;  %409 = vst [vmem:[%s1735_s26 + $0x408] sm:$0xff] %v408_v1  ;;  %v414_v4 = vld [vmem:[%s1730_s25 + $0x38a0] sm:$0xff] }
  0x54   : > { %411 = vst [vmem:[%s1735_s26 + $0x410] sm:$0xff] %v410_v2  ;;  %413 = vst [vmem:[%s1735_s26 + $0x418] sm:$0xff] %v412_v3  ;;  %v416_v5 = vld [vmem:[%s1730_s25 + $0x38a8] sm:$0xff]  ;;  %v418_v6 = vld [vmem:[%s1730_s25 + $0x38b0] sm:$0xff] }
  0x55   : > { %415 = vst [vmem:[%s1735_s26 + $0x420] sm:$0xff] %v414_v4  ;;  %417 = vst [vmem:[%s1735_s26 + $0x428] sm:$0xff] %v416_v5  ;;  %v420_v7 = vld [vmem:[%s1730_s25 + $0x3f48] sm:$0xff]  ;;  %v422_v8 = vld [vmem:[%s1730_s25 + $0x3f50] sm:$0xff] }
  0x56   : > { %419 = vst [vmem:[%s1735_s26 + $0x430] sm:$0xff] %v418_v6  ;;  %v424_v9 = vld [vmem:[%s1730_s25 + $0x3f58] sm:$0xff]  ;;  %421 = vst [vmem:[%s1735_s26 + $0x438] sm:$0xff] %v420_v7  ;;  %v426_v10 = vld [vmem:[%s1730_s25 + $0x3f60] sm:$0xff] }
  0x57   : > { %423 = vst [vmem:[%s1735_s26 + $0x440] sm:$0xff] %v422_v8  ;;  %425 = vst [vmem:[%s1735_s26 + $0x448] sm:$0xff] %v424_v9  ;;  %v428_v11 = vld [vmem:[%s1730_s25 + $0x3f68] sm:$0xff]  ;;  %v430_v12 = vld [vmem:[%s1730_s25 + $0x3f70] sm:$0xff] }
  0x58   : > { %427 = vst [vmem:[%s1735_s26 + $0x450] sm:$0xff] %v426_v10  ;;  %429 = vst [vmem:[%s1735_s26 + $0x458] sm:$0xff] %v428_v11  ;;  %v432_v13 = vld [vmem:[%s1730_s25 + $0x3f78] sm:$0xff]  ;;  %v434_v14 = vld [vmem:[%s1730_s25 + $0x3f80] sm:$0xff] }
  0x59   : > { %431 = vst [vmem:[%s1735_s26 + $0x460] sm:$0xff] %v430_v12  ;;  %v436_v15 = vld [vmem:[%s1730_s25 + $0x3f88] sm:$0xff]  ;;  %433 = vst [vmem:[%s1735_s26 + $0x468] sm:$0xff] %v432_v13  ;;  %v438_v16 = vld [vmem:[%s1730_s25 + $0x3f90] sm:$0xff] }
  0x5a   : > { %435 = vst [vmem:[%s1735_s26 + $0x470] sm:$0xff] %v434_v14  ;;  %437 = vst [vmem:[%s1735_s26 + $0x478] sm:$0xff] %v436_v15  ;;  %v440_v17 = vld [vmem:[%s1730_s25 + $0x3f98] sm:$0xff]  ;;  %v442_v18 = vld [vmem:[%s1730_s25 + $0x3fa0] sm:$0xff] }
  0x5b   : > { %439 = vst [vmem:[%s1735_s26 + $0x480] sm:$0xff] %v438_v16  ;;  %441 = vst [vmem:[%s1735_s26 + $0x488] sm:$0xff] %v440_v17  ;;  %v444_v19 = vld [vmem:[%s1730_s25 + $0x3fa8] sm:$0xff]  ;;  %v446_v20 = vld [vmem:[%s1730_s25 + $0x3fb0] sm:$0xff] }
  0x5c   : > { %443 = vst [vmem:[%s1735_s26 + $0x490] sm:$0xff] %v442_v18  ;;  %v448_v21 = vld [vmem:[%s1730_s25 + $0x3fb8] sm:$0xff]  ;;  %445 = vst [vmem:[%s1735_s26 + $0x498] sm:$0xff] %v444_v19 }
  0x5d   : > { %447 = vst [vmem:[%s1735_s26 + $0x4a0] sm:$0xff] %v446_v20  ;;  %449 = vst [vmem:[%s1735_s26 + $0x4a8] sm:$0xff] %v448_v21 }
  0x5e PF: > { %p1383_p5 = scmp.ge.s32.totalorder %s1669_s14, 1  ;;  %p454_p6 = scmp.lt.s32.totalorder %s1669_s14, 16 }
  0x60   : > { %p455_p7 = pnand %p1383_p5, %p454_p6 }
  0x61   : > { %s461_s27 = sand.u32 (!%p455_p7), 1, %s1661_s12   ;;  %v1671_v22 = vmov (!%p455_p7), 0.0   ;;  %v1672_v23 = vmov (!%p455_p7), 0   ;;  %v642_v24 = vld [vmem:[%s2282_s2] sm:$0xf] (!%p455_p7)  ;;  %vm652_vm0 = vcmask (!%p455_p7), 1042432  }
  0x62   : > { %458 = sbr.rel (%p455_p7) target bundleno = 405 (0x195), region = 51  ;;  %762 = vmatprep.mubr.f32.mxu0 (!%p455_p7), %v1671_v22  ;;  %833 = vmatprep.mubr.f32.mxu1 (!%p455_p7), %v1671_v22  ;;  %vm1673_vm1 = vmmov (!%p455_p7), 1   ;;  %vm648_vm3 = vcmask (!%p455_p7), 613376   ;;  %vm1675_vm4 = vmmov (!%p455_p7), 0  }
  0x63   : > { %s1616_s28 = smul.u32 (!%p455_p7), 1200, %s461_s27  ;;  %1646 = vset.pattern.permute.xlu0 (!%p455_p7), %v1672_v23  ;;  %vm2078_vm2 = vmpackc.low (!%p455_p7), %vm652_vm0, %vm1673_vm1 }
  0x64   : > { %645 = vperm.xlu0 (!%p455_p7), %1646, %v642_v24   ;;  %s485_s7 = smul.u32 (!%p455_p7), 15, %s1378_s15 }
  0x65   : > { %s2042_s4 = scalar_lea.vmem (!%p455_p7), [#allocation2], %s1616_s28 }
  0x66   : > { %v493_v25 = vld [vmem:[%s2042_s4 + $0x8] sm:$0xff] (!%p455_p7)  ;;  %v508_v26 = vld [vmem:[%s2042_s4 + $0x80] sm:$0xff] (!%p455_p7)  ;;  %v507_v29 = vld [vmem:[%s2042_s4 + $0x78] sm:$0xff] (!%p455_p7)  ;;  %p486_p8 = scmp.lt.s32.totalorder (!%p455_p7), %s485_s7, 224 }
  0x67   : > { %v492_v27 = vld [vmem:[%s2042_s4] sm:$0xff] (!%p455_p7)  ;;  %v1445_v28 = vpack.c.bf16 (!%p455_p7), %v508_v26, %v493_v25  ;;  %v495_v30 = vld [vmem:[%s2042_s4 + $0x18] sm:$0xff] (!%p455_p7)  ;;  %v510_v31 = vld [vmem:[%s2042_s4 + $0x90] sm:$0xff] (!%p455_p7) }
  0x68   : > { %v1447_v32 = vpack.c.bf16 (!%p455_p7), %v507_v29, %v492_v27  ;;  %v1467_v33 = vpack.c.bf16 (!%p455_p7), %v510_v31, %v495_v30  ;;  %v494_v34 = vld [vmem:[%s2042_s4 + $0x10] sm:$0xff] (!%p455_p7)  ;;  %v509_v35 = vld [vmem:[%s2042_s4 + $0x88] sm:$0xff] (!%p455_p7)  ;;  %v523_v36 = vld [vmem:[%s2042_s4 + $0xf8] sm:$0xff] (!%p455_p7) }
  0x69   : > { %1446 = vmatprep.subr.bf16.mxu0 %v1445_v28  ;;  %v1469_v37 = vpack.c.bf16 %v509_v35, %v494_v34  ;;  %v538_v38 = vld [vmem:[%s2042_s4 + $0x170] sm:$0xff]  ;;  %v537_v40 = vld [vmem:[%s2042_s4 + $0x168] sm:$0xff]  ;;  %v540_v44 = vld [vmem:[%s2042_s4 + $0x180] sm:$0xff]  ;;  %s2290_s7 = smov (!%p486_p8, %s485_s7), 224 }
  0x6a   : > { %v522_v39 = vld [vmem:[%s2042_s4 + $0xf0] sm:$0xff]  ;;  %1448 = vmatpush1.bf16.msra.mxu0 %v1447_v32  ;;  %1468 = vmatprep.subr.bf16.mxu1 %v1467_v33  ;;  %v1449_v41 = vpack.c.bf16 %v538_v38, %v523_v36  ;;  %v525_v43 = vld [vmem:[%s2042_s4 + $0x108] sm:$0xff]  ;;  %v524_v45 = vld [vmem:[%s2042_s4 + $0x100] sm:$0xff]  ;;  %s1384_s8 = sshll.u32 %s2290_s7, 2 }
  0x6b   : > { %v1451_v42 = vpack.c.bf16 %v537_v40, %v522_v39  ;;  %1470 = vmatpush1.bf16.msra.mxu1 %v1469_v37  ;;  %v1471_v46 = vpack.c.bf16 %v540_v44, %v525_v43  ;;  %v539_v47 = vld [vmem:[%s2042_s4 + $0x178] sm:$0xff]  ;;  %v553_v48 = vld [vmem:[%s2042_s4 + $0x1e8] sm:$0xff]  ;;  %v568_v49 = vld [vmem:[%s2042_s4 + $0x260] sm:$0xff]  ;;  %s2260_s11 = scalar_lea.vmem %s2283_s3, %s1384_s8 }
  0x6c   : > { %1450 = vmatprep.subr.bf16.mxu0 %v1449_v41  ;;  %v1473_v50 = vpack.c.bf16 %v539_v47, %v524_v45  ;;  %v1453_v51 = vpack.c.bf16 %v568_v49, %v553_v48  ;;  %v552_v52 = vld [vmem:[%s2042_s4 + $0x1e0] sm:$0xff]  ;;  %v567_v53 = vld [vmem:[%s2042_s4 + $0x258] sm:$0xff]  ;;  %v570_v55 = vld [vmem:[%s2042_s4 + $0x270] sm:$0xff] }
  0x6d   : > { %v555_v54 = vld [vmem:[%s2042_s4 + $0x1f8] sm:$0xff]  ;;  %1472 = vmatprep.subr.bf16.mxu1 %v1471_v46  ;;  %v554_v56 = vld [vmem:[%s2042_s4 + $0x1f0] sm:$0xff]  ;;  %v569_v57 = vld [vmem:[%s2042_s4 + $0x268] sm:$0xff]  ;;  %v1455_v58 = vpack.c.bf16 %v567_v53, %v552_v52 }
  0x6e   : > { %1452 = vmatpush1.bf16.msra.mxu0 %v1451_v42  ;;  %v1475_v59 = vpack.c.bf16 %v570_v55, %v555_v54  ;;  %v583_v60 = vld [vmem:[%s2042_s4 + $0x2d8] sm:$0xff]  ;;  %v598_v61 = vld [vmem:[%s2042_s4 + $0x350] sm:$0xff]  ;;  %v1477_v63 = vpack.c.bf16 %v569_v57, %v554_v56  ;;  %v597_v1 = vld [vmem:[%s2042_s4 + $0x348] sm:$0xff] }
  0x6f   : > { %v582_v62 = vld [vmem:[%s2042_s4 + $0x2d0] sm:$0xff]  ;;  %1474 = vmatpush1.bf16.msra.mxu1 %v1473_v50  ;;  %1454 = vmatprep.subr.bf16.mxu0 %v1453_v51  ;;  %v1457_v0 = vpack.c.bf16 %v598_v61, %v583_v60  ;;  %v585_v2 = vld [vmem:[%s2042_s4 + $0x2e8] sm:$0xff]  ;;  %v600_v3 = vld [vmem:[%s2042_s4 + $0x360] sm:$0xff] }
  0x70   : > { %1476 = vmatprep.subr.bf16.mxu1 %v1475_v59  ;;  %v1479_v4 = vpack.c.bf16 %v600_v3, %v585_v2  ;;  %v584_v5 = vld [vmem:[%s2042_s4 + $0x2e0] sm:$0xff]  ;;  %v599_v6 = vld [vmem:[%s2042_s4 + $0x358] sm:$0xff]  ;;  %v613_v7 = vld [vmem:[%s2042_s4 + $0x3c8] sm:$0xff]  ;;  %v1459_v9 = vpack.c.bf16 %v597_v1, %v582_v62 }
  0x71   : > { %v628_v8 = vld [vmem:[%s2042_s4 + $0x440] sm:$0x7]  ;;  %v615_v11 = vld [vmem:[%s2042_s4 + $0x3d8] sm:$0xff]  ;;  %v630_v12 = vld [vmem:[%s2042_s4 + $0x450] sm:$0x7]  ;;  %v1481_v13 = vpack.c.bf16 %v599_v6, %v584_v5 }
  0x72   : > { %1456 = vmatpush1.bf16.msra.mxu0 %v1455_v58  ;;  %v1461_v14 = vpack.c.bf16 %v628_v8, %v613_v7  ;;  %v612_v15 = vld [vmem:[%s2042_s4 + $0x3c0] sm:$0xff]  ;;  %v627_v16 = vld [vmem:[%s2042_s4 + $0x438] sm:$0x7]  ;;  %v614_v17 = vld [vmem:[%s2042_s4 + $0x3d0] sm:$0xff]  ;;  %v1483_v18 = vpack.c.bf16 %v630_v12, %v615_v11 }
  0x73   : > { %1478 = vmatpush1.bf16.msra.mxu1 %v1477_v63  ;;  %1458 = vmatprep.subr.bf16.mxu0 %v1457_v0  ;;  %v629_v19 = vld [vmem:[%s2042_s4 + $0x448] sm:$0x7]  ;;  %v512_v21 = vld [vmem:[%s2042_s4 + $0xa0] sm:$0xff]  ;;  %v499_v23 = vld [vmem:[%s2042_s4 + $0x38] sm:$0xff]  ;;  %v1464_v25 = vpack.c.bf16 %v627_v16, %v612_v15 }
  0x74   : > { %1480 = vmatprep.subr.bf16.mxu1 %v1479_v4  ;;  %v497_v20 = vld [vmem:[%s2042_s4 + $0x28] sm:$0xff]  ;;  %v514_v24 = vld [vmem:[%s2042_s4 + $0xb0] sm:$0xff]  ;;  %v1486_v26 = vpack.c.bf16 %v629_v19, %v614_v17  ;;  %v496_v28 = vld [vmem:[%s2042_s4 + $0x20] sm:$0xff] }
  0x75   : > { %v1489_v27 = vpack.c.bf16 %v512_v21, %v497_v20  ;;  %v511_v29 = vld [vmem:[%s2042_s4 + $0x98] sm:$0xff]  ;;  %v498_v30 = vld [vmem:[%s2042_s4 + $0x30] sm:$0xff]  ;;  %v1511_v31 = vpack.c.bf16 %v514_v24, %v499_v23  ;;  %v513_v32 = vld [vmem:[%s2042_s4 + $0xa8] sm:$0xff] }
  0x76   : > { %1460 = vmatpush1.bf16.msra.mxu0 %v1459_v9  ;;  %v527_v33 = vld [vmem:[%s2042_s4 + $0x118] sm:$0xff]  ;;  %v542_v34 = vld [vmem:[%s2042_s4 + $0x190] sm:$0xff]  ;;  %v529_v35 = vld [vmem:[%s2042_s4 + $0x128] sm:$0xff]  ;;  %v1491_v38 = vpack.c.bf16 %v511_v29, %v496_v28  ;;  %v1513_v39 = vpack.c.bf16 %v513_v32, %v498_v30 }
  0x77   : > { %1482 = vmatpush1.bf16.msra.mxu1 %v1481_v13  ;;  %1463 = vmatprep.subr.msk.bf16.mxu0 %vm2078_vm2, %v1461_v14  ;;  %v544_v36 = vld [vmem:[%s2042_s4 + $0x1a0] sm:$0xff]  ;;  %v1493_v40 = vpack.c.bf16 %v542_v34, %v527_v33  ;;  %v526_v41 = vld [vmem:[%s2042_s4 + $0x110] sm:$0xff]  ;;  %v541_v42 = vld [vmem:[%s2042_s4 + $0x188] sm:$0xff] }
  0x78   : > { %1485 = vmatprep.subr.msk.bf16.mxu1 %vm2078_vm2, %v1483_v18  ;;  %v2109_v37 = vld [vmem:[%s2280_s0] sm:$0xf]  ;;  %v1515_v44 = vpack.c.bf16 %v544_v36, %v529_v35  ;;  %v543_v45 = vld [vmem:[%s2042_s4 + $0x198] sm:$0xff]  ;;  %v557_v46 = vld [vmem:[%s2042_s4 + $0x208] sm:$0xff]  ;;  %v1495_v50 = vpack.c.bf16 %v541_v42, %v526_v41 }
  0x79   : > { %v528_v43 = vld [vmem:[%s2042_s4 + $0x120] sm:$0xff]  ;;  %v559_v48 = vld [vmem:[%s2042_s4 + $0x218] sm:$0xff]  ;;  %v574_v49 = vld [vmem:[%s2042_s4 + $0x290] sm:$0xff] }
  0x7a   : > { %1466 = vmatpush1.bf16.msk.msra.mxu0 %vm2078_vm2, %v1464_v25  ;;  %v572_v47 = vld [vmem:[%s2042_s4 + $0x280] sm:$0xff]  ;;  %v1517_v51 = vpack.c.bf16 %v543_v45, %v528_v43  ;;  %v571_v54 = vld [vmem:[%s2042_s4 + $0x278] sm:$0xff]  ;;  %v558_v55 = vld [vmem:[%s2042_s4 + $0x210] sm:$0xff]  ;;  %v1519_v56 = vpack.c.bf16 %v574_v49, %v559_v48 }
  0x7b   : > { %1488 = vmatpush1.bf16.msk.msra.mxu1 %vm2078_vm2, %v1486_v26  ;;  %1490 = vmatprep.subr.bf16.mxu0 %v1489_v27  ;;  %v1497_v52 = vpack.c.bf16 %v572_v47, %v557_v46  ;;  %v556_v53 = vld [vmem:[%s2042_s4 + $0x200] sm:$0xff]  ;;  %v573_v57 = vld [vmem:[%s2042_s4 + $0x288] sm:$0xff]  ;;  %v587_v58 = vld [vmem:[%s2042_s4 + $0x2f8] sm:$0xff] }
  0x7c   : > { %1512 = vmatprep.subr.bf16.mxu1 %v1511_v31  ;;  %v602_v59 = vld [vmem:[%s2042_s4 + $0x370] sm:$0xff]  ;;  %v589_v60 = vld [vmem:[%s2042_s4 + $0x308] sm:$0xff]  ;;  %v604_v61 = vld [vmem:[%s2042_s4 + $0x380] sm:$0xff]  ;;  %v1499_v62 = vpack.c.bf16 %v571_v54, %v556_v53  ;;  %v1521_v63 = vpack.c.bf16 %v573_v57, %v558_v55 }
  0x7d   : > { %1387 = vmatmul.mubr.msk.f32.vlgmr.msra.gmra.mrb[0].mxu0 %vm648_vm3, %v2109_v37  ;;  %v1501_v0 = vpack.c.bf16 %v602_v59, %v587_v58  ;;  %v586_v1 = vld [vmem:[%s2042_s4 + $0x2f0] sm:$0xff]  ;;  %v601_v2 = vld [vmem:[%s2042_s4 + $0x368] sm:$0xff]  ;;  %v588_v3 = vld [vmem:[%s2042_s4 + $0x300] sm:$0xff]  ;;  %v1523_v4 = vpack.c.bf16 %v604_v61, %v589_v60 }
  0x7e   : > { %1492 = vmatpush1.bf16.msra.mxu0 %v1491_v38  ;;  %1390 = vmatmul.mubr.msk.f32.vlgmr.msra.gmra.mrb[0].mxu1 %vm648_vm3, %v2109_v37  ;;  %v603_v5 = vld [vmem:[%s2042_s4 + $0x378] sm:$0xff]  ;;  %v617_v6 = vld [vmem:[%s2042_s4 + $0x3e8] sm:$0xff]  ;;  %v632_v7 = vld [vmem:[%s2042_s4 + $0x460] sm:$0x7]  ;;  %v1503_v11 = vpack.c.bf16 %v601_v2, %v586_v1 }
  0x7f   : > { %1514 = vmatpush1.bf16.msra.mxu1 %v1513_v39  ;;  %1494 = vmatprep.subr.bf16.mxu0 %v1493_v40  ;;  %v619_v8 = vld [vmem:[%s2042_s4 + $0x3f8] sm:$0xff]  ;;  %v634_v9 = vld [vmem:[%s2042_s4 + $0x470] sm:$0x7]  ;;  %v1525_v12 = vpack.c.bf16 %v603_v5, %v588_v3  ;;  %v1505_v13 = vpack.c.bf16 %v632_v7, %v617_v6  ;;  %v616_v14 = vld [vmem:[%s2042_s4 + $0x3e0] sm:$0xff] }
  0x80   : > { %1516 = vmatprep.subr.bf16.mxu1 %v1515_v44  ;;  %904 = vmatprep.mubr.f32.mxu0 %v1671_v22  ;;  %v631_v15 = vld [vmem:[%s2042_s4 + $0x458] sm:$0x7]  ;;  %v618_v16 = vld [vmem:[%s2042_s4 + $0x3f0] sm:$0xff]  ;;  %v1527_v17 = vpack.c.bf16 %v634_v9, %v619_v8  ;;  %v633_v18 = vld [vmem:[%s2042_s4 + $0x468] sm:$0x7] }
  0x81   : > { %975 = vmatprep.mubr.f32.mxu1 %v1671_v22  ;;  %v501_v19 = vld [vmem:[%s2042_s4 + $0x48] sm:$0xff]  ;;  %v516_v20 = vld [vmem:[%s2042_s4 + $0xc0] sm:$0xff]  ;;  %v503_v21 = vld [vmem:[%s2042_s4 + $0x58] sm:$0xff]  ;;  %v1508_v24 = vpack.c.bf16 %v631_v15, %v616_v14  ;;  %v1530_v25 = vpack.c.bf16 %v633_v18, %v618_v16 }
  0x82   : > { %1496 = vmatpush1.bf16.msra.mxu0 %v1495_v50  ;;  %v518_v23 = vld [vmem:[%s2042_s4 + $0xd0] sm:$0xff]  ;;  %v1533_v26 = vpack.c.bf16 %v516_v20, %v501_v19  ;;  %v500_v27 = vld [vmem:[%s2042_s4 + $0x40] sm:$0xff]  ;;  %v515_v28 = vld [vmem:[%s2042_s4 + $0xb8] sm:$0xff] }
  0x83   : > { %1518 = vmatpush1.bf16.msra.mxu1 %v1517_v51  ;;  %1498 = vmatprep.subr.bf16.mxu0 %v1497_v52  ;;  %v502_v29 = vld [vmem:[%s2042_s4 + $0x50] sm:$0xff]  ;;  %v1555_v30 = vpack.c.bf16 %v518_v23, %v503_v21  ;;  %v517_v31 = vld [vmem:[%s2042_s4 + $0xc8] sm:$0xff]  ;;  %v531_v32 = vld [vmem:[%s2042_s4 + $0x138] sm:$0xff]  ;;  %v1535_v36 = vpack.c.bf16 %v515_v28, %v500_v27 }
  0x84   : > { %1520 = vmatprep.subr.bf16.mxu1 %v1519_v56  ;;  %v546_v33 = vld [vmem:[%s2042_s4 + $0x1b0] sm:$0xff]  ;;  %v533_v34 = vld [vmem:[%s2042_s4 + $0x148] sm:$0xff]  ;;  %v548_v35 = vld [vmem:[%s2042_s4 + $0x1c0] sm:$0xff]  ;;  %v1557_v38 = vpack.c.bf16 %v517_v31, %v502_v29 }
  0x85   : > { %v1537_v39 = vpack.c.bf16 %v546_v33, %v531_v32  ;;  %v530_v40 = vld [vmem:[%s2042_s4 + $0x130] sm:$0xff]  ;;  %v545_v41 = vld [vmem:[%s2042_s4 + $0x1a8] sm:$0xff]  ;;  %v532_v42 = vld [vmem:[%s2042_s4 + $0x140] sm:$0xff]  ;;  %v1559_v43 = vpack.c.bf16 %v548_v35, %v533_v34 }
  0x86   : > { %1500 = vmatpush1.bf16.msra.mxu0 %v1499_v62  ;;  %v547_v44 = vld [vmem:[%s2042_s4 + $0x1b8] sm:$0xff]  ;;  %v561_v45 = vld [vmem:[%s2042_s4 + $0x228] sm:$0xff]  ;;  %v576_v46 = vld [vmem:[%s2042_s4 + $0x2a0] sm:$0xff]  ;;  %v1539_v49 = vpack.c.bf16 %v545_v41, %v530_v40 }
  0x87   : > { %1522 = vmatpush1.bf16.msra.mxu1 %v1521_v63  ;;  %1502 = vmatprep.subr.bf16.mxu0 %v1501_v0  ;;  %v563_v47 = vld [vmem:[%s2042_s4 + $0x238] sm:$0xff]  ;;  %v578_v48 = vld [vmem:[%s2042_s4 + $0x2b0] sm:$0xff]  ;;  %v1561_v50 = vpack.c.bf16 %v547_v44, %v532_v42  ;;  %v1541_v51 = vpack.c.bf16 %v576_v46, %v561_v45  ;;  %v560_v52 = vld [vmem:[%s2042_s4 + $0x220] sm:$0xff] }
  0x88   : > { %1524 = vmatprep.subr.bf16.mxu1 %v1523_v4  ;;  %v575_v53 = vld [vmem:[%s2042_s4 + $0x298] sm:$0xff]  ;;  %v562_v54 = vld [vmem:[%s2042_s4 + $0x230] sm:$0xff]  ;;  %v1563_v55 = vpack.c.bf16 %v578_v48, %v563_v47  ;;  %v577_v56 = vld [vmem:[%s2042_s4 + $0x2a8] sm:$0xff] }
  0x89   : > { %v591_v57 = vld [vmem:[%s2042_s4 + $0x318] sm:$0xff]  ;;  %v606_v58 = vld [vmem:[%s2042_s4 + $0x390] sm:$0xff]  ;;  %v593_v59 = vld [vmem:[%s2042_s4 + $0x328] sm:$0xff]  ;;  %v1543_v61 = vpack.c.bf16 %v575_v53, %v560_v52  ;;  %v1565_v62 = vpack.c.bf16 %v577_v56, %v562_v54 }
  0x8a   : > { %1504 = vmatpush1.bf16.msra.mxu0 %v1503_v11  ;;  %v608_v60 = vld [vmem:[%s2042_s4 + $0x3a0] sm:$0xff]  ;;  %v1545_v63 = vpack.c.bf16 %v606_v58, %v591_v57  ;;  %v590_v0 = vld [vmem:[%s2042_s4 + $0x310] sm:$0xff]  ;;  %v605_v1 = vld [vmem:[%s2042_s4 + $0x388] sm:$0xff] }
  0x8b   : > { %1526 = vmatpush1.bf16.msra.mxu1 %v1525_v12  ;;  %1507 = vmatprep.subr.msk.bf16.mxu0 %vm2078_vm2, %v1505_v13  ;;  %v592_v2 = vld [vmem:[%s2042_s4 + $0x320] sm:$0xff]  ;;  %v1567_v3 = vpack.c.bf16 %v608_v60, %v593_v59  ;;  %v607_v4 = vld [vmem:[%s2042_s4 + $0x398] sm:$0xff]  ;;  %v621_v5 = vld [vmem:[%s2042_s4 + $0x408] sm:$0xff]  ;;  %v1547_v9 = vpack.c.bf16 %v605_v1, %v590_v0 }
  0x8c   : > { %1529 = vmatprep.subr.msk.bf16.mxu1 %vm2078_vm2, %v1527_v17  ;;  %v636_v6 = vld [vmem:[%s2042_s4 + $0x480] sm:$0x7]  ;;  %v623_v7 = vld [vmem:[%s2042_s4 + $0x418] sm:$0xff]  ;;  %v638_v8 = vld [vmem:[%s2042_s4 + $0x490] sm:$0x7]  ;;  %v1569_v11 = vpack.c.bf16 %v607_v4, %v592_v2 }
  0x8d   : > { %v1549_v12 = vpack.c.bf16 %v636_v6, %v621_v5  ;;  %v620_v13 = vld [vmem:[%s2042_s4 + $0x400] sm:$0xff]  ;;  %v635_v14 = vld [vmem:[%s2042_s4 + $0x478] sm:$0x7]  ;;  %v622_v15 = vld [vmem:[%s2042_s4 + $0x410] sm:$0xff]  ;;  %v1571_v16 = vpack.c.bf16 %v638_v8, %v623_v7 }
  0x8e   : > { %1510 = vmatpush1.bf16.msk.msra.mxu0 %vm2078_vm2, %v1508_v24  ;;  %v637_v17 = vld [vmem:[%s2042_s4 + $0x488] sm:$0x7]  ;;  %v520_v19 = vld [vmem:[%s2042_s4 + $0xe0] sm:$0xff]  ;;  %v1552_v20 = vpack.c.bf16 %v635_v14, %v620_v13  ;;  %v535_v28 = vld [vmem:[%s2042_s4 + $0x158] sm:$0xff] }
  0x8f   : > { %1532 = vmatpush1.bf16.msk.msra.mxu1 %vm2078_vm2, %v1530_v25  ;;  %1534 = vmatprep.subr.bf16.mxu0 %v1533_v26  ;;  %v505_v18 = vld [vmem:[%s2042_s4 + $0x68] sm:$0xff]  ;;  %v1574_v21 = vpack.c.bf16 %v637_v17, %v622_v15  ;;  %v504_v24 = vld [vmem:[%s2042_s4 + $0x60] sm:$0xff]  ;;  %v519_v25 = vld [vmem:[%s2042_s4 + $0xd8] sm:$0xff] }
  0x90   : > { %1556 = vmatprep.subr.bf16.mxu1 %v1555_v30  ;;  %v1577_v23 = vpack.c.bf16 %v520_v19, %v505_v18  ;;  %v506_v26 = vld [vmem:[%s2042_s4 + $0x70] sm:$0xff]  ;;  %v521_v27 = vld [vmem:[%s2042_s4 + $0xe8] sm:$0xff]  ;;  %v1579_v30 = vpack.c.bf16 %v519_v25, %v504_v24  ;;  %v536_v35 = vld [vmem:[%s2042_s4 + $0x160] sm:$0xff] }
  0x91   : > { %1393 = vmatmul.mubr.msk.f32.vlgmr.msra.gmra.mrb[2].mxu0 %vm648_vm3, %v2109_v37  ;;  %v550_v29 = vld [vmem:[%s2042_s4 + $0x1d0] sm:$0xff]  ;;  %v1600_v31 = vpack.c.bf16 %v521_v27, %v506_v26  ;;  %v549_v34 = vld [vmem:[%s2042_s4 + $0x1c8] sm:$0xff]  ;;  %v580_v40 = vld [vmem:[%s2042_s4 + $0x2c0] sm:$0xff] }
  0x92   : > { %1536 = vmatpush1.bf16.msra.mxu0 %v1535_v36  ;;  %1396 = vmatmul.mubr.msk.f32.vlgmr.msra.gmra.mrb[2].mxu1 %vm648_vm3, %v2109_v37  ;;  %v1581_v32 = vpack.c.bf16 %v550_v29, %v535_v28  ;;  %v534_v33 = vld [vmem:[%s2042_s4 + $0x150] sm:$0xff]  ;;  %v1674_v36 = vmov 0.0|0.0   ;;  %v564_v44 = vld [vmem:[%s2042_s4 + $0x240] sm:$0xff]  ;;  %v579_v45 = vld [vmem:[%s2042_s4 + $0x2b8] sm:$0xff] }
  0x93   : > { %1558 = vmatpush1.bf16.msra.mxu1 %v1557_v38  ;;  %1538 = vmatprep.subr.bf16.mxu0 %v1537_v39  ;;  %v551_v38 = vld [vmem:[%s2042_s4 + $0x1d8] sm:$0xff]  ;;  %v565_v39 = vld [vmem:[%s2042_s4 + $0x248] sm:$0xff]  ;;  %v1583_v41 = vpack.c.bf16 %v549_v34, %v534_v33  ;;  %v566_v46 = vld [vmem:[%s2042_s4 + $0x250] sm:$0xff] }
  0x94   : > { %1560 = vmatprep.subr.bf16.mxu1 %v1559_v43  ;;  %1046 = vmatprep.mubr.f32.mxu0 %v1671_v22  ;;  %v1603_v42 = vpack.c.bf16 %v551_v38, %v536_v35  ;;  %v1585_v43 = vpack.c.bf16 %v580_v40, %v565_v39  ;;  %v581_v47 = vld [vmem:[%s2042_s4 + $0x2c8] sm:$0xff]  ;;  %v595_v48 = vld [vmem:[%s2042_s4 + $0x338] sm:$0xff]  ;;  %v594_v53 = vld [vmem:[%s2042_s4 + $0x330] sm:$0xff] }
  0x95   : > { %1117 = vmatprep.mubr.f32.mxu1 %v1671_v22  ;;  %v609_v54 = vld [vmem:[%s2042_s4 + $0x3a8] sm:$0xff]  ;;  %v611_v56 = vld [vmem:[%s2042_s4 + $0x3b8] sm:$0xff]  ;;  %v640_v58 = vld [vmem:[%s2042_s4 + $0x4a0] sm:$0x7] }
  0x96   : > { %1540 = vmatpush1.bf16.msra.mxu0 %v1539_v49  ;;  %v610_v49 = vld [vmem:[%s2042_s4 + $0x3b0] sm:$0xff]  ;;  %v625_v57 = vld [vmem:[%s2042_s4 + $0x428] sm:$0xff]  ;;  %v1591_v59 = vpack.c.bf16 %v609_v54, %v594_v53 }
  0x97   : > { %1562 = vmatpush1.bf16.msra.mxu1 %v1561_v50  ;;  %1542 = vmatprep.subr.bf16.mxu0 %v1541_v51  ;;  %v1587_v50 = vpack.c.bf16 %v579_v45, %v564_v44  ;;  %v1606_v51 = vpack.c.bf16 %v581_v47, %v566_v46  ;;  %v1589_v52 = vpack.c.bf16 %v610_v49, %v595_v48  ;;  %v641_v0 = vld [vmem:[%s2042_s4 + $0x4a8] sm:$0x7] }
  0x98   : > { %1564 = vmatprep.subr.bf16.mxu1 %v1563_v55  ;;  %v596_v55 = vld [vmem:[%s2042_s4 + $0x340] sm:$0xff]  ;;  %v1593_v60 = vpack.c.bf16 %v640_v58, %v625_v57 }
  0x9a   : > { %1544 = vmatpush1.bf16.msra.mxu0 %v1543_v61  ;;  %v624_v61 = vld [vmem:[%s2042_s4 + $0x420] sm:$0xff] }
  0x9b   : > { %1566 = vmatpush1.bf16.msra.mxu1 %v1565_v62  ;;  %1546 = vmatprep.subr.bf16.mxu0 %v1545_v63  ;;  %v639_v62 = vld [vmem:[%s2042_s4 + $0x498] sm:$0x7]  ;;  %v626_v63 = vld [vmem:[%s2042_s4 + $0x430] sm:$0xff] }
  0x9c   : > { %1568 = vmatprep.subr.bf16.mxu1 %v1567_v3  ;;  %v1596_v1 = vpack.c.bf16 %v639_v62, %v624_v61  ;;  %v1612_v2 = vpack.c.bf16 %v641_v0, %v626_v63 }
  0x9e   : > { %1548 = vmatpush1.bf16.msra.mxu0 %v1547_v9 }
  0x9f   : > { %1570 = vmatpush1.bf16.msra.mxu1 %v1569_v11  ;;  %1551 = vmatprep.subr.msk.bf16.mxu0 %vm2078_vm2, %v1549_v12 }
  0xa0   : > { %1573 = vmatprep.subr.msk.bf16.mxu1 %vm2078_vm2, %v1571_v16 }
  0xa2   : > { %1554 = vmatpush1.bf16.msk.msra.mxu0 %vm2078_vm2, %v1552_v20 }
  0xa3   : > { %1576 = vmatpush1.bf16.msk.msra.mxu1 %vm2078_vm2, %v1574_v21  ;;  %1578 = vmatprep.subr.bf16.mxu0 %v1577_v23 }
  0xa4   : > { %1599 = vmatprep.subr.bf16.mxu1 %v1674_v36 }
  0xa5   : > { %1399 = vmatmul.mubr.msk.f32.vlgmr.msra.gmra.mrb[4].mxu0 %vm648_vm3, %v2109_v37 }
  0xa6   : > { %1580 = vmatpush1.bf16.msra.mxu0 %v1579_v30  ;;  %1402 = vmatmul.mubr.msk.f32.vlgmr.msra.gmra.mrb[4].mxu1 %vm648_vm3, %v2109_v37 }
  0xa7   : > { %1601 = vmatpush3.bf16.msra.mxu1 %v1600_v31  ;;  %1582 = vmatprep.subr.bf16.mxu0 %v1581_v32 }
  0xa8   : > { %1602 = vmatprep.subr.bf16.mxu1 %v1674_v36  ;;  %1188 = vmatprep.mubr.f32.mxu0 %v1671_v22 }
  0xa9   : > { %1442 = vmatprep.mubr.msk.f32.mxu1 %vm1675_vm4, %v1671_v22  ;;  %v1609_v22 = vpack.c.bf16 %v611_v56, %v596_v55 }
  0xaa   : > { %1584 = vmatpush1.bf16.msra.mxu0 %v1583_v41 }
  0xab   : > { %1604 = vmatpush3.bf16.msra.mxu1 %v1603_v42  ;;  %1586 = vmatprep.subr.bf16.mxu0 %v1585_v43 }
  0xac   : > { %1605 = vmatprep.subr.bf16.mxu1 %v1674_v36 }
  0xae   : > { %1588 = vmatpush1.bf16.msra.mxu0 %v1587_v50 }
  0xaf   : > { %1607 = vmatpush3.bf16.msra.mxu1 %v1606_v51  ;;  %1590 = vmatprep.subr.bf16.mxu0 %v1589_v52 }
  0xb0   : > { %1608 = vmatprep.subr.bf16.mxu1 %v1674_v36 }
  0xb2   : > { %1592 = vmatpush1.bf16.msra.mxu0 %v1591_v59 }
  0xb3   : > { %1610 = vmatpush3.bf16.msra.mxu1 %v1609_v22  ;;  %1595 = vmatprep.subr.msk.bf16.mxu0 %vm2078_vm2, %v1593_v60 }
  0xb4   : > { %1611 = vmatprep.subr.bf16.mxu1 %v1674_v36 }
  0xb6   : > { %1598 = vmatpush1.bf16.msk.msra.mxu0 %vm2078_vm2, %v1596_v1 }
  0xb7   : > { %1614 = vmatpush3.bf16.msk.msra.mxu1 %vm2078_vm2, %v1612_v2 }
  0xb9   : > { %1405 = vmatmul.mubr.msk.f32.vlgmr.msra.gmra.mrb[6].mxu0 %vm648_vm3, %v2109_v37 }
  0xba   : > { %1443 = vmatmul.mubr.msk.f32.vlgmr.msra.gmra.mrb[6].mxu1 %vm648_vm3, %v2109_v37 }
  0xe3   : > { %v646_v3 = vpop.permute.xlu0 %645 }
 0x150   : > { %v764_v4 = vpop.f32.mrb[0].mxu0 }
 0x151   : > { %v765_v5 = vadd.f32 %v764_v4, %v646_v3  ;;  %v766_v6 = vpop.f32.mrb[1].mxu0  ;;  %v835_v7 = vpop.f32.mrb[0].mxu1 }
 0x152   : > { %v767_v8 = vadd.f32 %v766_v6, %v646_v3  ;;  %v836_v9 = vadd.f32 %v835_v7, %v646_v3  ;;  %v837_v10 = vpop.f32.mrb[1].mxu1 }
 0x153   : > { %v1265_v11 = vmax.f32 %v765_v5, 0.0  ;;  %v838_v12 = vadd.f32 %v837_v10, %v646_v3 }
 0x154   : > { %v1266_v13 = vmax.f32 %v767_v8, 0.0  ;;  %v1267_v14 = vmax.f32 %v836_v9, 0.0 }
 0x155   : > { %v1268_v37 = vmax.f32 %v838_v12, 0.0 }
 0x156   : > { %v1294_v15 = vcombine.low %v1265_v11, %v1266_v13 }
 0x157   : > { %v1295_v16 = vcombine.low %v1267_v14, %v1268_v37 }
 0x158   : > { %1308 = vst [vmem:[%s2260_s11] sm:$0xff] %v1294_v15 }
 0x159   : > { %1309 = vst [vmem:[%s2260_s11 + $0x8] sm:$0xff] %v1295_v16 }
 0x164   : > { %v906_v17 = vpop.f32.mrb[2].mxu0 }
 0x165   : > { %v907_v18 = vadd.f32 %v906_v17, %v646_v3  ;;  %v908_v19 = vpop.f32.mrb[3].mxu0  ;;  %v977_v20 = vpop.f32.mrb[2].mxu1 }
 0x166   : > { %v909_v21 = vadd.f32 %v908_v19, %v646_v3  ;;  %v978_v23 = vadd.f32 %v977_v20, %v646_v3  ;;  %v979_v24 = vpop.f32.mrb[3].mxu1 }
 0x167   : > { %v1269_v25 = vmax.f32 %v907_v18, 0.0  ;;  %v980_v26 = vadd.f32 %v979_v24, %v646_v3 }
 0x168   : > { %v1270_v27 = vmax.f32 %v909_v21, 0.0  ;;  %v1271_v28 = vmax.f32 %v978_v23, 0.0 }
 0x169   : > { %v1272_v29 = vmax.f32 %v980_v26, 0.0 }
 0x16a   : > { %v1296_v30 = vcombine.low %v1269_v25, %v1270_v27 }
 0x16b   : > { %v1297_v31 = vcombine.low %v1271_v28, %v1272_v29 }
 0x16c   : > { %1310 = vst [vmem:[%s2260_s11 + $0x10] sm:$0xff] %v1296_v30 }
 0x16d   : > { %1311 = vst [vmem:[%s2260_s11 + $0x18] sm:$0xff] %v1297_v31 }
 0x178   : > { %v1048_v32 = vpop.f32.mrb[4].mxu0 }
 0x179   : > { %v1049_v33 = vadd.f32 %v1048_v32, %v646_v3  ;;  %v1050_v34 = vpop.f32.mrb[5].mxu0  ;;  %v1119_v35 = vpop.f32.mrb[4].mxu1 }
 0x17a   : > { %v1051_v36 = vadd.f32 %v1050_v34, %v646_v3  ;;  %v1120_v38 = vadd.f32 %v1119_v35, %v646_v3  ;;  %v1121_v39 = vpop.f32.mrb[5].mxu1 }
 0x17b   : > { %v1273_v40 = vmax.f32 %v1049_v33, 0.0  ;;  %v1122_v41 = vadd.f32 %v1121_v39, %v646_v3 }
 0x17c   : > { %v1274_v42 = vmax.f32 %v1051_v36, 0.0  ;;  %v1275_v43 = vmax.f32 %v1120_v38, 0.0 }
 0x17d   : > { %v1276_v44 = vmax.f32 %v1122_v41, 0.0 }
 0x17e   : > { %v1298_v45 = vcombine.low %v1273_v40, %v1274_v42 }
 0x17f   : > { %v1299_v46 = vcombine.low %v1275_v43, %v1276_v44 }
 0x180   : > { %1312 = vst [vmem:[%s2260_s11 + $0x20] sm:$0xff] %v1298_v45 }
 0x181   : > { %1313 = vst [vmem:[%s2260_s11 + $0x28] sm:$0xff] %v1299_v46 }
 0x18c   : > { %v1190_v47 = vpop.f32.mrb[6].mxu0 }
 0x18d   : > { %v1191_v48 = vadd.f32 %v1190_v47, %v646_v3  ;;  %v1192_v49 = vpop.f32.mrb[7].mxu0  ;;  %v1261_v50 = vpop.f32.mrb[6].mxu1 }
 0x18e   : > { %v1193_v51 = vadd.f32 %v1192_v49, %v646_v3  ;;  %v1262_v52 = vadd.f32 %v1261_v50, %v646_v3  ;;  %v1444_v53 = vpop.f32.mrb[7].mxu1 }
 0x18f   : > { %v1277_v54 = vmax.f32 %v1191_v48, 0.0 }
 0x190   : > { %v1278_v55 = vmax.f32 %v1193_v51, 0.0  ;;  %v1279_v56 = vmax.f32 %v1262_v52, 0.0 }
 0x192   : > { %v1300_v57 = vcombine.low %v1277_v54, %v1278_v55  ;;  %1315 = vst [vmem:[%s2260_s11 + $0x38] sm:$0xf] %v1279_v56 }
 0x194   : > { %1314 = vst [vmem:[%s2260_s11 + $0x30] sm:$0xff] %v1300_v57 }
 0x195 PF: > { %p10_p9 = scmp.ge.s32.totalorder %s1713_s16, 17   ;;  %s2286_s12 = smov %s1665_s13 }
 0x196   : > { %s2287_s13 = smov %s1722_s19  ;;  %s2288_s14 = smov %s1713_s16 }
 0x197   :  { %12 = sbr.rel (!%p10_p9) target bundleno = 2 (0x2), region = 90 }

// kernel: eonss_forward.8
= control target key start
LH: loop header
LB: loop body
LE: loop exit
PB: predicated region body
PF: predicated region fallthrough
CT: control target
= control target key end

     0   :  { %v1367_v0 = vlaneseq  ;;  %v2931_v4 = vmov 1966171168   ;;  %s3542_s0 = inlined_call_operand.vmem [shape: f32[4,28800], index: 0, kind: input, shape index: {}]   ;;  %s3543_s1 = inlined_call_operand.vmem [shape: f32[1,28800], index: 1, kind: output, shape index: {}]  }
   0x1   :  { %v8_v1 = vld [vmem:[%s3542_s0] sm:$0xff]  ;;  %v9_v2 = vld [vmem:[%s3542_s0 + $0x8] sm:$0xff]  ;;  %v10_v3 = vld [vmem:[%s3542_s0 + $0x10] sm:$0xff]  ;;  %v1365_v5 = vunpack.c.l.s4 %v2931_v4 }
   0x2   :  { %v11_v6 = vld [vmem:[%s3542_s0 + $0x18] sm:$0xff]  ;;  %v2704_v7 = vrot.slane %v8_v1, 9  ;;  %v2705_v8 = vrot.slane %v9_v2, 9  ;;  %v2706_v9 = vrot.slane %v10_v3, 9  ;;  %v1368_v10 = vshrl.u32 %v1367_v0, 7  ;;  %v12_v11 = vld [vmem:[%s3542_s0 + $0x20] sm:$0xff] }
   0x3   :  { %v2707_v12 = vrot.slane %v11_v6, 9  ;;  %v1366_v13 = vunpack.c.0.s8 %v1365_v5  ;;  %v13_v14 = vld [vmem:[%s3542_s0 + $0x28] sm:$0xff]  ;;  %v14_v15 = vld [vmem:[%s3542_s0 + $0x30] sm:$0xff]  ;;  %v15_v16 = vld [vmem:[%s3542_s0 + $0x38] sm:$0xff]  ;;  %v2708_v17 = vrot.slane %v12_v11, 9  ;;  %vm2697_vm0 = vcmp.lt.s32.totalorder %v1367_v0, 128 }
   0x4   :  { %v573_v18 = vmax.f32 %v8_v1, %v2704_v7  ;;  %v574_v19 = vmax.f32 %v9_v2, %v2705_v8  ;;  %v575_v20 = vmax.f32 %v10_v3, %v2706_v9  ;;  %v2709_v21 = vrot.slane %v13_v14, 9  ;;  %v16_v42 = vld [vmem:[%s3542_s0 + $0x40] sm:$0xff]  ;;  %v17_v43 = vld [vmem:[%s3542_s0 + $0x48] sm:$0xff]  ;;  %v18_v52 = vld [vmem:[%s3542_s0 + $0x50] sm:$0xff] }
   0x5   :  { %v576_v22 = vmax.f32 %v11_v6, %v2707_v12  ;;  %v2967_v23 = vsub.s32 %v1366_v13, %v1368_v10  ;;  %v2710_v24 = vrot.slane %v14_v15, 9  ;;  %v2711_v25 = vrot.slane %v15_v16, 9  ;;  %v19_v53 = vld [vmem:[%s3542_s0 + $0x58] sm:$0xff]  ;;  %v20_v62 = vld [vmem:[%s3542_s0 + $0x60] sm:$0xff]  ;;  %v21_v8 = vld [vmem:[%s3542_s0 + $0x68] sm:$0xff] }
   0x6   :  { %v2817_v26 = vrot.slane %v573_v18, 10  ;;  %v2818_v27 = vrot.slane %v574_v19, 10  ;;  %v2819_v28 = vrot.slane %v575_v20, 10  ;;  %v577_v29 = vmax.f32 %v12_v11, %v2708_v17  ;;  %v22_v12 = vld [vmem:[%s3542_s0 + $0x70] sm:$0xff]  ;;  %v23_v13 = vld [vmem:[%s3542_s0 + $0x78] sm:$0xff] }
   0x7   :  { %v2820_v30 = vrot.slane %v576_v22, 10  ;;  %v578_v31 = vmax.f32 %v13_v14, %v2709_v21  ;;  %v579_v32 = vmax.f32 %v14_v15, %v2710_v24  ;;  %v580_v33 = vmax.f32 %v15_v16, %v2711_v25 }
   0x8   :  { %v1138_v34 = vmax.f32 %v573_v18, %v2817_v26  ;;  %v1139_v35 = vmax.f32 %v574_v19, %v2818_v27  ;;  %v1140_v36 = vmax.f32 %v575_v20, %v2819_v28  ;;  %v2821_v37 = vrot.slane %v577_v29, 10  ;;  %v24_v28 = vld [vmem:[%s3542_s0 + $0x80] sm:$0xff] }
   0x9   :  { %v1141_v38 = vmax.f32 %v576_v22, %v2820_v30  ;;  %v2822_v39 = vrot.slane %v578_v31, 10  ;;  %v2823_v40 = vrot.slane %v579_v32, 10  ;;  %v2824_v41 = vrot.slane %v580_v33, 10 }
   0xa   :  { %v1370_v44 = vrot.slane %v1138_v34, %v2967_v23  ;;  %v1377_v45 = vrot.slane %v1139_v35, %v2967_v23  ;;  %v1384_v46 = vrot.slane %v1140_v36, %v2967_v23  ;;  %v1142_v47 = vmax.f32 %v577_v29, %v2821_v37  ;;  %v25_v37 = vld [vmem:[%s3542_s0 + $0x88] sm:$0xff] }
   0xb   :  { %v1391_v48 = vrot.slane %v1141_v38, %v2967_v23  ;;  %v1143_v49 = vmax.f32 %v578_v31, %v2822_v39  ;;  %v1144_v50 = vmax.f32 %v579_v32, %v2823_v40  ;;  %v1145_v51 = vmax.f32 %v580_v33, %v2824_v41  ;;  %v26_v38 = vld [vmem:[%s3542_s0 + $0x90] sm:$0xff] }
   0xc   :  { %v1392_v54 = vcombine.low %v1370_v44, %v1377_v45  ;;  %v1415_v55 = vrot.slane %v1142_v47, %v2967_v23  ;;  %v2712_v56 = vrot.slane %v16_v42, 9  ;;  %v2713_v57 = vrot.slane %v17_v43, 9  ;;  %v27_v47 = vld [vmem:[%s3542_s0 + $0x98] sm:$0xff] }
   0xd   :  { %v1393_v58 = vcombine.low %v1384_v46, %v1391_v48  ;;  %v1422_v59 = vrot.slane %v1143_v49, %v2967_v23  ;;  %v1429_v60 = vrot.slane %v1144_v50, %v2967_v23  ;;  %v1436_v61 = vrot.slane %v1145_v51, %v2967_v23 }
   0xe   :  { %v1400_v63 = vrot.slane %v1392_v54, %v2967_v23  ;;  %v2714_v1 = vrot.slane %v18_v52, 9  ;;  %v2715_v2 = vrot.slane %v19_v53, 9  ;;  %v581_v3 = vmax.f32 %v16_v42, %v2712_v56 }
   0xf   :  { %v1407_v4 = vrot.slane %v1393_v58, %v2967_v23  ;;  %v1437_v5 = vcombine.low %v1415_v55, %v1422_v59  ;;  %v1438_v6 = vcombine.low %v1429_v60, %v1436_v61  ;;  %v582_v7 = vmax.f32 %v17_v43, %v2713_v57  ;;  %v28_v60 = vld [vmem:[%s3542_s0 + $0xa0] sm:$0xff] }
  0x10   :  { %v583_v9 = vmax.f32 %v18_v52, %v2714_v1  ;;  %v584_v10 = vmax.f32 %v19_v53, %v2715_v2  ;;  %v2825_v11 = vrot.slane %v581_v3, 10  ;;  %v2716_v14 = vrot.slane %v20_v62, 9  ;;  %v29_v2 = vld [vmem:[%s3542_s0 + $0xa8] sm:$0xff] }
  0x11   :  { %v1408_v15 = vcombine.low %v1400_v63, %v1407_v4  ;;  %v1445_v16 = vrot.slane %v1437_v5, %v2967_v23  ;;  %v1452_v17 = vrot.slane %v1438_v6, %v2967_v23  ;;  %v2826_v18 = vrot.slane %v582_v7, 10 }
  0x12   :  { %v2827_v19 = vrot.slane %v583_v9, 10  ;;  %v2828_v20 = vrot.slane %v584_v10, 10  ;;  %v1146_v21 = vmax.f32 %v581_v3, %v2825_v11  ;;  %v2717_v22 = vrot.slane %v21_v8, 9  ;;  %v31_v11 = vld [vmem:[%s3542_s0 + $0xb8] sm:$0xff] }
  0x13   :  { %2667 = vst [vmem:[%s3543_s1] sm:$0xff] %v1408_v15  ;;  %v1453_v24 = vcombine.low %v1445_v16, %v1452_v17  ;;  %v1147_v25 = vmax.f32 %v582_v7, %v2826_v18  ;;  %v2718_v26 = vrot.slane %v22_v12, 9  ;;  %v2719_v27 = vrot.slane %v23_v13, 9  ;;  %v30_v7 = vld [vmem:[%s3542_s0 + $0xb0] sm:$0xff] }
  0x14   :  { %v1148_v29 = vmax.f32 %v583_v9, %v2827_v19  ;;  %v1149_v30 = vmax.f32 %v584_v10, %v2828_v20  ;;  %v1460_v31 = vrot.slane %v1146_v21, %v2967_v23  ;;  %v585_v32 = vmax.f32 %v20_v62, %v2716_v14 }
  0x15   :  { %2668 = vst [vmem:[%s3543_s1 + $0x8] sm:$0xff] %v1453_v24  ;;  %v1467_v33 = vrot.slane %v1147_v25, %v2967_v23  ;;  %v586_v34 = vmax.f32 %v21_v8, %v2717_v22  ;;  %v587_v35 = vmax.f32 %v22_v12, %v2718_v26  ;;  %v588_v36 = vmax.f32 %v23_v13, %v2719_v27  ;;  %v32_v26 = vld [vmem:[%s3542_s0 + $0xc0] sm:$0xff] }
  0x16   :  { %v1474_v39 = vrot.slane %v1148_v29, %v2967_v23  ;;  %v1481_v40 = vrot.slane %v1149_v30, %v2967_v23  ;;  %v2829_v41 = vrot.slane %v585_v32, 10  ;;  %v2720_v42 = vrot.slane %v24_v28, 9 }
  0x17   :  { %v1482_v43 = vcombine.low %v1460_v31, %v1467_v33  ;;  %v2830_v44 = vrot.slane %v586_v34, 10  ;;  %v2831_v45 = vrot.slane %v587_v35, 10  ;;  %v2832_v46 = vrot.slane %v588_v36, 10  ;;  %v33_v31 = vld [vmem:[%s3542_s0 + $0xc8] sm:$0xff] }
  0x18   :  { %v1483_v48 = vcombine.low %v1474_v39, %v1481_v40  ;;  %v1150_v49 = vmax.f32 %v585_v32, %v2829_v41  ;;  %v2721_v50 = vrot.slane %v25_v37, 9  ;;  %v2722_v51 = vrot.slane %v26_v38, 9  ;;  %v35_v40 = vld [vmem:[%s3542_s0 + $0xd8] sm:$0xff] }
  0x19   :  { %v1490_v52 = vrot.slane %v1482_v43, %v2967_v23  ;;  %v1151_v53 = vmax.f32 %v586_v34, %v2830_v44  ;;  %v1152_v54 = vmax.f32 %v587_v35, %v2831_v45  ;;  %v1153_v55 = vmax.f32 %v588_v36, %v2832_v46  ;;  %v34_v36 = vld [vmem:[%s3542_s0 + $0xd0] sm:$0xff] }
  0x1a   :  { %v1497_v56 = vrot.slane %v1483_v48, %v2967_v23  ;;  %v1505_v57 = vrot.slane %v1150_v49, %v2967_v23  ;;  %v2723_v58 = vrot.slane %v27_v47, 9  ;;  %v589_v59 = vmax.f32 %v24_v28, %v2720_v42 }
  0x1b   :  { %v1512_v61 = vrot.slane %v1151_v53, %v2967_v23  ;;  %v1519_v62 = vrot.slane %v1152_v54, %v2967_v23  ;;  %v1526_v63 = vrot.slane %v1153_v55, %v2967_v23  ;;  %v590_v1 = vmax.f32 %v25_v37, %v2721_v50 }
  0x1c   :  { %v1498_v3 = vcombine.low %v1490_v52, %v1497_v56  ;;  %v591_v4 = vmax.f32 %v26_v38, %v2722_v51  ;;  %v592_v5 = vmax.f32 %v27_v47, %v2723_v58  ;;  %v2833_v6 = vrot.slane %v589_v59, 10  ;;  %v36_v58 = vld [vmem:[%s3542_s0 + $0xe0] sm:$0xff] }
  0x1d   :  { %v1527_v8 = vcombine.low %v1505_v57, %v1512_v61  ;;  %v1528_v9 = vcombine.low %v1519_v62, %v1526_v63  ;;  %v2834_v10 = vrot.slane %v590_v1, 10  ;;  %v2724_v12 = vrot.slane %v28_v60, 9 }
  0x1e   :  { %2669 = vst [vmem:[%s3543_s1 + $0x10] sm:$0xff] %v1498_v3  ;;  %v2835_v13 = vrot.slane %v591_v4, 10  ;;  %v2836_v14 = vrot.slane %v592_v5, 10  ;;  %v1154_v15 = vmax.f32 %v589_v59, %v2833_v6  ;;  %v2725_v16 = vrot.slane %v29_v2, 9  ;;  %v37_v59 = vld [vmem:[%s3542_s0 + $0xe8] sm:$0xff]  ;;  %v39_v6 = vld [vmem:[%s3542_s0 + $0xf8] sm:$0xff] }
  0x1f   :  { %v1535_v17 = vrot.slane %v1527_v8, %v2967_v23  ;;  %v1542_v18 = vrot.slane %v1528_v9, %v2967_v23  ;;  %v1155_v19 = vmax.f32 %v590_v1, %v2834_v10  ;;  %v2726_v20 = vrot.slane %v30_v7, 9 }
  0x20   :  { %v1156_v21 = vmax.f32 %v591_v4, %v2835_v13  ;;  %v1157_v22 = vmax.f32 %v592_v5, %v2836_v14  ;;  %v1550_v24 = vrot.slane %v1154_v15, %v2967_v23  ;;  %v2727_v25 = vrot.slane %v31_v11, 9  ;;  %v38_v5 = vld [vmem:[%s3542_s0 + $0xf0] sm:$0xff] }
  0x21   :  { %v1543_v27 = vcombine.low %v1535_v17, %v1542_v18  ;;  %v1557_v28 = vrot.slane %v1155_v19, %v2967_v23  ;;  %v593_v29 = vmax.f32 %v28_v60, %v2724_v12  ;;  %v594_v30 = vmax.f32 %v29_v2, %v2725_v16 }
  0x22   :  { %v1564_v32 = vrot.slane %v1156_v21, %v2967_v23  ;;  %v1571_v33 = vrot.slane %v1157_v22, %v2967_v23  ;;  %v595_v34 = vmax.f32 %v30_v7, %v2726_v20  ;;  %v596_v35 = vmax.f32 %v31_v11, %v2727_v25  ;;  %v41_v25 = vld [vmem:[%s3542_s0 + $0x108] sm:$0xff] }
  0x23   :  { %2670 = vst [vmem:[%s3543_s1 + $0x18] sm:$0xff] %v1543_v27  ;;  %v1572_v37 = vcombine.low %v1550_v24, %v1557_v28  ;;  %v2837_v38 = vrot.slane %v593_v29, 10  ;;  %v2838_v39 = vrot.slane %v594_v30, 10  ;;  %v2728_v41 = vrot.slane %v32_v26, 9  ;;  %v40_v24 = vld [vmem:[%s3542_s0 + $0x100] sm:$0xff] }
  0x24   :  { %v1573_v42 = vcombine.low %v1564_v32, %v1571_v33  ;;  %v2839_v43 = vrot.slane %v595_v34, 10  ;;  %v2840_v44 = vrot.slane %v596_v35, 10  ;;  %v2729_v45 = vrot.slane %v33_v31, 9 }
  0x25   :  { %v1580_v46 = vrot.slane %v1572_v37, %v2967_v23  ;;  %v1158_v47 = vmax.f32 %v593_v29, %v2837_v38  ;;  %v1159_v48 = vmax.f32 %v594_v30, %v2838_v39  ;;  %v2730_v49 = vrot.slane %v34_v36, 9 }
  0x26   :  { %v1587_v50 = vrot.slane %v1573_v42, %v2967_v23  ;;  %v1160_v51 = vmax.f32 %v595_v34, %v2839_v43  ;;  %v1161_v52 = vmax.f32 %v596_v35, %v2840_v44  ;;  %v2731_v53 = vrot.slane %v35_v40, 9  ;;  %v42_v34 = vld [vmem:[%s3542_s0 + $0x110] sm:$0xff]  ;;  %v43_v35 = vld [vmem:[%s3542_s0 + $0x118] sm:$0xff] }
  0x27   :  { %v1595_v54 = vrot.slane %v1158_v47, %v2967_v23  ;;  %v1602_v55 = vrot.slane %v1159_v48, %v2967_v23  ;;  %v597_v56 = vmax.f32 %v32_v26, %v2728_v41  ;;  %v598_v57 = vmax.f32 %v33_v31, %v2729_v45 }
  0x28   :  { %v1588_v60 = vcombine.low %v1580_v46, %v1587_v50  ;;  %v1609_v61 = vrot.slane %v1160_v51, %v2967_v23  ;;  %v1616_v62 = vrot.slane %v1161_v52, %v2967_v23  ;;  %v599_v63 = vmax.f32 %v34_v36, %v2730_v49  ;;  %v44_v52 = vld [vmem:[%s3542_s0 + $0x120] sm:$0xff] }
  0x29   :  { %v1617_v1 = vcombine.low %v1595_v54, %v1602_v55  ;;  %v600_v2 = vmax.f32 %v35_v40, %v2731_v53  ;;  %v2841_v3 = vrot.slane %v597_v56, 10  ;;  %v2842_v4 = vrot.slane %v598_v57, 10 }
  0x2a   :  { %2671 = vst [vmem:[%s3543_s1 + $0x20] sm:$0xff] %v1588_v60  ;;  %v1618_v7 = vcombine.low %v1609_v61, %v1616_v62  ;;  %v2843_v8 = vrot.slane %v599_v63, 10  ;;  %v2732_v9 = vrot.slane %v36_v58, 9  ;;  %v2733_v10 = vrot.slane %v37_v59, 9  ;;  %v46_v62 = vld [vmem:[%s3542_s0 + $0x130] sm:$0xff] }
  0x2b   :  { %v1625_v11 = vrot.slane %v1617_v1, %v2967_v23  ;;  %v2844_v12 = vrot.slane %v600_v2, 10  ;;  %v1162_v13 = vmax.f32 %v597_v56, %v2841_v3  ;;  %v1163_v14 = vmax.f32 %v598_v57, %v2842_v4  ;;  %v45_v57 = vld [vmem:[%s3542_s0 + $0x128] sm:$0xff]  ;;  %v47_v3 = vld [vmem:[%s3542_s0 + $0x138] sm:$0xff] }
  0x2c   :  { %v1632_v15 = vrot.slane %v1618_v7, %v2967_v23  ;;  %v1164_v16 = vmax.f32 %v599_v63, %v2843_v8  ;;  %v2734_v17 = vrot.slane %v38_v5, 9  ;;  %v2735_v18 = vrot.slane %v39_v6, 9 }
  0x2d   :  { %v1165_v19 = vmax.f32 %v600_v2, %v2844_v12  ;;  %v1640_v20 = vrot.slane %v1162_v13, %v2967_v23  ;;  %v1647_v21 = vrot.slane %v1163_v14, %v2967_v23  ;;  %v601_v22 = vmax.f32 %v36_v58, %v2732_v9 }
  0x2e   :  { %v1633_v26 = vcombine.low %v1625_v11, %v1632_v15  ;;  %v1654_v27 = vrot.slane %v1164_v16, %v2967_v23  ;;  %v602_v28 = vmax.f32 %v37_v59, %v2733_v10  ;;  %v603_v29 = vmax.f32 %v38_v5, %v2734_v17  ;;  %v48_v17 = vld [vmem:[%s3542_s0 + $0x140] sm:$0xff] }
  0x2f   :  { %v1661_v30 = vrot.slane %v1165_v19, %v2967_v23  ;;  %v1662_v31 = vcombine.low %v1640_v20, %v1647_v21  ;;  %v604_v32 = vmax.f32 %v39_v6, %v2735_v18  ;;  %v2845_v33 = vrot.slane %v601_v22, 10 }
  0x30   :  { %2672 = vst [vmem:[%s3543_s1 + $0x28] sm:$0xff] %v1633_v26  ;;  %v2846_v36 = vrot.slane %v602_v28, 10  ;;  %v2847_v37 = vrot.slane %v603_v29, 10  ;;  %v2736_v38 = vrot.slane %v40_v24, 9  ;;  %v2737_v39 = vrot.slane %v41_v25, 9 }
  0x31   :  { %v1663_v40 = vcombine.low %v1654_v27, %v1661_v30  ;;  %v1670_v41 = vrot.slane %v1662_v31, %v2967_v23  ;;  %v2848_v42 = vrot.slane %v604_v32, 10  ;;  %v1166_v43 = vmax.f32 %v601_v22, %v2845_v33  ;;  %v49_v22 = vld [vmem:[%s3542_s0 + $0x148] sm:$0xff] }
  0x32   :  { %v1167_v44 = vmax.f32 %v602_v28, %v2846_v36  ;;  %v1168_v45 = vmax.f32 %v603_v29, %v2847_v37  ;;  %v2738_v46 = vrot.slane %v42_v34, 9  ;;  %v2739_v47 = vrot.slane %v43_v35, 9  ;;  %v50_v28 = vld [vmem:[%s3542_s0 + $0x150] sm:$0xff] }
  0x33   :  { %v1677_v48 = vrot.slane %v1663_v40, %v2967_v23  ;;  %v1169_v49 = vmax.f32 %v604_v32, %v2848_v42  ;;  %v1685_v50 = vrot.slane %v1166_v43, %v2967_v23  ;;  %v605_v51 = vmax.f32 %v40_v24, %v2736_v38  ;;  %v51_v32 = vld [vmem:[%s3542_s0 + $0x158] sm:$0xff] }
  0x34   :  { %v1692_v53 = vrot.slane %v1167_v44, %v2967_v23  ;;  %v1699_v54 = vrot.slane %v1168_v45, %v2967_v23  ;;  %v606_v55 = vmax.f32 %v41_v25, %v2737_v39  ;;  %v607_v56 = vmax.f32 %v42_v34, %v2738_v46 }
  0x35   :  { %v1678_v58 = vcombine.low %v1670_v41, %v1677_v48  ;;  %v1706_v59 = vrot.slane %v1169_v49, %v2967_v23  ;;  %v608_v60 = vmax.f32 %v43_v35, %v2739_v47  ;;  %v2849_v61 = vrot.slane %v605_v51, 10 }
  0x36   :  { %v1707_v63 = vcombine.low %v1685_v50, %v1692_v53  ;;  %v2850_v1 = vrot.slane %v606_v55, 10  ;;  %v2851_v2 = vrot.slane %v607_v56, 10  ;;  %v2740_v4 = vrot.slane %v44_v52, 9  ;;  %v52_v50 = vld [vmem:[%s3542_s0 + $0x160] sm:$0xff] }
  0x37   :  { %2673 = vst [vmem:[%s3543_s1 + $0x30] sm:$0xff] %v1678_v58  ;;  %v1708_v5 = vcombine.low %v1699_v54, %v1706_v59  ;;  %v2852_v6 = vrot.slane %v608_v60, 10  ;;  %v1170_v7 = vmax.f32 %v605_v51, %v2849_v61  ;;  %v2741_v8 = vrot.slane %v45_v57, 9  ;;  %v53_v51 = vld [vmem:[%s3542_s0 + $0x168] sm:$0xff]  ;;  %v55_v61 = vld [vmem:[%s3542_s0 + $0x178] sm:$0xff] }
  0x38   :  { %v1715_v9 = vrot.slane %v1707_v63, %v2967_v23  ;;  %v1171_v10 = vmax.f32 %v606_v55, %v2850_v1  ;;  %v1172_v11 = vmax.f32 %v607_v56, %v2851_v2  ;;  %v2742_v12 = vrot.slane %v46_v62, 9 }
  0x39   :  { %v1722_v13 = vrot.slane %v1708_v5, %v2967_v23  ;;  %v1173_v14 = vmax.f32 %v608_v60, %v2852_v6  ;;  %v1730_v15 = vrot.slane %v1170_v7, %v2967_v23  ;;  %v2743_v16 = vrot.slane %v47_v3, 9  ;;  %v54_v60 = vld [vmem:[%s3542_s0 + $0x170] sm:$0xff] }
  0x3a   :  { %v1737_v18 = vrot.slane %v1171_v10, %v2967_v23  ;;  %v1744_v19 = vrot.slane %v1172_v11, %v2967_v23  ;;  %v609_v20 = vmax.f32 %v44_v52, %v2740_v4  ;;  %v610_v21 = vmax.f32 %v45_v57, %v2741_v8 }
  0x3b   :  { %v1723_v24 = vcombine.low %v1715_v9, %v1722_v13  ;;  %v1751_v25 = vrot.slane %v1173_v14, %v2967_v23  ;;  %v611_v26 = vmax.f32 %v46_v62, %v2742_v12  ;;  %v612_v27 = vmax.f32 %v47_v3, %v2743_v16  ;;  %v57_v16 = vld [vmem:[%s3542_s0 + $0x188] sm:$0xff] }
  0x3c   :  { %v1752_v29 = vcombine.low %v1730_v15, %v1737_v18  ;;  %v2853_v30 = vrot.slane %v609_v20, 10  ;;  %v2854_v31 = vrot.slane %v610_v21, 10  ;;  %v2744_v33 = vrot.slane %v48_v17, 9  ;;  %v56_v15 = vld [vmem:[%s3542_s0 + $0x180] sm:$0xff] }
  0x3d   :  { %2674 = vst [vmem:[%s3543_s1 + $0x38] sm:$0xff] %v1723_v24  ;;  %v1753_v34 = vcombine.low %v1744_v19, %v1751_v25  ;;  %v2855_v35 = vrot.slane %v611_v26, 10  ;;  %v2856_v36 = vrot.slane %v612_v27, 10  ;;  %v2745_v37 = vrot.slane %v49_v22, 9 }
  0x3e   :  { %v1760_v38 = vrot.slane %v1752_v29, %v2967_v23  ;;  %v1174_v39 = vmax.f32 %v609_v20, %v2853_v30  ;;  %v1175_v40 = vmax.f32 %v610_v21, %v2854_v31  ;;  %v2746_v41 = vrot.slane %v50_v28, 9 }
  0x3f   :  { %v1767_v42 = vrot.slane %v1753_v34, %v2967_v23  ;;  %v1176_v43 = vmax.f32 %v611_v26, %v2855_v35  ;;  %v1177_v44 = vmax.f32 %v612_v27, %v2856_v36  ;;  %v2747_v45 = vrot.slane %v51_v32, 9  ;;  %v58_v26 = vld [vmem:[%s3542_s0 + $0x190] sm:$0xff]  ;;  %v59_v27 = vld [vmem:[%s3542_s0 + $0x198] sm:$0xff] }
  0x40   :  { %v1775_v46 = vrot.slane %v1174_v39, %v2967_v23  ;;  %v1782_v47 = vrot.slane %v1175_v40, %v2967_v23  ;;  %v613_v48 = vmax.f32 %v48_v17, %v2744_v33  ;;  %v614_v49 = vmax.f32 %v49_v22, %v2745_v37 }
  0x41   :  { %v1768_v52 = vcombine.low %v1760_v38, %v1767_v42  ;;  %v1789_v53 = vrot.slane %v1176_v43, %v2967_v23  ;;  %v1796_v54 = vrot.slane %v1177_v44, %v2967_v23  ;;  %v615_v55 = vmax.f32 %v50_v28, %v2746_v41  ;;  %v60_v44 = vld [vmem:[%s3542_s0 + $0x1a0] sm:$0xff] }
  0x42   :  { %v1797_v56 = vcombine.low %v1775_v46, %v1782_v47  ;;  %v616_v57 = vmax.f32 %v51_v32, %v2747_v45  ;;  %v2857_v58 = vrot.slane %v613_v48, 10  ;;  %v2858_v59 = vrot.slane %v614_v49, 10 }
  0x43   :  { %2675 = vst [vmem:[%s3543_s1 + $0x40] sm:$0xff] %v1768_v52  ;;  %v1798_v62 = vcombine.low %v1789_v53, %v1796_v54  ;;  %v2859_v63 = vrot.slane %v615_v55, 10  ;;  %v2748_v1 = vrot.slane %v52_v50, 9  ;;  %v2749_v2 = vrot.slane %v53_v51, 9  ;;  %v62_v54 = vld [vmem:[%s3542_s0 + $0x1b0] sm:$0xff] }
  0x44   :  { %v1805_v3 = vrot.slane %v1797_v56, %v2967_v23  ;;  %v2860_v4 = vrot.slane %v616_v57, 10  ;;  %v1178_v5 = vmax.f32 %v613_v48, %v2857_v58  ;;  %v1179_v6 = vmax.f32 %v614_v49, %v2858_v59  ;;  %v61_v49 = vld [vmem:[%s3542_s0 + $0x1a8] sm:$0xff]  ;;  %v63_v58 = vld [vmem:[%s3542_s0 + $0x1b8] sm:$0xff] }
  0x45   :  { %v1812_v7 = vrot.slane %v1798_v62, %v2967_v23  ;;  %v1180_v8 = vmax.f32 %v615_v55, %v2859_v63  ;;  %v2750_v9 = vrot.slane %v54_v60, 9  ;;  %v2751_v10 = vrot.slane %v55_v61, 9 }
  0x46   :  { %v1181_v11 = vmax.f32 %v616_v57, %v2860_v4  ;;  %v1820_v12 = vrot.slane %v1178_v5, %v2967_v23  ;;  %v1827_v13 = vrot.slane %v1179_v6, %v2967_v23  ;;  %v617_v14 = vmax.f32 %v52_v50, %v2748_v1 }
  0x47   :  { %v1813_v17 = vcombine.low %v1805_v3, %v1812_v7  ;;  %v1834_v18 = vrot.slane %v1180_v8, %v2967_v23  ;;  %v618_v19 = vmax.f32 %v53_v51, %v2749_v2  ;;  %v619_v20 = vmax.f32 %v54_v60, %v2750_v9  ;;  %v64_v9 = vld [vmem:[%s3542_s0 + $0x1c0] sm:$0xff] }
  0x48   :  { %v1841_v21 = vrot.slane %v1181_v11, %v2967_v23  ;;  %v1842_v22 = vcombine.low %v1820_v12, %v1827_v13  ;;  %v620_v24 = vmax.f32 %v55_v61, %v2751_v10  ;;  %v2861_v25 = vrot.slane %v617_v14, 10 }
  0x49   :  { %2676 = vst [vmem:[%s3543_s1 + $0x48] sm:$0xff] %v1813_v17  ;;  %v2862_v28 = vrot.slane %v618_v19, 10  ;;  %v2863_v29 = vrot.slane %v619_v20, 10  ;;  %v2752_v30 = vrot.slane %v56_v15, 9  ;;  %v2753_v31 = vrot.slane %v57_v16, 9 }
  0x4a   :  { %v1843_v32 = vcombine.low %v1834_v18, %v1841_v21  ;;  %v1850_v33 = vrot.slane %v1842_v22, %v2967_v23  ;;  %v2864_v34 = vrot.slane %v620_v24, 10  ;;  %v1182_v35 = vmax.f32 %v617_v14, %v2861_v25  ;;  %v65_v14 = vld [vmem:[%s3542_s0 + $0x1c8] sm:$0xff] }
  0x4b   :  { %v1183_v36 = vmax.f32 %v618_v19, %v2862_v28  ;;  %v1184_v37 = vmax.f32 %v619_v20, %v2863_v29  ;;  %v2754_v38 = vrot.slane %v58_v26, 9  ;;  %v2755_v39 = vrot.slane %v59_v27, 9  ;;  %v66_v19 = vld [vmem:[%s3542_s0 + $0x1d0] sm:$0xff] }
  0x4c   :  { %v1857_v40 = vrot.slane %v1843_v32, %v2967_v23  ;;  %v1185_v41 = vmax.f32 %v620_v24, %v2864_v34  ;;  %v1865_v42 = vrot.slane %v1182_v35, %v2967_v23  ;;  %v621_v43 = vmax.f32 %v56_v15, %v2752_v30  ;;  %v67_v24 = vld [vmem:[%s3542_s0 + $0x1d8] sm:$0xff] }
  0x4d   :  { %v1872_v45 = vrot.slane %v1183_v36, %v2967_v23  ;;  %v1879_v46 = vrot.slane %v1184_v37, %v2967_v23  ;;  %v622_v47 = vmax.f32 %v57_v16, %v2753_v31  ;;  %v623_v48 = vmax.f32 %v58_v26, %v2754_v38 }
  0x4e   :  { %v1858_v50 = vcombine.low %v1850_v33, %v1857_v40  ;;  %v1886_v51 = vrot.slane %v1185_v41, %v2967_v23  ;;  %v624_v52 = vmax.f32 %v59_v27, %v2755_v39  ;;  %v2865_v53 = vrot.slane %v621_v43, 10 }
  0x4f   :  { %v1887_v55 = vcombine.low %v1865_v42, %v1872_v45  ;;  %v2866_v56 = vrot.slane %v622_v47, 10  ;;  %v2867_v57 = vrot.slane %v623_v48, 10  ;;  %v2756_v59 = vrot.slane %v60_v44, 9  ;;  %v68_v42 = vld [vmem:[%s3542_s0 + $0x1e0] sm:$0xff] }
  0x50   :  { %2677 = vst [vmem:[%s3543_s1 + $0x50] sm:$0xff] %v1858_v50  ;;  %v1888_v60 = vcombine.low %v1879_v46, %v1886_v51  ;;  %v2868_v61 = vrot.slane %v624_v52, 10  ;;  %v1186_v62 = vmax.f32 %v621_v43, %v2865_v53  ;;  %v2757_v63 = vrot.slane %v61_v49, 9  ;;  %v69_v43 = vld [vmem:[%s3542_s0 + $0x1e8] sm:$0xff]  ;;  %v71_v53 = vld [vmem:[%s3542_s0 + $0x1f8] sm:$0xff] }
  0x51   :  { %v1895_v1 = vrot.slane %v1887_v55, %v2967_v23  ;;  %v1187_v2 = vmax.f32 %v622_v47, %v2866_v56  ;;  %v1188_v3 = vmax.f32 %v623_v48, %v2867_v57  ;;  %v2758_v4 = vrot.slane %v62_v54, 9 }
  0x52   :  { %v1902_v5 = vrot.slane %v1888_v60, %v2967_v23  ;;  %v1189_v6 = vmax.f32 %v624_v52, %v2868_v61  ;;  %v1910_v7 = vrot.slane %v1186_v62, %v2967_v23  ;;  %v2759_v8 = vrot.slane %v63_v58, 9  ;;  %v70_v52 = vld [vmem:[%s3542_s0 + $0x1f0] sm:$0xff] }
  0x53   :  { %v1917_v10 = vrot.slane %v1187_v2, %v2967_v23  ;;  %v1924_v11 = vrot.slane %v1188_v3, %v2967_v23  ;;  %v625_v12 = vmax.f32 %v60_v44, %v2756_v59  ;;  %v626_v13 = vmax.f32 %v61_v49, %v2757_v63 }
  0x54   :  { %v1903_v15 = vcombine.low %v1895_v1, %v1902_v5  ;;  %v1931_v16 = vrot.slane %v1189_v6, %v2967_v23  ;;  %v627_v17 = vmax.f32 %v62_v54, %v2758_v4  ;;  %v628_v18 = vmax.f32 %v63_v58, %v2759_v8  ;;  %v73_v8 = vld [vmem:[%s3542_s0 + $0x208] sm:$0xff] }
  0x55   :  { %v1932_v20 = vcombine.low %v1910_v7, %v1917_v10  ;;  %v2869_v21 = vrot.slane %v625_v12, 10  ;;  %v2870_v22 = vrot.slane %v626_v13, 10  ;;  %v2760_v25 = vrot.slane %v64_v9, 9  ;;  %v72_v7 = vld [vmem:[%s3542_s0 + $0x200] sm:$0xff] }
  0x56   :  { %2678 = vst [vmem:[%s3543_s1 + $0x58] sm:$0xff] %v1903_v15  ;;  %v1933_v26 = vcombine.low %v1924_v11, %v1931_v16  ;;  %v2871_v27 = vrot.slane %v627_v17, 10  ;;  %v2872_v28 = vrot.slane %v628_v18, 10  ;;  %v2761_v29 = vrot.slane %v65_v14, 9 }
  0x57   :  { %v1940_v30 = vrot.slane %v1932_v20, %v2967_v23  ;;  %v1190_v31 = vmax.f32 %v625_v12, %v2869_v21  ;;  %v1191_v32 = vmax.f32 %v626_v13, %v2870_v22  ;;  %v2762_v33 = vrot.slane %v66_v19, 9 }
  0x58   :  { %v1947_v34 = vrot.slane %v1933_v26, %v2967_v23  ;;  %v1192_v35 = vmax.f32 %v627_v17, %v2871_v27  ;;  %v1193_v36 = vmax.f32 %v628_v18, %v2872_v28  ;;  %v2763_v37 = vrot.slane %v67_v24, 9  ;;  %v74_v17 = vld [vmem:[%s3542_s0 + $0x210] sm:$0xff]  ;;  %v75_v18 = vld [vmem:[%s3542_s0 + $0x218] sm:$0xff] }
  0x59   :  { %v1955_v38 = vrot.slane %v1190_v31, %v2967_v23  ;;  %v1962_v39 = vrot.slane %v1191_v32, %v2967_v23  ;;  %v629_v40 = vmax.f32 %v64_v9, %v2760_v25  ;;  %v630_v41 = vmax.f32 %v65_v14, %v2761_v29 }
  0x5a   :  { %v1948_v44 = vcombine.low %v1940_v30, %v1947_v34  ;;  %v1969_v45 = vrot.slane %v1192_v35, %v2967_v23  ;;  %v1976_v46 = vrot.slane %v1193_v36, %v2967_v23  ;;  %v631_v47 = vmax.f32 %v66_v19, %v2762_v33  ;;  %v76_v36 = vld [vmem:[%s3542_s0 + $0x220] sm:$0xff] }
  0x5b   :  { %v1977_v48 = vcombine.low %v1955_v38, %v1962_v39  ;;  %v632_v49 = vmax.f32 %v67_v24, %v2763_v37  ;;  %v2873_v50 = vrot.slane %v629_v40, 10  ;;  %v2874_v51 = vrot.slane %v630_v41, 10 }
  0x5c   :  { %2679 = vst [vmem:[%s3543_s1 + $0x60] sm:$0xff] %v1948_v44  ;;  %v1978_v54 = vcombine.low %v1969_v45, %v1976_v46  ;;  %v2875_v55 = vrot.slane %v631_v47, 10  ;;  %v2764_v56 = vrot.slane %v68_v42, 9  ;;  %v2765_v57 = vrot.slane %v69_v43, 9  ;;  %v78_v46 = vld [vmem:[%s3542_s0 + $0x230] sm:$0xff] }
  0x5d   :  { %v1985_v58 = vrot.slane %v1977_v48, %v2967_v23  ;;  %v2876_v59 = vrot.slane %v632_v49, 10  ;;  %v1194_v60 = vmax.f32 %v629_v40, %v2873_v50  ;;  %v1195_v61 = vmax.f32 %v630_v41, %v2874_v51  ;;  %v77_v41 = vld [vmem:[%s3542_s0 + $0x228] sm:$0xff]  ;;  %v79_v50 = vld [vmem:[%s3542_s0 + $0x238] sm:$0xff] }
  0x5e   :  { %v1992_v62 = vrot.slane %v1978_v54, %v2967_v23  ;;  %v1196_v63 = vmax.f32 %v631_v47, %v2875_v55  ;;  %v2766_v1 = vrot.slane %v70_v52, 9  ;;  %v2767_v2 = vrot.slane %v71_v53, 9 }
  0x5f   :  { %v1197_v3 = vmax.f32 %v632_v49, %v2876_v59  ;;  %v2000_v4 = vrot.slane %v1194_v60, %v2967_v23  ;;  %v2007_v5 = vrot.slane %v1195_v61, %v2967_v23  ;;  %v633_v6 = vmax.f32 %v68_v42, %v2764_v56 }
  0x60   :  { %v1993_v9 = vcombine.low %v1985_v58, %v1992_v62  ;;  %v2014_v10 = vrot.slane %v1196_v63, %v2967_v23  ;;  %v634_v11 = vmax.f32 %v69_v43, %v2765_v57  ;;  %v635_v12 = vmax.f32 %v70_v52, %v2766_v1  ;;  %v80_v1 = vld [vmem:[%s3542_s0 + $0x240] sm:$0xff] }
  0x61   :  { %v2021_v13 = vrot.slane %v1197_v3, %v2967_v23  ;;  %v2022_v14 = vcombine.low %v2000_v4, %v2007_v5  ;;  %v636_v15 = vmax.f32 %v71_v53, %v2767_v2  ;;  %v2877_v16 = vrot.slane %v633_v6, 10 }
  0x62   :  { %2680 = vst [vmem:[%s3543_s1 + $0x68] sm:$0xff] %v1993_v9  ;;  %v2878_v19 = vrot.slane %v634_v11, 10  ;;  %v2879_v20 = vrot.slane %v635_v12, 10  ;;  %v2768_v21 = vrot.slane %v72_v7, 9  ;;  %v2769_v22 = vrot.slane %v73_v8, 9 }
  0x63   :  { %v2023_v24 = vcombine.low %v2014_v10, %v2021_v13  ;;  %v2030_v25 = vrot.slane %v2022_v14, %v2967_v23  ;;  %v2880_v26 = vrot.slane %v636_v15, 10  ;;  %v1198_v27 = vmax.f32 %v633_v6, %v2877_v16  ;;  %v81_v6 = vld [vmem:[%s3542_s0 + $0x248] sm:$0xff] }
  0x64   :  { %v1199_v28 = vmax.f32 %v634_v11, %v2878_v19  ;;  %v1200_v29 = vmax.f32 %v635_v12, %v2879_v20  ;;  %v2770_v30 = vrot.slane %v74_v17, 9  ;;  %v2771_v31 = vrot.slane %v75_v18, 9  ;;  %v82_v11 = vld [vmem:[%s3542_s0 + $0x250] sm:$0xff] }
  0x65   :  { %v2037_v32 = vrot.slane %v2023_v24, %v2967_v23  ;;  %v1201_v33 = vmax.f32 %v636_v15, %v2880_v26  ;;  %v2045_v34 = vrot.slane %v1198_v27, %v2967_v23  ;;  %v637_v35 = vmax.f32 %v72_v7, %v2768_v21  ;;  %v83_v15 = vld [vmem:[%s3542_s0 + $0x258] sm:$0xff] }
  0x66   :  { %v2052_v37 = vrot.slane %v1199_v28, %v2967_v23  ;;  %v2059_v38 = vrot.slane %v1200_v29, %v2967_v23  ;;  %v638_v39 = vmax.f32 %v73_v8, %v2769_v22  ;;  %v639_v40 = vmax.f32 %v74_v17, %v2770_v30 }
  0x67   :  { %v2038_v42 = vcombine.low %v2030_v25, %v2037_v32  ;;  %v2066_v43 = vrot.slane %v1201_v33, %v2967_v23  ;;  %v640_v44 = vmax.f32 %v75_v18, %v2771_v31  ;;  %v2881_v45 = vrot.slane %v637_v35, 10 }
  0x68   :  { %v2067_v47 = vcombine.low %v2045_v34, %v2052_v37  ;;  %v2882_v48 = vrot.slane %v638_v39, 10  ;;  %v2883_v49 = vrot.slane %v639_v40, 10  ;;  %v2772_v51 = vrot.slane %v76_v36, 9  ;;  %v84_v34 = vld [vmem:[%s3542_s0 + $0x260] sm:$0xff] }
  0x69   :  { %2681 = vst [vmem:[%s3543_s1 + $0x70] sm:$0xff] %v2038_v42  ;;  %v2068_v52 = vcombine.low %v2059_v38, %v2066_v43  ;;  %v2884_v53 = vrot.slane %v640_v44, 10  ;;  %v1202_v54 = vmax.f32 %v637_v35, %v2881_v45  ;;  %v2773_v55 = vrot.slane %v77_v41, 9  ;;  %v85_v35 = vld [vmem:[%s3542_s0 + $0x268] sm:$0xff]  ;;  %v87_v45 = vld [vmem:[%s3542_s0 + $0x278] sm:$0xff] }
  0x6a   :  { %v2075_v56 = vrot.slane %v2067_v47, %v2967_v23  ;;  %v1203_v57 = vmax.f32 %v638_v39, %v2882_v48  ;;  %v1204_v58 = vmax.f32 %v639_v40, %v2883_v49  ;;  %v2774_v59 = vrot.slane %v78_v46, 9 }
  0x6b   :  { %v2082_v60 = vrot.slane %v2068_v52, %v2967_v23  ;;  %v1205_v61 = vmax.f32 %v640_v44, %v2884_v53  ;;  %v2090_v62 = vrot.slane %v1202_v54, %v2967_v23  ;;  %v2775_v63 = vrot.slane %v79_v50, 9  ;;  %v86_v44 = vld [vmem:[%s3542_s0 + $0x270] sm:$0xff] }
  0x6c   :  { %v2097_v2 = vrot.slane %v1203_v57, %v2967_v23  ;;  %v2104_v3 = vrot.slane %v1204_v58, %v2967_v23  ;;  %v641_v4 = vmax.f32 %v76_v36, %v2772_v51  ;;  %v642_v5 = vmax.f32 %v77_v41, %v2773_v55 }
  0x6d   :  { %v2083_v7 = vcombine.low %v2075_v56, %v2082_v60  ;;  %v2111_v8 = vrot.slane %v1205_v61, %v2967_v23  ;;  %v643_v9 = vmax.f32 %v78_v46, %v2774_v59  ;;  %v644_v10 = vmax.f32 %v79_v50, %v2775_v63  ;;  %v89_v63 = vld [vmem:[%s3542_s0 + $0x288] sm:$0xff] }
  0x6e   :  { %v2112_v12 = vcombine.low %v2090_v62, %v2097_v2  ;;  %v2885_v13 = vrot.slane %v641_v4, 10  ;;  %v2886_v14 = vrot.slane %v642_v5, 10  ;;  %v2776_v16 = vrot.slane %v80_v1, 9  ;;  %v88_v62 = vld [vmem:[%s3542_s0 + $0x280] sm:$0xff] }
  0x6f   :  { %2682 = vst [vmem:[%s3543_s1 + $0x78] sm:$0xff] %v2083_v7  ;;  %v2113_v17 = vcombine.low %v2104_v3, %v2111_v8  ;;  %v2887_v18 = vrot.slane %v643_v9, 10  ;;  %v2888_v19 = vrot.slane %v644_v10, 10  ;;  %v2777_v20 = vrot.slane %v81_v6, 9 }
  0x70   :  { %v2120_v21 = vrot.slane %v2112_v12, %v2967_v23  ;;  %v1206_v22 = vmax.f32 %v641_v4, %v2885_v13  ;;  %v1207_v24 = vmax.f32 %v642_v5, %v2886_v14  ;;  %v2778_v25 = vrot.slane %v82_v11, 9 }
  0x71   :  { %v2127_v26 = vrot.slane %v2113_v17, %v2967_v23  ;;  %v1208_v27 = vmax.f32 %v643_v9, %v2887_v18  ;;  %v1209_v28 = vmax.f32 %v644_v10, %v2888_v19  ;;  %v2779_v29 = vrot.slane %v83_v15, 9  ;;  %v90_v9 = vld [vmem:[%s3542_s0 + $0x290] sm:$0xff]  ;;  %v91_v10 = vld [vmem:[%s3542_s0 + $0x298] sm:$0xff] }
  0x72   :  { %v2135_v30 = vrot.slane %v1206_v22, %v2967_v23  ;;  %v2142_v31 = vrot.slane %v1207_v24, %v2967_v23  ;;  %v645_v32 = vmax.f32 %v80_v1, %v2776_v16  ;;  %v646_v33 = vmax.f32 %v81_v6, %v2777_v20 }
  0x73   :  { %v2128_v36 = vcombine.low %v2120_v21, %v2127_v26  ;;  %v2149_v37 = vrot.slane %v1208_v27, %v2967_v23  ;;  %v2156_v38 = vrot.slane %v1209_v28, %v2967_v23  ;;  %v647_v39 = vmax.f32 %v82_v11, %v2778_v25  ;;  %v92_v28 = vld [vmem:[%s3542_s0 + $0x2a0] sm:$0xff] }
  0x74   :  { %v2157_v40 = vcombine.low %v2135_v30, %v2142_v31  ;;  %v648_v41 = vmax.f32 %v83_v15, %v2779_v29  ;;  %v2889_v42 = vrot.slane %v645_v32, 10  ;;  %v2890_v43 = vrot.slane %v646_v33, 10 }
  0x75   :  { %2683 = vst [vmem:[%s3543_s1 + $0x80] sm:$0xff] %v2128_v36  ;;  %v2158_v46 = vcombine.low %v2149_v37, %v2156_v38  ;;  %v2891_v47 = vrot.slane %v647_v39, 10  ;;  %v2780_v48 = vrot.slane %v84_v34, 9  ;;  %v2781_v49 = vrot.slane %v85_v35, 9  ;;  %v94_v38 = vld [vmem:[%s3542_s0 + $0x2b0] sm:$0xff] }
  0x76   :  { %v2165_v50 = vrot.slane %v2157_v40, %v2967_v23  ;;  %v2892_v51 = vrot.slane %v648_v41, 10  ;;  %v1210_v52 = vmax.f32 %v645_v32, %v2889_v42  ;;  %v1211_v53 = vmax.f32 %v646_v33, %v2890_v43  ;;  %v93_v33 = vld [vmem:[%s3542_s0 + $0x2a8] sm:$0xff]  ;;  %v95_v42 = vld [vmem:[%s3542_s0 + $0x2b8] sm:$0xff] }
  0x77   :  { %v2172_v54 = vrot.slane %v2158_v46, %v2967_v23  ;;  %v1212_v55 = vmax.f32 %v647_v39, %v2891_v47  ;;  %v2782_v56 = vrot.slane %v86_v44, 9  ;;  %v2783_v57 = vrot.slane %v87_v45, 9 }
  0x78   :  { %v1213_v58 = vmax.f32 %v648_v41, %v2892_v51  ;;  %v2180_v59 = vrot.slane %v1210_v52, %v2967_v23  ;;  %v2187_v60 = vrot.slane %v1211_v53, %v2967_v23  ;;  %v649_v61 = vmax.f32 %v84_v34, %v2780_v48 }
  0x79   :  { %v2173_v1 = vcombine.low %v2165_v50, %v2172_v54  ;;  %v2194_v2 = vrot.slane %v1212_v55, %v2967_v23  ;;  %v650_v3 = vmax.f32 %v85_v35, %v2781_v49  ;;  %v651_v4 = vmax.f32 %v86_v44, %v2782_v56  ;;  %v96_v56 = vld [vmem:[%s3542_s0 + $0x2c0] sm:$0xff] }
  0x7a   :  { %v2201_v5 = vrot.slane %v1213_v58, %v2967_v23  ;;  %v2202_v6 = vcombine.low %v2180_v59, %v2187_v60  ;;  %v652_v7 = vmax.f32 %v87_v45, %v2783_v57  ;;  %v2893_v8 = vrot.slane %v649_v61, 10 }
  0x7b   :  { %2684 = vst [vmem:[%s3543_s1 + $0x88] sm:$0xff] %v2173_v1  ;;  %v2894_v11 = vrot.slane %v650_v3, 10  ;;  %v2895_v12 = vrot.slane %v651_v4, 10  ;;  %v2784_v13 = vrot.slane %v88_v62, 9  ;;  %v2785_v14 = vrot.slane %v89_v63, 9 }
  0x7c   :  { %v2203_v15 = vcombine.low %v2194_v2, %v2201_v5  ;;  %v2210_v16 = vrot.slane %v2202_v6, %v2967_v23  ;;  %v2896_v17 = vrot.slane %v652_v7, 10  ;;  %v1214_v18 = vmax.f32 %v649_v61, %v2893_v8  ;;  %v97_v61 = vld [vmem:[%s3542_s0 + $0x2c8] sm:$0xff] }
  0x7d   :  { %v1215_v19 = vmax.f32 %v650_v3, %v2894_v11  ;;  %v1216_v20 = vmax.f32 %v651_v4, %v2895_v12  ;;  %v2786_v21 = vrot.slane %v90_v9, 9  ;;  %v2787_v22 = vrot.slane %v91_v10, 9  ;;  %v98_v3 = vld [vmem:[%s3542_s0 + $0x2d0] sm:$0xff] }
  0x7e   :  { %v2217_v24 = vrot.slane %v2203_v15, %v2967_v23  ;;  %v1217_v25 = vmax.f32 %v652_v7, %v2896_v17  ;;  %v2225_v26 = vrot.slane %v1214_v18, %v2967_v23  ;;  %v653_v27 = vmax.f32 %v88_v62, %v2784_v13  ;;  %v99_v7 = vld [vmem:[%s3542_s0 + $0x2d8] sm:$0xff] }
  0x7f   :  { %v2232_v29 = vrot.slane %v1215_v19, %v2967_v23  ;;  %v2239_v30 = vrot.slane %v1216_v20, %v2967_v23  ;;  %v654_v31 = vmax.f32 %v89_v63, %v2785_v14  ;;  %v655_v32 = vmax.f32 %v90_v9, %v2786_v21 }
  0x80   :  { %v2218_v34 = vcombine.low %v2210_v16, %v2217_v24  ;;  %v2246_v35 = vrot.slane %v1217_v25, %v2967_v23  ;;  %v656_v36 = vmax.f32 %v91_v10, %v2787_v22  ;;  %v2897_v37 = vrot.slane %v653_v27, 10 }
  0x81   :  { %v2247_v39 = vcombine.low %v2225_v26, %v2232_v29  ;;  %v2898_v40 = vrot.slane %v654_v31, 10  ;;  %v2899_v41 = vrot.slane %v655_v32, 10  ;;  %v2788_v43 = vrot.slane %v92_v28, 9  ;;  %v100_v26 = vld [vmem:[%s3542_s0 + $0x2e0] sm:$0xff] }
  0x82   :  { %2685 = vst [vmem:[%s3543_s1 + $0x90] sm:$0xff] %v2218_v34  ;;  %v2248_v44 = vcombine.low %v2239_v30, %v2246_v35  ;;  %v2900_v45 = vrot.slane %v656_v36, 10  ;;  %v1218_v46 = vmax.f32 %v653_v27, %v2897_v37  ;;  %v2789_v47 = vrot.slane %v93_v33, 9  ;;  %v101_v27 = vld [vmem:[%s3542_s0 + $0x2e8] sm:$0xff]  ;;  %v103_v37 = vld [vmem:[%s3542_s0 + $0x2f8] sm:$0xff] }
  0x83   :  { %v2255_v48 = vrot.slane %v2247_v39, %v2967_v23  ;;  %v1219_v49 = vmax.f32 %v654_v31, %v2898_v40  ;;  %v1220_v50 = vmax.f32 %v655_v32, %v2899_v41  ;;  %v2790_v51 = vrot.slane %v94_v38, 9 }
  0x84   :  { %v2262_v52 = vrot.slane %v2248_v44, %v2967_v23  ;;  %v1221_v53 = vmax.f32 %v656_v36, %v2900_v45  ;;  %v2270_v54 = vrot.slane %v1218_v46, %v2967_v23  ;;  %v2791_v55 = vrot.slane %v95_v42, 9  ;;  %v102_v36 = vld [vmem:[%s3542_s0 + $0x2f0] sm:$0xff] }
  0x85   :  { %v2277_v57 = vrot.slane %v1219_v49, %v2967_v23  ;;  %v2284_v58 = vrot.slane %v1220_v50, %v2967_v23  ;;  %v657_v59 = vmax.f32 %v92_v28, %v2788_v43  ;;  %v658_v60 = vmax.f32 %v93_v33, %v2789_v47 }
  0x86   :  { %v2263_v62 = vcombine.low %v2255_v48, %v2262_v52  ;;  %v2291_v63 = vrot.slane %v1221_v53, %v2967_v23  ;;  %v659_v1 = vmax.f32 %v94_v38, %v2790_v51  ;;  %v660_v2 = vmax.f32 %v95_v42, %v2791_v55  ;;  %v105_v55 = vld [vmem:[%s3542_s0 + $0x308] sm:$0xff] }
  0x87   :  { %v2292_v4 = vcombine.low %v2270_v54, %v2277_v57  ;;  %v2901_v5 = vrot.slane %v657_v59, 10  ;;  %v2902_v6 = vrot.slane %v658_v60, 10  ;;  %v2792_v8 = vrot.slane %v96_v56, 9  ;;  %v104_v54 = vld [vmem:[%s3542_s0 + $0x300] sm:$0xff] }
  0x88   :  { %2686 = vst [vmem:[%s3543_s1 + $0x98] sm:$0xff] %v2263_v62  ;;  %v2293_v9 = vcombine.low %v2284_v58, %v2291_v63  ;;  %v2903_v10 = vrot.slane %v659_v1, 10  ;;  %v2904_v11 = vrot.slane %v660_v2, 10  ;;  %v2793_v12 = vrot.slane %v97_v61, 9 }
  0x89   :  { %v2300_v13 = vrot.slane %v2292_v4, %v2967_v23  ;;  %v1222_v14 = vmax.f32 %v657_v59, %v2901_v5  ;;  %v1223_v15 = vmax.f32 %v658_v60, %v2902_v6  ;;  %v2794_v16 = vrot.slane %v98_v3, 9 }
  0x8a   :  { %v2307_v17 = vrot.slane %v2293_v9, %v2967_v23  ;;  %v1224_v18 = vmax.f32 %v659_v1, %v2903_v10  ;;  %v1225_v19 = vmax.f32 %v660_v2, %v2904_v11  ;;  %v2795_v20 = vrot.slane %v99_v7, 9  ;;  %v106_v1 = vld [vmem:[%s3542_s0 + $0x310] sm:$0xff]  ;;  %v107_v2 = vld [vmem:[%s3542_s0 + $0x318] sm:$0xff] }
  0x8b   :  { %v2315_v21 = vrot.slane %v1222_v14, %v2967_v23  ;;  %v2322_v22 = vrot.slane %v1223_v15, %v2967_v23  ;;  %v661_v24 = vmax.f32 %v96_v56, %v2792_v8  ;;  %v662_v25 = vmax.f32 %v97_v61, %v2793_v12 }
  0x8c   :  { %v2308_v28 = vcombine.low %v2300_v13, %v2307_v17  ;;  %v2329_v29 = vrot.slane %v1224_v18, %v2967_v23  ;;  %v2336_v30 = vrot.slane %v1225_v19, %v2967_v23  ;;  %v663_v31 = vmax.f32 %v98_v3, %v2794_v16  ;;  %v108_v19 = vld [vmem:[%s3542_s0 + $0x320] sm:$0xff] }
  0x8d   :  { %v2337_v32 = vcombine.low %v2315_v21, %v2322_v22  ;;  %v664_v33 = vmax.f32 %v99_v7, %v2795_v20  ;;  %v2905_v34 = vrot.slane %v661_v24, 10  ;;  %v2906_v35 = vrot.slane %v662_v25, 10 }
  0x8e   :  { %2687 = vst [vmem:[%s3543_s1 + $0xa0] sm:$0xff] %v2308_v28  ;;  %v2338_v38 = vcombine.low %v2329_v29, %v2336_v30  ;;  %v2907_v39 = vrot.slane %v663_v31, 10  ;;  %v2796_v40 = vrot.slane %v100_v26, 9  ;;  %v2797_v41 = vrot.slane %v101_v27, 9  ;;  %v110_v30 = vld [vmem:[%s3542_s0 + $0x330] sm:$0xff] }
  0x8f   :  { %v2345_v42 = vrot.slane %v2337_v32, %v2967_v23  ;;  %v2908_v43 = vrot.slane %v664_v33, 10  ;;  %v1226_v44 = vmax.f32 %v661_v24, %v2905_v34  ;;  %v1227_v45 = vmax.f32 %v662_v25, %v2906_v35  ;;  %v109_v25 = vld [vmem:[%s3542_s0 + $0x328] sm:$0xff]  ;;  %v111_v34 = vld [vmem:[%s3542_s0 + $0x338] sm:$0xff] }
  0x90   :  { %v2352_v46 = vrot.slane %v2338_v38, %v2967_v23  ;;  %v1228_v47 = vmax.f32 %v663_v31, %v2907_v39  ;;  %v2798_v48 = vrot.slane %v102_v36, 9  ;;  %v2799_v49 = vrot.slane %v103_v37, 9 }
  0x91   :  { %v1229_v50 = vmax.f32 %v664_v33, %v2908_v43  ;;  %v2360_v51 = vrot.slane %v1226_v44, %v2967_v23  ;;  %v2367_v52 = vrot.slane %v1227_v45, %v2967_v23  ;;  %v665_v53 = vmax.f32 %v100_v26, %v2796_v40 }
  0x92   :  { %v2353_v56 = vcombine.low %v2345_v42, %v2352_v46  ;;  %v2374_v57 = vrot.slane %v1228_v47, %v2967_v23  ;;  %v666_v58 = vmax.f32 %v101_v27, %v2797_v41  ;;  %v667_v59 = vmax.f32 %v102_v36, %v2798_v48  ;;  %v112_v48 = vld [vmem:[%s3542_s0 + $0x340] sm:$0xff] }
  0x93   :  { %v2381_v60 = vrot.slane %v1229_v50, %v2967_v23  ;;  %v2382_v61 = vcombine.low %v2360_v51, %v2367_v52  ;;  %v668_v62 = vmax.f32 %v103_v37, %v2799_v49  ;;  %v2909_v63 = vrot.slane %v665_v53, 10 }
  0x94   :  { %2688 = vst [vmem:[%s3543_s1 + $0xa8] sm:$0xff] %v2353_v56  ;;  %v2910_v3 = vrot.slane %v666_v58, 10  ;;  %v2911_v4 = vrot.slane %v667_v59, 10  ;;  %v2800_v5 = vrot.slane %v104_v54, 9  ;;  %v2801_v6 = vrot.slane %v105_v55, 9 }
  0x95   :  { %v2383_v7 = vcombine.low %v2374_v57, %v2381_v60  ;;  %v2390_v8 = vrot.slane %v2382_v61, %v2967_v23  ;;  %v2912_v9 = vrot.slane %v668_v62, 10  ;;  %v1230_v10 = vmax.f32 %v665_v53, %v2909_v63  ;;  %v113_v53 = vld [vmem:[%s3542_s0 + $0x348] sm:$0xff] }
  0x96   :  { %v1231_v11 = vmax.f32 %v666_v58, %v2910_v3  ;;  %v1232_v12 = vmax.f32 %v667_v59, %v2911_v4  ;;  %v2802_v13 = vrot.slane %v106_v1, 9  ;;  %v2803_v14 = vrot.slane %v107_v2, 9  ;;  %v114_v58 = vld [vmem:[%s3542_s0 + $0x350] sm:$0xff] }
  0x97   :  { %v2397_v15 = vrot.slane %v2383_v7, %v2967_v23  ;;  %v1233_v16 = vmax.f32 %v668_v62, %v2912_v9  ;;  %v2405_v17 = vrot.slane %v1230_v10, %v2967_v23  ;;  %v669_v18 = vmax.f32 %v104_v54, %v2800_v5  ;;  %v115_v62 = vld [vmem:[%s3542_s0 + $0x358] sm:$0xff] }
  0x98   :  { %v2412_v20 = vrot.slane %v1231_v11, %v2967_v23  ;;  %v2419_v21 = vrot.slane %v1232_v12, %v2967_v23  ;;  %v670_v22 = vmax.f32 %v105_v55, %v2801_v6  ;;  %v671_v24 = vmax.f32 %v106_v1, %v2802_v13 }
  0x99   :  { %v2398_v26 = vcombine.low %v2390_v8, %v2397_v15  ;;  %v2426_v27 = vrot.slane %v1233_v16, %v2967_v23  ;;  %v672_v28 = vmax.f32 %v107_v2, %v2803_v14  ;;  %v2913_v29 = vrot.slane %v669_v18, 10 }
  0x9a   :  { %v2427_v31 = vcombine.low %v2405_v17, %v2412_v20  ;;  %v2914_v32 = vrot.slane %v670_v22, 10  ;;  %v2915_v33 = vrot.slane %v671_v24, 10  ;;  %v2804_v35 = vrot.slane %v108_v19, 9  ;;  %v116_v17 = vld [vmem:[%s3542_s0 + $0x360] sm:$0xff] }
  0x9b   :  { %2689 = vst [vmem:[%s3543_s1 + $0xb0] sm:$0xff] %v2398_v26  ;;  %v2428_v36 = vcombine.low %v2419_v21, %v2426_v27  ;;  %v2916_v37 = vrot.slane %v672_v28, 10  ;;  %v1234_v38 = vmax.f32 %v669_v18, %v2913_v29  ;;  %v2805_v39 = vrot.slane %v109_v25, 9  ;;  %v117_v18 = vld [vmem:[%s3542_s0 + $0x368] sm:$0xff]  ;;  %v119_v29 = vld [vmem:[%s3542_s0 + $0x378] sm:$0xff] }
  0x9c   :  { %v2435_v40 = vrot.slane %v2427_v31, %v2967_v23  ;;  %v1235_v41 = vmax.f32 %v670_v22, %v2914_v32  ;;  %v1236_v42 = vmax.f32 %v671_v24, %v2915_v33  ;;  %v2806_v43 = vrot.slane %v110_v30, 9 }
  0x9d   :  { %v2442_v44 = vrot.slane %v2428_v36, %v2967_v23  ;;  %v1237_v45 = vmax.f32 %v672_v28, %v2916_v37  ;;  %v2450_v46 = vrot.slane %v1234_v38, %v2967_v23  ;;  %v2807_v47 = vrot.slane %v111_v34, 9  ;;  %v118_v28 = vld [vmem:[%s3542_s0 + $0x370] sm:$0xff] }
  0x9e   :  { %v2457_v49 = vrot.slane %v1235_v41, %v2967_v23  ;;  %v2464_v50 = vrot.slane %v1236_v42, %v2967_v23  ;;  %v673_v51 = vmax.f32 %v108_v19, %v2804_v35  ;;  %v674_v52 = vmax.f32 %v109_v25, %v2805_v39 }
  0x9f   :  { %v2443_v54 = vcombine.low %v2435_v40, %v2442_v44  ;;  %v2471_v55 = vrot.slane %v1237_v45, %v2967_v23  ;;  %v675_v56 = vmax.f32 %v110_v30, %v2806_v43  ;;  %v676_v57 = vmax.f32 %v111_v34, %v2807_v47 }
  0xa0   :  { %v2472_v59 = vcombine.low %v2450_v46, %v2457_v49  ;;  %v2917_v60 = vrot.slane %v673_v51, 10  ;;  %v2918_v61 = vrot.slane %v674_v52, 10  ;;  %v2808_v63 = vrot.slane %v112_v48, 9  ;;  %v120_v46 = vld [vmem:[%s3542_s0 + $0x380] sm:$0xf] }
  0xa1   :  { %2690 = vst [vmem:[%s3543_s1 + $0xb8] sm:$0xff] %v2443_v54  ;;  %v2473_v1 = vcombine.low %v2464_v50, %v2471_v55  ;;  %v2919_v2 = vrot.slane %v675_v56, 10  ;;  %v2920_v3 = vrot.slane %v676_v57, 10  ;;  %v2809_v4 = vrot.slane %v113_v53, 9 }
  0xa2   :  { %v2480_v5 = vrot.slane %v2472_v59, %v2967_v23  ;;  %v1238_v6 = vmax.f32 %v673_v51, %v2917_v60  ;;  %v1239_v7 = vmax.f32 %v674_v52, %v2918_v61  ;;  %v2810_v8 = vrot.slane %v114_v58, 9 }
  0xa3   :  { %v2487_v9 = vrot.slane %v2473_v1, %v2967_v23  ;;  %v1240_v10 = vmax.f32 %v675_v56, %v2919_v2  ;;  %v1241_v11 = vmax.f32 %v676_v57, %v2920_v3  ;;  %v2811_v12 = vrot.slane %v115_v62, 9 }
  0xa4   :  { %v2495_v13 = vrot.slane %v1238_v6, %v2967_v23  ;;  %v2502_v14 = vrot.slane %v1239_v7, %v2967_v23  ;;  %v677_v15 = vmax.f32 %v112_v48, %v2808_v63  ;;  %v678_v16 = vmax.f32 %v113_v53, %v2809_v4 }
  0xa5   :  { %v2488_v19 = vcombine.low %v2480_v5, %v2487_v9  ;;  %v2509_v20 = vrot.slane %v1240_v10, %v2967_v23  ;;  %v2516_v21 = vrot.slane %v1241_v11, %v2967_v23  ;;  %v679_v22 = vmax.f32 %v114_v58, %v2810_v8 }
  0xa6   :  { %v2517_v24 = vcombine.low %v2495_v13, %v2502_v14  ;;  %v680_v25 = vmax.f32 %v115_v62, %v2811_v12  ;;  %v2921_v26 = vrot.slane %v677_v15, 10  ;;  %v2922_v27 = vrot.slane %v678_v16, 10 }
  0xa7   :  { %2691 = vst [vmem:[%s3543_s1 + $0xc0] sm:$0xff] %v2488_v19  ;;  %v2518_v30 = vcombine.low %v2509_v20, %v2516_v21  ;;  %v2923_v31 = vrot.slane %v679_v22, 10  ;;  %v2812_v32 = vrot.slane %v116_v17, 9  ;;  %v2813_v33 = vrot.slane %v117_v18, 9 }
  0xa8   :  { %v2525_v34 = vrot.slane %v2517_v24, %v2967_v23  ;;  %v2924_v35 = vrot.slane %v680_v25, 10  ;;  %v1242_v36 = vmax.f32 %v677_v15, %v2921_v26  ;;  %v1243_v37 = vmax.f32 %v678_v16, %v2922_v27 }
  0xa9   :  { %v2532_v38 = vrot.slane %v2518_v30, %v2967_v23  ;;  %v1244_v39 = vmax.f32 %v679_v22, %v2923_v31  ;;  %v2814_v40 = vrot.slane %v118_v28, 9  ;;  %v2815_v41 = vrot.slane %v119_v29, 9 }
  0xaa   :  { %v1245_v42 = vmax.f32 %v680_v25, %v2924_v35  ;;  %v2540_v43 = vrot.slane %v1242_v36, %v2967_v23  ;;  %v2547_v44 = vrot.slane %v1243_v37, %v2967_v23  ;;  %v681_v45 = vmax.f32 %v116_v17, %v2812_v32 }
  0xab   :  { %v2533_v47 = vcombine.low %v2525_v34, %v2532_v38  ;;  %v2554_v48 = vrot.slane %v1244_v39, %v2967_v23  ;;  %v682_v49 = vmax.f32 %v117_v18, %v2813_v33  ;;  %v683_v50 = vmax.f32 %v118_v28, %v2814_v40 }
  0xac   :  { %v2561_v51 = vrot.slane %v1245_v42, %v2967_v23  ;;  %v2562_v52 = vcombine.low %v2540_v43, %v2547_v44  ;;  %v684_v53 = vmax.f32 %v119_v29, %v2815_v41  ;;  %v2925_v54 = vrot.slane %v681_v45, 10 }
  0xad   :  { %2692 = vst [vmem:[%s3543_s1 + $0xc8] sm:$0xff] %v2533_v47  ;;  %v2926_v55 = vrot.slane %v682_v49, 10  ;;  %v2927_v56 = vrot.slane %v683_v50, 10  ;;  %v2816_v57 = vrot.slane %v120_v46, 9 }
  0xae   :  { %v2563_v58 = vcombine.low %v2554_v48, %v2561_v51  ;;  %v2570_v59 = vrot.slane %v2562_v52, %v2967_v23  ;;  %v2928_v60 = vrot.slane %v684_v53, 10  ;;  %v1246_v61 = vmax.f32 %v681_v45, %v2925_v54 }
  0xaf   :  { %v1247_v62 = vmax.f32 %v682_v49, %v2926_v55  ;;  %v1248_v63 = vmax.f32 %v683_v50, %v2927_v56  ;;  %v685_v1 = vmax.f32 %v120_v46, %v2816_v57 }
  0xb0   :  { %v2577_v2 = vrot.slane %v2563_v58, %v2967_v23  ;;  %v1249_v3 = vmax.f32 %v684_v53, %v2928_v60  ;;  %v2585_v4 = vrot.slane %v1246_v61, %v2967_v23 }
  0xb1   :  { %v2592_v5 = vrot.slane %v1247_v62, %v2967_v23  ;;  %v2599_v6 = vrot.slane %v1248_v63, %v2967_v23  ;;  %v2929_v7 = vrot.slane %v685_v1, 10 }
  0xb2   :  { %v2578_v8 = vcombine.low %v2570_v59, %v2577_v2  ;;  %v2606_v9 = vrot.slane %v1249_v3, %v2967_v23 }
  0xb3   :  { %v2607_v10 = vcombine.low %v2585_v4, %v2592_v5  ;;  %v1250_v11 = vmax.f32 %v685_v1, %v2929_v7 }
  0xb4   :  { %2693 = vst [vmem:[%s3543_s1 + $0xd0] sm:$0xff] %v2578_v8  ;;  %v2608_v12 = vcombine.low %v2599_v6, %v2606_v9 }
  0xb5   :  { %v2615_v13 = vrot.slane %v2607_v10, %v2967_v23  ;;  %v2630_v14 = vrot.slane %v1250_v11, %v2967_v23 }
  0xb6   :  { %v2622_v15 = vrot.slane %v2608_v12, %v2967_v23 }
  0xb7   :  { %v2637_v16 = vrot.slane %v2630_v14, %v2967_v23 }
  0xb8   :  { %v2623_v17 = vcombine.low %v2615_v13, %v2622_v15 }
  0xb9   :  { %2699 = vst.msk [vmem:[%s3543_s1 + $0xe0] sm:$0x1] %vm2697_vm0, %v2637_v16 }
  0xba   :  { %2694 = vst [vmem:[%s3543_s1 + $0xd8] sm:$0xff] %v2623_v17 }

// kernel: eonss_forward.9
= control target key start
LH: loop header
LB: loop body
LE: loop exit
PB: predicated region body
PF: predicated region fallthrough
CT: control target
= control target key end

     0   :  { %v1125_v3 = vmov 0.0   ;;  %v1126_v8 = vmov 0   ;;  %vm220_vm0 = vcmask 1043456   ;;  %vm216_vm1 = vcmask 818176   ;;  %s1827_s1 = inlined_call_operand.vmem [shape: f32[100,1800], index: 1, kind: input, shape index: {}]   ;;  %s1828_s0 = inlined_call_operand.vmem [shape: f32[8,100], index: 0, kind: input, shape index: {}]   ;;  %s1829_s2 = inlined_call_operand.vmem [shape: f32[8,1], index: 2, kind: input, shape index: {}]   ;;  %s1830_s3 = inlined_call_operand.vmem [shape: f32[8,1800], index: 3, kind: output, shape index: {}]  }
   0x1   :  { %v16_v0 = vld [vmem:[%s1827_s1 + $0x8] sm:$0xff]  ;;  %v31_v1 = vld [vmem:[%s1827_s1 + $0x80] sm:$0xff]  ;;  %v18_v2 = vld [vmem:[%s1827_s1 + $0x18] sm:$0xff]  ;;  %330 = vmatprep.mubr.f32.mxu0 %v1125_v3  ;;  %401 = vmatprep.mubr.f32.mxu1 %v1125_v3  ;;  %vm1128_vm2 = vmmov 0   ;;  %vm862_vm3 = vcmask 64512  }
   0x2   :  { %v934_v4 = vpack.c.bf16 %v31_v1, %v16_v0  ;;  %v33_v5 = vld [vmem:[%s1827_s1 + $0x90] sm:$0xff]  ;;  %v15_v6 = vld [vmem:[%s1827_s1] sm:$0xff]  ;;  %v30_v7 = vld [vmem:[%s1827_s1 + $0x78] sm:$0xff]  ;;  %1124 = vset.pattern.permute.xlu0 %v1126_v8 }
   0x3   :  { %v958_v9 = vpack.c.bf16 %v33_v5, %v18_v2  ;;  %v936_v10 = vpack.c.bf16 %v30_v7, %v15_v6  ;;  %v17_v11 = vld [vmem:[%s1827_s1 + $0x10] sm:$0xff]  ;;  %v32_v12 = vld [vmem:[%s1827_s1 + $0x88] sm:$0xff]  ;;  %v46_v13 = vld [vmem:[%s1827_s1 + $0xf8] sm:$0xff] }
   0x4   :  { %935 = vmatprep.subr.bf16.mxu0 %v934_v4  ;;  %v960_v14 = vpack.c.bf16 %v32_v12, %v17_v11  ;;  %v61_v15 = vld [vmem:[%s1827_s1 + $0x170] sm:$0xff]  ;;  %v48_v16 = vld [vmem:[%s1827_s1 + $0x108] sm:$0xff]  ;;  %v63_v17 = vld [vmem:[%s1827_s1 + $0x180] sm:$0xff] }
   0x5   :  { %959 = vmatprep.subr.bf16.mxu1 %v958_v9  ;;  %937 = vmatpush1.bf16.msra.mxu0 %v936_v10  ;;  %v938_v18 = vpack.c.bf16 %v61_v15, %v46_v13  ;;  %v962_v19 = vpack.c.bf16 %v63_v17, %v48_v16  ;;  %v45_v20 = vld [vmem:[%s1827_s1 + $0xf0] sm:$0xff]  ;;  %v60_v21 = vld [vmem:[%s1827_s1 + $0x168] sm:$0xff]  ;;  %v47_v22 = vld [vmem:[%s1827_s1 + $0x100] sm:$0xff] }
   0x6   :  { %961 = vmatpush1.bf16.msra.mxu1 %v960_v14  ;;  %v940_v23 = vpack.c.bf16 %v60_v21, %v45_v20  ;;  %v62_v24 = vld [vmem:[%s1827_s1 + $0x178] sm:$0xff]  ;;  %v76_v25 = vld [vmem:[%s1827_s1 + $0x1e8] sm:$0xff]  ;;  %v91_v26 = vld [vmem:[%s1827_s1 + $0x260] sm:$0xff] }
   0x7   :  { %939 = vmatprep.subr.bf16.mxu0 %v938_v18  ;;  %963 = vmatprep.subr.bf16.mxu1 %v962_v19  ;;  %v964_v27 = vpack.c.bf16 %v62_v24, %v47_v22  ;;  %v942_v28 = vpack.c.bf16 %v91_v26, %v76_v25  ;;  %v78_v29 = vld [vmem:[%s1827_s1 + $0x1f8] sm:$0xff]  ;;  %v93_v30 = vld [vmem:[%s1827_s1 + $0x270] sm:$0xff]  ;;  %v75_v31 = vld [vmem:[%s1827_s1 + $0x1e0] sm:$0xff] }
   0x8   :  { %v966_v32 = vpack.c.bf16 %v93_v30, %v78_v29  ;;  %v90_v33 = vld [vmem:[%s1827_s1 + $0x258] sm:$0xff]  ;;  %v77_v34 = vld [vmem:[%s1827_s1 + $0x1f0] sm:$0xff]  ;;  %v92_v35 = vld [vmem:[%s1827_s1 + $0x268] sm:$0xff] }
   0x9   :  { %941 = vmatpush1.bf16.msra.mxu0 %v940_v23  ;;  %v944_v36 = vpack.c.bf16 %v90_v33, %v75_v31  ;;  %v106_v37 = vld [vmem:[%s1827_s1 + $0x2d8] sm:$0xff]  ;;  %v121_v38 = vld [vmem:[%s1827_s1 + $0x350] sm:$0xff]  ;;  %v108_v39 = vld [vmem:[%s1827_s1 + $0x2e8] sm:$0xff]  ;;  %v968_v40 = vpack.c.bf16 %v92_v35, %v77_v34 }
   0xa   :  { %965 = vmatpush1.bf16.msra.mxu1 %v964_v27  ;;  %943 = vmatprep.subr.bf16.mxu0 %v942_v28  ;;  %v946_v41 = vpack.c.bf16 %v121_v38, %v106_v37  ;;  %v123_v42 = vld [vmem:[%s1827_s1 + $0x360] sm:$0xff]  ;;  %v105_v43 = vld [vmem:[%s1827_s1 + $0x2d0] sm:$0xff]  ;;  %v120_v44 = vld [vmem:[%s1827_s1 + $0x348] sm:$0xff] }
   0xb   :  { %967 = vmatprep.subr.bf16.mxu1 %v966_v32  ;;  %v970_v45 = vpack.c.bf16 %v123_v42, %v108_v39  ;;  %v107_v46 = vld [vmem:[%s1827_s1 + $0x2e0] sm:$0xff]  ;;  %v122_v47 = vld [vmem:[%s1827_s1 + $0x358] sm:$0xff]  ;;  %v136_v48 = vld [vmem:[%s1827_s1 + $0x3c8] sm:$0xff]  ;;  %v948_v52 = vpack.c.bf16 %v120_v44, %v105_v43 }
   0xc   :  { %v151_v49 = vld [vmem:[%s1827_s1 + $0x440] sm:$0xff]  ;;  %v138_v50 = vld [vmem:[%s1827_s1 + $0x3d8] sm:$0xff]  ;;  %v153_v51 = vld [vmem:[%s1827_s1 + $0x450] sm:$0xff]  ;;  %v972_v53 = vpack.c.bf16 %v122_v47, %v107_v46 }
   0xd   :  { %945 = vmatpush1.bf16.msra.mxu0 %v944_v36  ;;  %v950_v54 = vpack.c.bf16 %v151_v49, %v136_v48  ;;  %v135_v55 = vld [vmem:[%s1827_s1 + $0x3c0] sm:$0xff]  ;;  %v150_v56 = vld [vmem:[%s1827_s1 + $0x438] sm:$0xff]  ;;  %v137_v57 = vld [vmem:[%s1827_s1 + $0x3d0] sm:$0xff]  ;;  %v974_v58 = vpack.c.bf16 %v153_v51, %v138_v50 }
   0xe   :  { %969 = vmatpush1.bf16.msra.mxu1 %v968_v40  ;;  %947 = vmatprep.subr.bf16.mxu0 %v946_v41  ;;  %v152_v59 = vld [vmem:[%s1827_s1 + $0x448] sm:$0xff]  ;;  %v166_v60 = vld [vmem:[%s1827_s1 + $0x4b8] sm:$0xff]  ;;  %v181_v61 = vld [vmem:[%s1827_s1 + $0x530] sm:$0xff]  ;;  %v952_v0 = vpack.c.bf16 %v150_v56, %v135_v55 }
   0xf   :  { %971 = vmatprep.subr.bf16.mxu1 %v970_v45  ;;  %v168_v62 = vld [vmem:[%s1827_s1 + $0x4c8] sm:$0xff]  ;;  %v183_v63 = vld [vmem:[%s1827_s1 + $0x540] sm:$0xff]  ;;  %v976_v1 = vpack.c.bf16 %v152_v59, %v137_v57  ;;  %v954_v2 = vpack.c.bf16 %v181_v61, %v166_v60  ;;  %v165_v4 = vld [vmem:[%s1827_s1 + $0x4b0] sm:$0xff] }
  0x10   :  { %v180_v5 = vld [vmem:[%s1827_s1 + $0x528] sm:$0xff]  ;;  %v978_v6 = vpack.c.bf16 %v183_v63, %v168_v62  ;;  %v167_v7 = vld [vmem:[%s1827_s1 + $0x4c0] sm:$0xff]  ;;  %v182_v8 = vld [vmem:[%s1827_s1 + $0x538] sm:$0xff] }
  0x11   :  { %949 = vmatpush1.bf16.msra.mxu0 %v948_v52  ;;  %v956_v9 = vpack.c.bf16 %v180_v5, %v165_v4  ;;  %v980_v10 = vpack.c.bf16 %v182_v8, %v167_v7  ;;  %v196_v11 = vld [vmem:[%s1827_s1 + $0x5a8] sm:$0xf]  ;;  %v198_v12 = vld [vmem:[%s1827_s1 + $0x5b8] sm:$0xf]  ;;  %v195_v14 = vld [vmem:[%s1827_s1 + $0x5a0] sm:$0xf] }
  0x12   :  { %973 = vmatpush1.bf16.msra.mxu1 %v972_v53  ;;  %951 = vmatprep.subr.bf16.mxu0 %v950_v54  ;;  %v20_v13 = vld [vmem:[%s1827_s1 + $0x28] sm:$0xff]  ;;  %v35_v15 = vld [vmem:[%s1827_s1 + $0xa0] sm:$0xff]  ;;  %v22_v16 = vld [vmem:[%s1827_s1 + $0x38] sm:$0xff] }
  0x13   :  { %975 = vmatprep.subr.bf16.mxu1 %v974_v58  ;;  %v37_v17 = vld [vmem:[%s1827_s1 + $0xb0] sm:$0xff]  ;;  %v19_v19 = vld [vmem:[%s1827_s1 + $0x20] sm:$0xff]  ;;  %v34_v20 = vld [vmem:[%s1827_s1 + $0x98] sm:$0xff]  ;;  %v982_v26 = vpack.c.bf16 %v35_v15, %v20_v13 }
  0x14   :  { %v197_v18 = vld [vmem:[%s1827_s1 + $0x5b0] sm:$0xf]  ;;  %v36_v22 = vld [vmem:[%s1827_s1 + $0xa8] sm:$0xff]  ;;  %v50_v23 = vld [vmem:[%s1827_s1 + $0x118] sm:$0xff]  ;;  %v1006_v27 = vpack.c.bf16 %v37_v17, %v22_v16  ;;  %v984_v30 = vpack.c.bf16 %v34_v20, %v19_v19 }
  0x15   :  { %953 = vmatpush1.bf16.msra.mxu0 %v952_v0  ;;  %v21_v21 = vld [vmem:[%s1827_s1 + $0x30] sm:$0xff]  ;;  %v1342_v25 = vld [vmem:[%s1828_s0] sm:$0xff]  ;;  %v52_v28 = vld [vmem:[%s1827_s1 + $0x128] sm:$0xff] }
  0x16   :  { %977 = vmatpush1.bf16.msra.mxu1 %v976_v1  ;;  %955 = vmatprep.subr.bf16.mxu0 %v954_v2  ;;  %v65_v24 = vld [vmem:[%s1827_s1 + $0x190] sm:$0xff]  ;;  %v67_v29 = vld [vmem:[%s1827_s1 + $0x1a0] sm:$0xff]  ;;  %v1008_v31 = vpack.c.bf16 %v36_v22, %v21_v21  ;;  %v64_v34 = vld [vmem:[%s1827_s1 + $0x188] sm:$0xff] }
  0x17   :  { %979 = vmatprep.subr.bf16.mxu1 %v978_v6  ;;  %v986_v32 = vpack.c.bf16 %v65_v24, %v50_v23  ;;  %v49_v33 = vld [vmem:[%s1827_s1 + $0x110] sm:$0xff]  ;;  %v51_v35 = vld [vmem:[%s1827_s1 + $0x120] sm:$0xff]  ;;  %v1010_v36 = vpack.c.bf16 %v67_v29, %v52_v28  ;;  %v66_v37 = vld [vmem:[%s1827_s1 + $0x198] sm:$0xff] }
  0x18   :  { %v80_v38 = vld [vmem:[%s1827_s1 + $0x208] sm:$0xff]  ;;  %v95_v39 = vld [vmem:[%s1827_s1 + $0x280] sm:$0xff]  ;;  %v82_v40 = vld [vmem:[%s1827_s1 + $0x218] sm:$0xff]  ;;  %v988_v42 = vpack.c.bf16 %v64_v34, %v49_v33  ;;  %v1012_v43 = vpack.c.bf16 %v66_v37, %v51_v35 }
  0x19   :  { %957 = vmatpush1.bf16.msra.mxu0 %v956_v9  ;;  %v97_v41 = vld [vmem:[%s1827_s1 + $0x290] sm:$0xff]  ;;  %v990_v44 = vpack.c.bf16 %v95_v39, %v80_v38  ;;  %v79_v45 = vld [vmem:[%s1827_s1 + $0x200] sm:$0xff]  ;;  %v94_v46 = vld [vmem:[%s1827_s1 + $0x278] sm:$0xff] }
  0x1a   :  { %981 = vmatpush1.bf16.msra.mxu1 %v980_v10  ;;  %868 = vmatprep.subr.msk.mxu0 %vm220_vm0, %v196_v11  ;;  %v81_v47 = vld [vmem:[%s1827_s1 + $0x210] sm:$0xff]  ;;  %v1014_v48 = vpack.c.bf16 %v97_v41, %v82_v40  ;;  %v96_v49 = vld [vmem:[%s1827_s1 + $0x288] sm:$0xff]  ;;  %v110_v50 = vld [vmem:[%s1827_s1 + $0x2f8] sm:$0xff]  ;;  %v992_v54 = vpack.c.bf16 %v94_v46, %v79_v45 }
  0x1b   :  { %871 = vmatprep.subr.msk.mxu1 %vm220_vm0, %v198_v12  ;;  %v125_v51 = vld [vmem:[%s1827_s1 + $0x370] sm:$0xff]  ;;  %v112_v52 = vld [vmem:[%s1827_s1 + $0x308] sm:$0xff]  ;;  %v127_v53 = vld [vmem:[%s1827_s1 + $0x380] sm:$0xff]  ;;  %v1016_v55 = vpack.c.bf16 %v96_v49, %v81_v47 }
  0x1c   :  { %v994_v56 = vpack.c.bf16 %v125_v51, %v110_v50  ;;  %v109_v57 = vld [vmem:[%s1827_s1 + $0x2f0] sm:$0xff]  ;;  %v124_v58 = vld [vmem:[%s1827_s1 + $0x368] sm:$0xff]  ;;  %v111_v59 = vld [vmem:[%s1827_s1 + $0x300] sm:$0xff]  ;;  %v1018_v60 = vpack.c.bf16 %v127_v53, %v112_v52 }
  0x1d   :  { %869 = vmatpush1.msk.msra.mxu0 %vm220_vm0, %v195_v14  ;;  %v126_v61 = vld [vmem:[%s1827_s1 + $0x378] sm:$0xff]  ;;  %v140_v62 = vld [vmem:[%s1827_s1 + $0x3e8] sm:$0xff]  ;;  %v155_v63 = vld [vmem:[%s1827_s1 + $0x460] sm:$0xff]  ;;  %v996_v2 = vpack.c.bf16 %v124_v58, %v109_v57 }
  0x1e   :  { %872 = vmatpush1.msk.msra.mxu1 %vm220_vm0, %v197_v18  ;;  %870 = vmatmul.mubr.msk.f32.vlgmr.msra.gmra.mrb[0].mxu0 %vm216_vm1, %v1342_v25  ;;  %v142_v0 = vld [vmem:[%s1827_s1 + $0x3f8] sm:$0xff]  ;;  %v157_v1 = vld [vmem:[%s1827_s1 + $0x470] sm:$0xff]  ;;  %v1020_v4 = vpack.c.bf16 %v126_v61, %v111_v59  ;;  %v998_v5 = vpack.c.bf16 %v155_v63, %v140_v62  ;;  %v139_v6 = vld [vmem:[%s1827_s1 + $0x3e0] sm:$0xff] }
  0x1f   :  { %983 = vmatprep.subr.bf16.mxu0 %v982_v26  ;;  %1007 = vmatprep.subr.bf16.mxu1 %v1006_v27  ;;  %v154_v7 = vld [vmem:[%s1827_s1 + $0x458] sm:$0xff]  ;;  %v141_v8 = vld [vmem:[%s1827_s1 + $0x3f0] sm:$0xff]  ;;  %v1022_v9 = vpack.c.bf16 %v157_v1, %v142_v0  ;;  %v156_v10 = vld [vmem:[%s1827_s1 + $0x468] sm:$0xff] }
  0x20   :  { %873 = vmatmul.mubr.msk.f32.vlgmr.msra.gmra.mrb[0].mxu1 %vm216_vm1, %v1342_v25  ;;  %985 = vmatpush1.bf16.msra.mxu0 %v984_v30  ;;  %v170_v11 = vld [vmem:[%s1827_s1 + $0x4d8] sm:$0xff]  ;;  %v185_v12 = vld [vmem:[%s1827_s1 + $0x550] sm:$0xff]  ;;  %v172_v13 = vld [vmem:[%s1827_s1 + $0x4e8] sm:$0xff]  ;;  %v1000_v15 = vpack.c.bf16 %v154_v7, %v139_v6  ;;  %v1024_v16 = vpack.c.bf16 %v156_v10, %v141_v8 }
  0x21   :  { %1009 = vmatpush1.bf16.msra.mxu1 %v1008_v31  ;;  %987 = vmatprep.subr.bf16.mxu0 %v986_v32  ;;  %v187_v14 = vld [vmem:[%s1827_s1 + $0x560] sm:$0xff]  ;;  %v1002_v17 = vpack.c.bf16 %v185_v12, %v170_v11  ;;  %v169_v18 = vld [vmem:[%s1827_s1 + $0x4d0] sm:$0xff]  ;;  %v184_v19 = vld [vmem:[%s1827_s1 + $0x548] sm:$0xff] }
  0x22   :  { %1011 = vmatprep.subr.bf16.mxu1 %v1010_v36  ;;  %472 = vmatprep.mubr.f32.mxu0 %v1125_v3  ;;  %v1026_v20 = vpack.c.bf16 %v187_v14, %v172_v13  ;;  %v171_v21 = vld [vmem:[%s1827_s1 + $0x4e0] sm:$0xff]  ;;  %v186_v22 = vld [vmem:[%s1827_s1 + $0x558] sm:$0xff]  ;;  %v1004_v23 = vpack.c.bf16 %v184_v19, %v169_v18  ;;  %v200_v26 = vld [vmem:[%s1827_s1 + $0x5c8] sm:$0xf] }
  0x23   :  { %543 = vmatprep.mubr.f32.mxu1 %v1125_v3  ;;  %v1028_v24 = vpack.c.bf16 %v186_v22, %v171_v21  ;;  %v202_v27 = vld [vmem:[%s1827_s1 + $0x5d8] sm:$0xf]  ;;  %v24_v28 = vld [vmem:[%s1827_s1 + $0x48] sm:$0xff]  ;;  %v199_v29 = vld [vmem:[%s1827_s1 + $0x5c0] sm:$0xf] }
  0x24   :  { %989 = vmatpush1.bf16.msra.mxu0 %v988_v42  ;;  %v39_v30 = vld [vmem:[%s1827_s1 + $0xc0] sm:$0xff]  ;;  %v26_v31 = vld [vmem:[%s1827_s1 + $0x58] sm:$0xff]  ;;  %v41_v32 = vld [vmem:[%s1827_s1 + $0xd0] sm:$0xff] }
  0x25   :  { %1013 = vmatpush1.bf16.msra.mxu1 %v1012_v43  ;;  %991 = vmatprep.subr.bf16.mxu0 %v990_v44  ;;  %v23_v33 = vld [vmem:[%s1827_s1 + $0x40] sm:$0xff]  ;;  %v38_v34 = vld [vmem:[%s1827_s1 + $0xb8] sm:$0xff]  ;;  %v25_v35 = vld [vmem:[%s1827_s1 + $0x50] sm:$0xff]  ;;  %v1030_v40 = vpack.c.bf16 %v39_v30, %v24_v28  ;;  %v1054_v41 = vpack.c.bf16 %v41_v32, %v26_v31 }
  0x26   :  { %1015 = vmatprep.subr.bf16.mxu1 %v1014_v48  ;;  %v40_v36 = vld [vmem:[%s1827_s1 + $0xc8] sm:$0xff]  ;;  %v54_v37 = vld [vmem:[%s1827_s1 + $0x138] sm:$0xff]  ;;  %v69_v38 = vld [vmem:[%s1827_s1 + $0x1b0] sm:$0xff]  ;;  %v1032_v44 = vpack.c.bf16 %v38_v34, %v23_v33 }
  0x27   :  { %v201_v39 = vld [vmem:[%s1827_s1 + $0x5d0] sm:$0xf]  ;;  %v56_v42 = vld [vmem:[%s1827_s1 + $0x148] sm:$0xff]  ;;  %v71_v43 = vld [vmem:[%s1827_s1 + $0x1c0] sm:$0xff]  ;;  %v1056_v45 = vpack.c.bf16 %v40_v36, %v25_v35  ;;  %v1034_v46 = vpack.c.bf16 %v69_v38, %v54_v37 }
  0x28   :  { %993 = vmatpush1.bf16.msra.mxu0 %v992_v54  ;;  %v53_v47 = vld [vmem:[%s1827_s1 + $0x130] sm:$0xff]  ;;  %v68_v48 = vld [vmem:[%s1827_s1 + $0x1a8] sm:$0xff]  ;;  %v55_v49 = vld [vmem:[%s1827_s1 + $0x140] sm:$0xff]  ;;  %v1058_v50 = vpack.c.bf16 %v71_v43, %v56_v42 }
  0x29   :  { %1017 = vmatpush1.bf16.msra.mxu1 %v1016_v55  ;;  %995 = vmatprep.subr.bf16.mxu0 %v994_v56  ;;  %v70_v51 = vld [vmem:[%s1827_s1 + $0x1b8] sm:$0xff]  ;;  %v84_v52 = vld [vmem:[%s1827_s1 + $0x228] sm:$0xff]  ;;  %v99_v53 = vld [vmem:[%s1827_s1 + $0x2a0] sm:$0xff]  ;;  %v1036_v56 = vpack.c.bf16 %v68_v48, %v53_v47 }
  0x2a   :  { %1019 = vmatprep.subr.bf16.mxu1 %v1018_v60  ;;  %v86_v54 = vld [vmem:[%s1827_s1 + $0x238] sm:$0xff]  ;;  %v101_v55 = vld [vmem:[%s1827_s1 + $0x2b0] sm:$0xff]  ;;  %v1060_v57 = vpack.c.bf16 %v70_v51, %v55_v49  ;;  %v1038_v58 = vpack.c.bf16 %v99_v53, %v84_v52  ;;  %v83_v59 = vld [vmem:[%s1827_s1 + $0x220] sm:$0xff] }
  0x2b   :  { %v98_v60 = vld [vmem:[%s1827_s1 + $0x298] sm:$0xff]  ;;  %v85_v61 = vld [vmem:[%s1827_s1 + $0x230] sm:$0xff]  ;;  %v1062_v62 = vpack.c.bf16 %v101_v55, %v86_v54  ;;  %v100_v63 = vld [vmem:[%s1827_s1 + $0x2a8] sm:$0xff] }
  0x2c   :  { %997 = vmatpush1.bf16.msra.mxu0 %v996_v2  ;;  %v114_v0 = vld [vmem:[%s1827_s1 + $0x318] sm:$0xff]  ;;  %v129_v1 = vld [vmem:[%s1827_s1 + $0x390] sm:$0xff]  ;;  %v116_v2 = vld [vmem:[%s1827_s1 + $0x328] sm:$0xff]  ;;  %v1064_v6 = vpack.c.bf16 %v100_v63, %v85_v61  ;;  %v1127_v63 = vmov 0.0|0.0  }
  0x2d   :  { %1021 = vmatpush1.bf16.msra.mxu1 %v1020_v4  ;;  %999 = vmatprep.subr.bf16.mxu0 %v998_v5  ;;  %v131_v4 = vld [vmem:[%s1827_s1 + $0x3a0] sm:$0xff]  ;;  %v1040_v5 = vpack.c.bf16 %v98_v60, %v83_v59  ;;  %v1042_v7 = vpack.c.bf16 %v129_v1, %v114_v0  ;;  %v113_v8 = vld [vmem:[%s1827_s1 + $0x310] sm:$0xff]  ;;  %v130_v12 = vld [vmem:[%s1827_s1 + $0x398] sm:$0xff] }
  0x2e   :  { %1023 = vmatprep.subr.bf16.mxu1 %v1022_v9  ;;  %v128_v9 = vld [vmem:[%s1827_s1 + $0x388] sm:$0xff]  ;;  %v115_v10 = vld [vmem:[%s1827_s1 + $0x320] sm:$0xff]  ;;  %v1066_v11 = vpack.c.bf16 %v131_v4, %v116_v2  ;;  %v158_v22 = vld [vmem:[%s1827_s1 + $0x478] sm:$0xff] }
  0x2f   :  { %v144_v13 = vld [vmem:[%s1827_s1 + $0x408] sm:$0xff]  ;;  %v159_v14 = vld [vmem:[%s1827_s1 + $0x480] sm:$0xff]  ;;  %v1044_v18 = vpack.c.bf16 %v128_v9, %v113_v8  ;;  %v1068_v19 = vpack.c.bf16 %v130_v12, %v115_v10  ;;  %v189_v28 = vld [vmem:[%s1827_s1 + $0x570] sm:$0xff] }
  0x30   :  { %1001 = vmatpush1.bf16.msra.mxu0 %v1000_v15  ;;  %v146_v15 = vld [vmem:[%s1827_s1 + $0x418] sm:$0xff]  ;;  %v143_v21 = vld [vmem:[%s1827_s1 + $0x400] sm:$0xff]  ;;  %v173_v34 = vld [vmem:[%s1827_s1 + $0x4f0] sm:$0xff] }
  0x31   :  { %1025 = vmatpush1.bf16.msra.mxu1 %v1024_v16  ;;  %1003 = vmatprep.subr.bf16.mxu0 %v1002_v17  ;;  %v161_v16 = vld [vmem:[%s1827_s1 + $0x490] sm:$0xff]  ;;  %v210_v17 = vld [vmem:[%s1829_s2] sm:$0xff]  ;;  %v1048_v31 = vpack.c.bf16 %v158_v22, %v143_v21  ;;  %v188_v35 = vld [vmem:[%s1827_s1 + $0x568] sm:$0xff] }
  0x32   :  { %1027 = vmatprep.subr.bf16.mxu1 %v1026_v20  ;;  %213 = vperm.xlu0 %1124, %v210_v17   ;;  %v1046_v20 = vpack.c.bf16 %v159_v14, %v144_v13  ;;  %v191_v30 = vld [vmem:[%s1827_s1 + $0x580] sm:$0xff]  ;;  %v190_v38 = vld [vmem:[%s1827_s1 + $0x578] sm:$0xff]  ;;  %v29_v48 = vld [vmem:[%s1827_s1 + $0x70] sm:$0xff] }
  0x33   :  { %v175_v37 = vld [vmem:[%s1827_s1 + $0x500] sm:$0xff]  ;;  %v206_v42 = vld [vmem:[%s1827_s1 + $0x5f8] sm:$0xf]  ;;  %v44_v49 = vld [vmem:[%s1827_s1 + $0xe8] sm:$0xff] }
  0x34   :  { %1005 = vmatpush1.bf16.msra.mxu0 %v1004_v23  ;;  %v145_v23 = vld [vmem:[%s1827_s1 + $0x410] sm:$0xff]  ;;  %v203_v43 = vld [vmem:[%s1827_s1 + $0x5e0] sm:$0xf]  ;;  %v42_v47 = vld [vmem:[%s1827_s1 + $0xd8] sm:$0xff]  ;;  %v1103_v55 = vpack.c.bf16 %v44_v49, %v29_v48 }
  0x35   :  { %1029 = vmatpush1.bf16.msra.mxu1 %v1028_v24  ;;  %874 = vmatprep.subr.msk.mxu0 %vm220_vm0, %v200_v26  ;;  %v1070_v24 = vpack.c.bf16 %v161_v16, %v146_v15  ;;  %v160_v26 = vld [vmem:[%s1827_s1 + $0x488] sm:$0xff]  ;;  %v73_v51 = vld [vmem:[%s1827_s1 + $0x1d0] sm:$0xff]  ;;  %v59_v59 = vld [vmem:[%s1827_s1 + $0x160] sm:$0xff] }
  0x36   :  { %877 = vmatprep.subr.msk.mxu1 %vm220_vm0, %v202_v27  ;;  %v174_v27 = vld [vmem:[%s1827_s1 + $0x4f8] sm:$0xff]  ;;  %v1072_v32 = vpack.c.bf16 %v160_v26, %v145_v23  ;;  %v205_v52 = vld [vmem:[%s1827_s1 + $0x5f0] sm:$0xf]  ;;  %v88_v61 = vld [vmem:[%s1827_s1 + $0x248] sm:$0xff] }
  0x37   :  { %v1050_v33 = vpack.c.bf16 %v189_v28, %v174_v27  ;;  %v74_v60 = vld [vmem:[%s1827_s1 + $0x1d8] sm:$0xff]  ;;  %v87_v4 = vld [vmem:[%s1827_s1 + $0x240] sm:$0xff]  ;;  %v133_v9 = vld [vmem:[%s1827_s1 + $0x3b0] sm:$0xff] }
  0x38   :  { %875 = vmatpush1.msk.msra.mxu0 %vm220_vm0, %v199_v29  ;;  %v176_v29 = vld [vmem:[%s1827_s1 + $0x508] sm:$0xff]  ;;  %v1106_v1 = vpack.c.bf16 %v74_v60, %v59_v59  ;;  %v118_v8 = vld [vmem:[%s1827_s1 + $0x338] sm:$0xff]  ;;  %v117_v13 = vld [vmem:[%s1827_s1 + $0x330] sm:$0xff] }
  0x39   :  { %878 = vmatpush1.msk.msra.mxu1 %vm220_vm0, %v201_v39  ;;  %876 = vmatmul.mubr.msk.f32.vlgmr.msra.gmra.mrb[2].mxu0 %vm216_vm1, %v1342_v25  ;;  %v1074_v36 = vpack.c.bf16 %v191_v30, %v176_v29  ;;  %v1052_v39 = vpack.c.bf16 %v188_v35, %v173_v34  ;;  %v1090_v12 = vpack.c.bf16 %v133_v9, %v118_v8  ;;  %v132_v14 = vld [vmem:[%s1827_s1 + $0x3a8] sm:$0xff]  ;;  %v119_v15 = vld [vmem:[%s1827_s1 + $0x340] sm:$0xff]  ;;  %v134_v16 = vld [vmem:[%s1827_s1 + $0x3b8] sm:$0xff] }
  0x3a   :  { %1031 = vmatprep.subr.bf16.mxu0 %v1030_v40  ;;  %1055 = vmatprep.subr.bf16.mxu1 %v1054_v41  ;;  %v1076_v40 = vpack.c.bf16 %v190_v38, %v175_v37  ;;  %v204_v41 = vld [vmem:[%s1827_s1 + $0x5e8] sm:$0xf]  ;;  %v147_v22 = vld [vmem:[%s1827_s1 + $0x420] sm:$0xff]  ;;  %v162_v23 = vld [vmem:[%s1827_s1 + $0x498] sm:$0xff] }
  0x3b   :  { %879 = vmatmul.mubr.msk.f32.vlgmr.msra.gmra.mrb[2].mxu1 %vm216_vm1, %v1342_v25  ;;  %1033 = vmatpush1.bf16.msra.mxu0 %v1032_v44  ;;  %v28_v44 = vld [vmem:[%s1827_s1 + $0x68] sm:$0xff]  ;;  %v178_v27 = vld [vmem:[%s1827_s1 + $0x518] sm:$0xff]  ;;  %v193_v28 = vld [vmem:[%s1827_s1 + $0x590] sm:$0xff]  ;;  %v1096_v29 = vpack.c.bf16 %v162_v23, %v147_v22 }
  0x3c   :  { %1057 = vmatpush1.bf16.msra.mxu1 %v1056_v45  ;;  %1035 = vmatprep.subr.bf16.mxu0 %v1034_v46  ;;  %v43_v45 = vld [vmem:[%s1827_s1 + $0xe0] sm:$0xff]  ;;  %v148_v17 = vld [vmem:[%s1827_s1 + $0x428] sm:$0xff]  ;;  %v194_v35 = vld [vmem:[%s1827_s1 + $0x598] sm:$0xff] }
  0x3d   :  { %1059 = vmatprep.subr.bf16.mxu1 %v1058_v50  ;;  %614 = vmatprep.mubr.f32.mxu0 %v1125_v3  ;;  %v27_v46 = vld [vmem:[%s1827_s1 + $0x60] sm:$0xff]  ;;  %v58_v50 = vld [vmem:[%s1827_s1 + $0x158] sm:$0xff]  ;;  %v1078_v53 = vpack.c.bf16 %v43_v45, %v28_v44  ;;  %v164_v26 = vld [vmem:[%s1827_s1 + $0x4a8] sm:$0xff] }
  0x3e   :  { %685 = vmatprep.mubr.f32.mxu1 %v1125_v3  ;;  %v1080_v54 = vpack.c.bf16 %v42_v47, %v27_v46  ;;  %v179_v34 = vld [vmem:[%s1827_s1 + $0x520] sm:$0xff]  ;;  %v208_v38 = vld [vmem:[%s1827_s1 + $0x608] sm:$0xf] }
  0x3f   :  { %1037 = vmatpush1.bf16.msra.mxu0 %v1036_v56  ;;  %v1082_v56 = vpack.c.bf16 %v73_v51, %v58_v50  ;;  %v1118_v37 = vpack.c.bf16 %v194_v35, %v179_v34 }
  0x40   :  { %1061 = vmatpush1.bf16.msra.mxu1 %v1060_v57  ;;  %1039 = vmatprep.subr.bf16.mxu0 %v1038_v58  ;;  %v57_v57 = vld [vmem:[%s1827_s1 + $0x150] sm:$0xff]  ;;  %v72_v58 = vld [vmem:[%s1827_s1 + $0x1c8] sm:$0xff] }
  0x41   :  { %1063 = vmatprep.subr.bf16.mxu1 %v1062_v62  ;;  %v103_v62 = vld [vmem:[%s1827_s1 + $0x2c0] sm:$0xff]  ;;  %v1084_v0 = vpack.c.bf16 %v72_v58, %v57_v57 }
  0x42   :  { %v1086_v2 = vpack.c.bf16 %v103_v62, %v88_v61 }
  0x43   :  { %1041 = vmatpush1.bf16.msra.mxu0 %v1040_v5  ;;  %v102_v5 = vld [vmem:[%s1827_s1 + $0x2b8] sm:$0xff] }
  0x44   :  { %1065 = vmatpush1.bf16.msra.mxu1 %v1064_v6  ;;  %1043 = vmatprep.subr.bf16.mxu0 %v1042_v7  ;;  %v89_v6 = vld [vmem:[%s1827_s1 + $0x250] sm:$0xff]  ;;  %v104_v7 = vld [vmem:[%s1827_s1 + $0x2c8] sm:$0xff]  ;;  %v1088_v10 = vpack.c.bf16 %v102_v5, %v87_v4 }
  0x45   :  { %1067 = vmatprep.subr.bf16.mxu1 %v1066_v11  ;;  %v1109_v11 = vpack.c.bf16 %v104_v7, %v89_v6 }
  0x47   :  { %1045 = vmatpush1.bf16.msra.mxu0 %v1044_v18  ;;  %v163_v18 = vld [vmem:[%s1827_s1 + $0x4a0] sm:$0xff] }
  0x48   :  { %1069 = vmatpush1.bf16.msra.mxu1 %v1068_v19  ;;  %1047 = vmatprep.subr.bf16.mxu0 %v1046_v20  ;;  %v1092_v19 = vpack.c.bf16 %v132_v14, %v117_v13  ;;  %v1112_v20 = vpack.c.bf16 %v134_v16, %v119_v15  ;;  %v1094_v21 = vpack.c.bf16 %v163_v18, %v148_v17 }
  0x49   :  { %1071 = vmatprep.subr.bf16.mxu1 %v1070_v24  ;;  %v149_v24 = vld [vmem:[%s1827_s1 + $0x430] sm:$0xff] }
  0x4a   :  { %v1115_v30 = vpack.c.bf16 %v164_v26, %v149_v24 }
  0x4b   :  { %1049 = vmatpush1.bf16.msra.mxu0 %v1048_v31  ;;  %v1098_v31 = vpack.c.bf16 %v193_v28, %v178_v27 }
  0x4c   :  { %1073 = vmatpush1.bf16.msra.mxu1 %v1072_v32  ;;  %1051 = vmatprep.subr.bf16.mxu0 %v1050_v33  ;;  %v177_v32 = vld [vmem:[%s1827_s1 + $0x510] sm:$0xff]  ;;  %v192_v33 = vld [vmem:[%s1827_s1 + $0x588] sm:$0xff] }
  0x4d   :  { %1075 = vmatprep.subr.bf16.mxu1 %v1074_v36  ;;  %v1100_v36 = vpack.c.bf16 %v192_v33, %v177_v32 }
  0x4f   :  { %1053 = vmatpush1.bf16.msra.mxu0 %v1052_v39  ;;  %v207_v39 = vld [vmem:[%s1827_s1 + $0x600] sm:$0xf] }
  0x50   :  { %1077 = vmatpush1.bf16.msra.mxu1 %v1076_v40  ;;  %880 = vmatprep.subr.msk.mxu0 %vm220_vm0, %v204_v41  ;;  %v209_v40 = vld [vmem:[%s1827_s1 + $0x610] sm:$0xf] }
  0x51   :  { %883 = vmatprep.subr.msk.mxu1 %vm220_vm0, %v206_v42 }
  0x53   :  { %881 = vmatpush1.msk.msra.mxu0 %vm220_vm0, %v203_v43 }
  0x54   :  { %884 = vmatpush1.msk.msra.mxu1 %vm220_vm0, %v205_v52  ;;  %882 = vmatmul.mubr.msk.f32.vlgmr.msra.gmra.mrb[4].mxu0 %vm216_vm1, %v1342_v25 }
  0x55   :  { %1079 = vmatprep.subr.bf16.mxu0 %v1078_v53  ;;  %1102 = vmatprep.subr.bf16.mxu1 %v1127_v63 }
  0x56   :  { %885 = vmatmul.mubr.msk.f32.vlgmr.msra.gmra.mrb[4].mxu1 %vm216_vm1, %v1342_v25  ;;  %1081 = vmatpush1.bf16.msra.mxu0 %v1080_v54 }
  0x57   :  { %1104 = vmatpush3.bf16.msra.mxu1 %v1103_v55  ;;  %1083 = vmatprep.subr.bf16.mxu0 %v1082_v56 }
  0x58   :  { %1105 = vmatprep.subr.bf16.mxu1 %v1127_v63  ;;  %756 = vmatprep.mubr.f32.mxu0 %v1125_v3 }
  0x59   :  { %931 = vmatprep.mubr.msk.f32.mxu1 %vm1128_vm2, %v1125_v3 }
  0x5a   :  { %1085 = vmatpush1.bf16.msra.mxu0 %v1084_v0 }
  0x5b   :  { %1107 = vmatpush3.bf16.msra.mxu1 %v1106_v1  ;;  %1087 = vmatprep.subr.bf16.mxu0 %v1086_v2 }
  0x5c   :  { %1108 = vmatprep.subr.bf16.mxu1 %v1127_v63 }
  0x5e   :  { %1089 = vmatpush1.bf16.msra.mxu0 %v1088_v10 }
  0x5f   :  { %1110 = vmatpush3.bf16.msra.mxu1 %v1109_v11  ;;  %1091 = vmatprep.subr.bf16.mxu0 %v1090_v12 }
  0x60   :  { %1111 = vmatprep.subr.bf16.mxu1 %v1127_v63 }
  0x62   :  { %1093 = vmatpush1.bf16.msra.mxu0 %v1092_v19 }
  0x63   :  { %1113 = vmatpush3.bf16.msra.mxu1 %v1112_v20  ;;  %1095 = vmatprep.subr.bf16.mxu0 %v1094_v21 }
  0x64   :  { %1114 = vmatprep.subr.bf16.mxu1 %v1127_v63 }
  0x66   :  { %1097 = vmatpush1.bf16.msra.mxu0 %v1096_v29 }
  0x67   :  { %1116 = vmatpush3.bf16.msra.mxu1 %v1115_v30  ;;  %1099 = vmatprep.subr.bf16.mxu0 %v1098_v31 }
  0x68   :  { %1117 = vmatprep.subr.bf16.mxu1 %v1127_v63 }
  0x6a   :  { %1101 = vmatpush1.bf16.msra.mxu0 %v1100_v36 }
  0x6b   :  { %1119 = vmatpush3.bf16.msra.mxu1 %v1118_v37  ;;  %886 = vmatprep.subr.msk.mxu0 %vm220_vm0, %v208_v38 }
  0x6c   :  { %929 = vmatprep.subr.mxu1 %v1125_v3 }
  0x6e   :  { %887 = vmatpush1.msk.msra.mxu0 %vm220_vm0, %v207_v39 }
  0x6f   :  { %930 = vmatpush3.msk.msra.mxu1 %vm220_vm0, %v209_v40  ;;  %888 = vmatmul.mubr.msk.f32.vlgmr.msra.gmra.mrb[6].mxu0 %vm216_vm1, %v1342_v25 }
  0x70   :  { %932 = vmatmul.mubr.msk.f32.vlgmr.msra.gmra.mrb[6].mxu1 %vm216_vm1, %v1342_v25 }
  0xb1   :  { %v214_v41 = vpop.permute.xlu0 %213 }
  0xf1   :  { %v332_v42 = vpop.f32.mrb[0].mxu0 }
  0xf2   :  { %v333_v43 = vadd.f32 %v332_v42, %v214_v41  ;;  %v334_v44 = vpop.f32.mrb[1].mxu0 }
  0xf3   :  { %v335_v45 = vadd.f32 %v334_v44, %v214_v41  ;;  %v403_v3 = vpop.f32.mrb[0].mxu1 }
  0xf4   :  { %v833_v46 = vmax.f32 %v333_v43, 0.0  ;;  %v404_v47 = vadd.f32 %v403_v3, %v214_v41  ;;  %v405_v48 = vpop.f32.mrb[1].mxu1 }
  0xf5   :  { %v834_v49 = vmax.f32 %v335_v45, 0.0  ;;  %v406_v50 = vadd.f32 %v405_v48, %v214_v41 }
  0xf6   :  { %848 = vst [vmem:[%s1830_s3] sm:$0xff] %v833_v46  ;;  %v835_v51 = vmax.f32 %v404_v47, 0.0 }
  0xf7   :  { %849 = vst [vmem:[%s1830_s3 + $0x8] sm:$0xff] %v834_v49  ;;  %v836_v25 = vmax.f32 %v406_v50, 0.0 }
  0xf8   :  { %850 = vst [vmem:[%s1830_s3 + $0x10] sm:$0xff] %v835_v51 }
  0xf9   :  { %851 = vst [vmem:[%s1830_s3 + $0x18] sm:$0xff] %v836_v25 }
 0x10c   :  { %v474_v52 = vpop.f32.mrb[2].mxu0 }
 0x10d   :  { %v475_v53 = vadd.f32 %v474_v52, %v214_v41  ;;  %v476_v54 = vpop.f32.mrb[3].mxu0 }
 0x10e   :  { %v477_v55 = vadd.f32 %v476_v54, %v214_v41  ;;  %v545_v56 = vpop.f32.mrb[2].mxu1 }
 0x10f   :  { %v837_v57 = vmax.f32 %v475_v53, 0.0  ;;  %v546_v58 = vadd.f32 %v545_v56, %v214_v41  ;;  %v547_v59 = vpop.f32.mrb[3].mxu1 }
 0x110   :  { %v838_v60 = vmax.f32 %v477_v55, 0.0  ;;  %v548_v61 = vadd.f32 %v547_v59, %v214_v41 }
 0x111   :  { %852 = vst [vmem:[%s1830_s3 + $0x20] sm:$0xff] %v837_v57  ;;  %v839_v62 = vmax.f32 %v546_v58, 0.0 }
 0x112   :  { %853 = vst [vmem:[%s1830_s3 + $0x28] sm:$0xff] %v838_v60  ;;  %v840_v63 = vmax.f32 %v548_v61, 0.0 }
 0x113   :  { %854 = vst [vmem:[%s1830_s3 + $0x30] sm:$0xff] %v839_v62 }
 0x114   :  { %855 = vst [vmem:[%s1830_s3 + $0x38] sm:$0xff] %v840_v63 }
 0x127   :  { %v616_v0 = vpop.f32.mrb[4].mxu0 }
 0x128   :  { %v617_v1 = vadd.f32 %v616_v0, %v214_v41  ;;  %v618_v2 = vpop.f32.mrb[5].mxu0 }
 0x129   :  { %v619_v4 = vadd.f32 %v618_v2, %v214_v41  ;;  %v687_v5 = vpop.f32.mrb[4].mxu1 }
 0x12a   :  { %v841_v6 = vmax.f32 %v617_v1, 0.0  ;;  %v688_v7 = vadd.f32 %v687_v5, %v214_v41  ;;  %v689_v8 = vpop.f32.mrb[5].mxu1 }
 0x12b   :  { %v842_v9 = vmax.f32 %v619_v4, 0.0  ;;  %v690_v10 = vadd.f32 %v689_v8, %v214_v41 }
 0x12c   :  { %856 = vst [vmem:[%s1830_s3 + $0x40] sm:$0xff] %v841_v6  ;;  %v843_v11 = vmax.f32 %v688_v7, 0.0 }
 0x12d   :  { %857 = vst [vmem:[%s1830_s3 + $0x48] sm:$0xff] %v842_v9  ;;  %v844_v12 = vmax.f32 %v690_v10, 0.0 }
 0x12e   :  { %858 = vst [vmem:[%s1830_s3 + $0x50] sm:$0xff] %v843_v11 }
 0x12f   :  { %859 = vst [vmem:[%s1830_s3 + $0x58] sm:$0xff] %v844_v12 }
 0x142   :  { %v758_v13 = vpop.f32.mrb[6].mxu0 }
 0x143   :  { %v759_v14 = vadd.f32 %v758_v13, %v214_v41  ;;  %v829_v15 = vpop.f32.mrb[6].mxu1  ;;  %v760_v16 = vpop.f32.mrb[7].mxu0 }
 0x144   :  { %v830_v17 = vadd.f32 %v829_v15, %v214_v41  ;;  %v761_v18 = vadd.f32 %v760_v16, %v214_v41  ;;  %v933_v19 = vpop.f32.mrb[7].mxu1 }
 0x145   :  { %v845_v20 = vmax.f32 %v759_v14, 0.0 }
 0x146   :  { %v847_v21 = vmax.f32 %v830_v17, 0.0  ;;  %v846_v22 = vmax.f32 %v761_v18, 0.0 }
 0x147   :  { %860 = vst [vmem:[%s1830_s3 + $0x60] sm:$0xff] %v845_v20 }
 0x148   :  { %863 = vst.msk [vmem:[%s1830_s3 + $0x70] sm:$0xff] %vm862_vm3, %v847_v21  ;;  %861 = vst [vmem:[%s1830_s3 + $0x68] sm:$0xff] %v846_v22 }

// kernel: eonss_forward.10
= control target key start
LH: loop header
LB: loop body
LE: loop exit
PB: predicated region body
PF: predicated region fallthrough
CT: control target
= control target key end

     0   :  { %v191_v0 = vlaneseq  ;;  %v407_v4 = vmov 1966171168   ;;  %s502_s0 = inlined_call_operand.vmem [shape: f32[4,3600], index: 0, kind: input, shape index: {}]   ;;  %s503_s1 = inlined_call_operand.vmem [shape: f32[1,3600], index: 1, kind: output, shape index: {}]  }
   0x1   :  { %v8_v1 = vld [vmem:[%s502_s0] sm:$0xff]  ;;  %v9_v2 = vld [vmem:[%s502_s0 + $0x8] sm:$0xff]  ;;  %v10_v3 = vld [vmem:[%s502_s0 + $0x10] sm:$0xff]  ;;  %v189_v5 = vunpack.c.l.s4 %v407_v4 }
   0x2   :  { %v11_v6 = vld [vmem:[%s502_s0 + $0x18] sm:$0xff]  ;;  %v376_v7 = vrot.slane %v8_v1, 9  ;;  %v377_v8 = vrot.slane %v9_v2, 9  ;;  %v378_v9 = vrot.slane %v10_v3, 9  ;;  %v192_v10 = vshrl.u32 %v191_v0, 7  ;;  %v12_v11 = vld [vmem:[%s502_s0 + $0x20] sm:$0xff] }
   0x3   :  { %v379_v12 = vrot.slane %v11_v6, 9  ;;  %v190_v13 = vunpack.c.0.s8 %v189_v5  ;;  %v13_v14 = vld [vmem:[%s502_s0 + $0x28] sm:$0xff]  ;;  %v14_v15 = vld [vmem:[%s502_s0 + $0x30] sm:$0xff]  ;;  %v15_v16 = vld [vmem:[%s502_s0 + $0x38] sm:$0xff]  ;;  %v380_v17 = vrot.slane %v12_v11, 9  ;;  %vm369_vm0 = vcmp.lt.s32.totalorder %v191_v0, 528 }
   0x4   :  { %v83_v18 = vmax.f32 %v8_v1, %v376_v7  ;;  %v84_v19 = vmax.f32 %v9_v2, %v377_v8  ;;  %v85_v20 = vmax.f32 %v10_v3, %v378_v9  ;;  %v381_v21 = vrot.slane %v13_v14, 9  ;;  %v16_v42 = vld [vmem:[%s502_s0 + $0x40] sm:$0xff]  ;;  %v17_v43 = vld [vmem:[%s502_s0 + $0x48] sm:$0xff]  ;;  %v18_v52 = vld [vmem:[%s502_s0 + $0x50] sm:$0xff] }
   0x5   :  { %v86_v22 = vmax.f32 %v11_v6, %v379_v12  ;;  %v443_v23 = vsub.s32 %v190_v13, %v192_v10  ;;  %v382_v24 = vrot.slane %v14_v15, 9  ;;  %v383_v25 = vrot.slane %v15_v16, 9  ;;  %v19_v53 = vld [vmem:[%s502_s0 + $0x58] sm:$0xff]  ;;  %v20_v62 = vld [vmem:[%s502_s0 + $0x60] sm:$0xff]  ;;  %v21_v8 = vld [vmem:[%s502_s0 + $0x68] sm:$0xff] }
   0x6   :  { %v391_v26 = vrot.slane %v83_v18, 10  ;;  %v392_v27 = vrot.slane %v84_v19, 10  ;;  %v393_v28 = vrot.slane %v85_v20, 10  ;;  %v87_v29 = vmax.f32 %v12_v11, %v380_v17  ;;  %v22_v12 = vld [vmem:[%s502_s0 + $0x70] sm:$0xf] }
   0x7   :  { %v394_v30 = vrot.slane %v86_v22, 10  ;;  %v88_v31 = vmax.f32 %v13_v14, %v381_v21  ;;  %v89_v32 = vmax.f32 %v14_v15, %v382_v24  ;;  %v90_v33 = vmax.f32 %v15_v16, %v383_v25 }
   0x8   :  { %v158_v34 = vmax.f32 %v83_v18, %v391_v26  ;;  %v159_v35 = vmax.f32 %v84_v19, %v392_v27  ;;  %v160_v36 = vmax.f32 %v85_v20, %v393_v28  ;;  %v395_v37 = vrot.slane %v87_v29, 10 }
   0x9   :  { %v161_v38 = vmax.f32 %v86_v22, %v394_v30  ;;  %v396_v39 = vrot.slane %v88_v31, 10  ;;  %v397_v40 = vrot.slane %v89_v32, 10  ;;  %v398_v41 = vrot.slane %v90_v33, 10 }
   0xa   :  { %v194_v44 = vrot.slane %v158_v34, %v443_v23  ;;  %v201_v45 = vrot.slane %v159_v35, %v443_v23  ;;  %v208_v46 = vrot.slane %v160_v36, %v443_v23  ;;  %v162_v47 = vmax.f32 %v87_v29, %v395_v37 }
   0xb   :  { %v215_v48 = vrot.slane %v161_v38, %v443_v23  ;;  %v163_v49 = vmax.f32 %v88_v31, %v396_v39  ;;  %v164_v50 = vmax.f32 %v89_v32, %v397_v40  ;;  %v165_v51 = vmax.f32 %v90_v33, %v398_v41 }
   0xc   :  { %v216_v54 = vcombine.low %v194_v44, %v201_v45  ;;  %v239_v55 = vrot.slane %v162_v47, %v443_v23  ;;  %v384_v56 = vrot.slane %v16_v42, 9  ;;  %v385_v57 = vrot.slane %v17_v43, 9 }
   0xd   :  { %v217_v58 = vcombine.low %v208_v46, %v215_v48  ;;  %v246_v59 = vrot.slane %v163_v49, %v443_v23  ;;  %v253_v60 = vrot.slane %v164_v50, %v443_v23  ;;  %v260_v61 = vrot.slane %v165_v51, %v443_v23 }
   0xe   :  { %v224_v63 = vrot.slane %v216_v54, %v443_v23  ;;  %v386_v1 = vrot.slane %v18_v52, 9  ;;  %v387_v2 = vrot.slane %v19_v53, 9  ;;  %v91_v3 = vmax.f32 %v16_v42, %v384_v56 }
   0xf   :  { %v231_v4 = vrot.slane %v217_v58, %v443_v23  ;;  %v261_v5 = vcombine.low %v239_v55, %v246_v59  ;;  %v262_v6 = vcombine.low %v253_v60, %v260_v61  ;;  %v92_v7 = vmax.f32 %v17_v43, %v385_v57 }
  0x10   :  { %v93_v9 = vmax.f32 %v18_v52, %v386_v1  ;;  %v94_v10 = vmax.f32 %v19_v53, %v387_v2  ;;  %v399_v11 = vrot.slane %v91_v3, 10  ;;  %v388_v13 = vrot.slane %v20_v62, 9 }
  0x11   :  { %v232_v14 = vcombine.low %v224_v63, %v231_v4  ;;  %v269_v15 = vrot.slane %v261_v5, %v443_v23  ;;  %v276_v16 = vrot.slane %v262_v6, %v443_v23  ;;  %v400_v17 = vrot.slane %v92_v7, 10 }
  0x12   :  { %v401_v18 = vrot.slane %v93_v9, 10  ;;  %v402_v19 = vrot.slane %v94_v10, 10  ;;  %v166_v20 = vmax.f32 %v91_v3, %v399_v11  ;;  %v389_v21 = vrot.slane %v21_v8, 9 }
  0x13   :  { %364 = vst [vmem:[%s503_s1] sm:$0xff] %v232_v14  ;;  %v277_v22 = vcombine.low %v269_v15, %v276_v16  ;;  %v167_v24 = vmax.f32 %v92_v7, %v400_v17  ;;  %v390_v25 = vrot.slane %v22_v12, 9  ;;  %v95_v26 = vmax.f32 %v20_v62, %v388_v13 }
  0x14   :  { %v168_v27 = vmax.f32 %v93_v9, %v401_v18  ;;  %v169_v28 = vmax.f32 %v94_v10, %v402_v19  ;;  %v284_v29 = vrot.slane %v166_v20, %v443_v23  ;;  %v96_v30 = vmax.f32 %v21_v8, %v389_v21 }
  0x15   :  { %365 = vst [vmem:[%s503_s1 + $0x8] sm:$0xff] %v277_v22  ;;  %v291_v31 = vrot.slane %v167_v24, %v443_v23  ;;  %v97_v32 = vmax.f32 %v22_v12, %v390_v25  ;;  %v403_v33 = vrot.slane %v95_v26, 10 }
  0x16   :  { %v298_v34 = vrot.slane %v168_v27, %v443_v23  ;;  %v305_v35 = vrot.slane %v169_v28, %v443_v23  ;;  %v404_v36 = vrot.slane %v96_v30, 10 }
  0x17   :  { %v306_v37 = vcombine.low %v284_v29, %v291_v31  ;;  %v405_v38 = vrot.slane %v97_v32, 10  ;;  %v170_v39 = vmax.f32 %v95_v26, %v403_v33 }
  0x18   :  { %v307_v40 = vcombine.low %v298_v34, %v305_v35  ;;  %v171_v41 = vmax.f32 %v96_v30, %v404_v36 }
  0x19   :  { %v314_v42 = vrot.slane %v306_v37, %v443_v23  ;;  %v172_v43 = vmax.f32 %v97_v32, %v405_v38  ;;  %v329_v44 = vrot.slane %v170_v39, %v443_v23 }
  0x1a   :  { %v321_v45 = vrot.slane %v307_v40, %v443_v23  ;;  %v336_v46 = vrot.slane %v171_v41, %v443_v23 }
  0x1b   :  { %v343_v47 = vrot.slane %v172_v43, %v443_v23 }
  0x1c   :  { %v322_v48 = vcombine.low %v314_v42, %v321_v45  ;;  %v344_v49 = vcombine.low %v329_v44, %v336_v46 }
  0x1d   :  { %v358_v50 = vrot.slane %v343_v47, %v443_v23 }
  0x1e   :  { %366 = vst [vmem:[%s503_s1 + $0x10] sm:$0xff] %v322_v48  ;;  %v351_v51 = vrot.slane %v344_v49, %v443_v23 }
  0x20   :  { %v359_v52 = vcombine.low %v351_v51, %v358_v50 }
  0x22   :  { %371 = vst.msk [vmem:[%s503_s1 + $0x18] sm:$0x1f] %vm369_vm0, %v359_v52 }

// kernel: eonss_forward.11
= control target key start
LH: loop header
LB: loop body
LE: loop exit
PB: predicated region body
PF: predicated region fallthrough
CT: control target
= control target key end

     0   :  { %v213_v0 = vmov 0.0|0.0   ;;  %v214_v6 = vmov 0   ;;  %vm55_vm0 = vcmask 588800   ;;  %v215_v42 = vmov 0.0   ;;  %s359_s1 = inlined_call_operand.vmem [shape: f32[200,128], index: 1, kind: input, shape index: {}]   ;;  %s360_s0 = inlined_call_operand.vmem [shape: f32[16,200], index: 0, kind: input, shape index: {}]   ;;  %s361_s2 = inlined_call_operand.vmem [shape: f32[16,1], index: 2, kind: input, shape index: {}]   ;;  %s362_s3 = inlined_call_operand.vmem [shape: f32[16,128], index: 3, kind: output, shape index: {}]  }
   0x1   :  { %147 = vmatprep.subr.bf16.mxu0 %v213_v0  ;;  %183 = vmatprep.subr.bf16.mxu1 %v213_v0  ;;  %v18_v1 = vld [vmem:[%s359_s1] sm:$0xff]  ;;  %v19_v2 = vld [vmem:[%s359_s1 + $0x8] sm:$0xff]  ;;  %v20_v3 = vld [vmem:[%s359_s1 + $0x10] sm:$0xff] }
   0x2   :  { %v148_v4 = vpack.c.bf16 %v19_v2, %v18_v1  ;;  %v21_v5 = vld [vmem:[%s359_s1 + $0x18] sm:$0xff]  ;;  %212 = vset.pattern.permute.xlu0 %v214_v6  ;;  %v22_v8 = vld [vmem:[%s359_s1 + $0x20] sm:$0xff]  ;;  %v23_v9 = vld [vmem:[%s359_s1 + $0x28] sm:$0xff] }
   0x3   :  { %v151_v7 = vpack.c.bf16 %v21_v5, %v20_v3  ;;  %v154_v10 = vpack.c.bf16 %v23_v9, %v22_v8  ;;  %v24_v11 = vld [vmem:[%s359_s1 + $0x30] sm:$0xff]  ;;  %v25_v12 = vld [vmem:[%s359_s1 + $0x38] sm:$0xff]  ;;  %v15_v13 = vld [vmem:[%s360_s0 + $0x8] sm:$0xff] }
   0x4   :  { %149 = vmatpush1.bf16.msra.mxu0 %v148_v4  ;;  %196 = vmatpush1.bf16.msra.mxu1 %v148_v4  ;;  %v17_v14 = vld [vmem:[%s360_s0 + $0x18] sm:$0xff]  ;;  %v43_v15 = vld [vmem:[%s361_s2] sm:$0xff]  ;;  %v157_v16 = vpack.c.bf16 %v25_v12, %v24_v11  ;;  %v44_v17 = vld [vmem:[%s361_s2 + $0x8] sm:$0xff] }
   0x5   :  { %150 = vmatprep.subr.bf16.mxu0 %v213_v0  ;;  %184 = vmatprep.subr.bf16.mxu1 %v213_v0  ;;  %v26_v18 = vld [vmem:[%s359_s1 + $0x40] sm:$0xff]  ;;  %v27_v19 = vld [vmem:[%s359_s1 + $0x48] sm:$0xff]  ;;  %v28_v21 = vld [vmem:[%s359_s1 + $0x50] sm:$0xff] }
   0x6   :  { %145 = vmatprep.mubr.msk.f32.mxu0 %vm55_vm0, %v15_v13  ;;  %146 = vmatprep.mubr.msk.f32.mxu1 %vm55_vm0, %v17_v14  ;;  %v160_v20 = vpack.c.bf16 %v27_v19, %v26_v18  ;;  %v29_v22 = vld [vmem:[%s359_s1 + $0x58] sm:$0xff]  ;;  %v30_v24 = vld [vmem:[%s359_s1 + $0x60] sm:$0xff]  ;;  %v31_v25 = vld [vmem:[%s359_s1 + $0x68] sm:$0xff] }
   0x7   :  { %47 = vperm.xlu0 %212, %v43_v15   ;;  %v163_v23 = vpack.c.bf16 %v29_v22, %v28_v21  ;;  %v166_v26 = vpack.c.bf16 %v31_v25, %v30_v24  ;;  %v32_v27 = vld [vmem:[%s359_s1 + $0x70] sm:$0xff]  ;;  %v33_v28 = vld [vmem:[%s359_s1 + $0x78] sm:$0xff]  ;;  %v34_v30 = vld [vmem:[%s359_s1 + $0x80] sm:$0xff] }
   0x8   :  { %152 = vmatpush1.bf16.msra.mxu0 %v151_v7  ;;  %197 = vmatpush1.bf16.msra.mxu1 %v151_v7  ;;  %v169_v29 = vpack.c.bf16 %v33_v28, %v32_v27  ;;  %v35_v31 = vld [vmem:[%s359_s1 + $0x88] sm:$0xff]  ;;  %v36_v33 = vld [vmem:[%s359_s1 + $0x90] sm:$0xff]  ;;  %v37_v34 = vld [vmem:[%s359_s1 + $0x98] sm:$0xff] }
   0x9   :  { %153 = vmatprep.subr.bf16.mxu0 %v213_v0  ;;  %185 = vmatprep.subr.bf16.mxu1 %v213_v0  ;;  %v172_v32 = vpack.c.bf16 %v35_v31, %v34_v30  ;;  %v175_v35 = vpack.c.bf16 %v37_v34, %v36_v33  ;;  %v38_v36 = vld [vmem:[%s359_s1 + $0xa0] sm:$0xff]  ;;  %v39_v37 = vld [vmem:[%s359_s1 + $0xa8] sm:$0xff]  ;;  %v40_v39 = vld [vmem:[%s359_s1 + $0xb0] sm:$0xff] }
   0xa   :  { %v178_v38 = vpack.c.bf16 %v39_v37, %v38_v36  ;;  %v41_v40 = vld [vmem:[%s359_s1 + $0xb8] sm:$0xff]  ;;  %v42_v43 = vld [vmem:[%s359_s1 + $0xc0] sm:$0xff]  ;;  %v16_v45 = vld [vmem:[%s360_s0 + $0x10] sm:$0xff] }
   0xb   :  { %52 = vperm.xlu0 %212, %v44_v17   ;;  %v181_v41 = vpack.c.bf16 %v41_v40, %v40_v39  ;;  %v14_v44 = vld [vmem:[%s360_s0] sm:$0xff] }
   0xc   :  { %155 = vmatpush1.bf16.msra.mxu0 %v154_v10  ;;  %198 = vmatpush1.bf16.msra.mxu1 %v154_v10 }
   0xd   :  { %156 = vmatprep.subr.bf16.mxu0 %v213_v0  ;;  %186 = vmatprep.subr.bf16.mxu1 %v213_v0 }
  0x10   :  { %158 = vmatpush1.bf16.msra.mxu0 %v157_v16  ;;  %199 = vmatpush1.bf16.msra.mxu1 %v157_v16 }
  0x11   :  { %159 = vmatprep.subr.bf16.mxu0 %v213_v0  ;;  %187 = vmatprep.subr.bf16.mxu1 %v213_v0 }
  0x14   :  { %161 = vmatpush1.bf16.msra.mxu0 %v160_v20  ;;  %200 = vmatpush1.bf16.msra.mxu1 %v160_v20 }
  0x15   :  { %162 = vmatprep.subr.bf16.mxu0 %v213_v0  ;;  %188 = vmatprep.subr.bf16.mxu1 %v213_v0 }
  0x18   :  { %164 = vmatpush1.bf16.msra.mxu0 %v163_v23  ;;  %201 = vmatpush1.bf16.msra.mxu1 %v163_v23 }
  0x19   :  { %165 = vmatprep.subr.bf16.mxu0 %v213_v0  ;;  %189 = vmatprep.subr.bf16.mxu1 %v213_v0 }
  0x1c   :  { %167 = vmatpush1.bf16.msra.mxu0 %v166_v26  ;;  %202 = vmatpush1.bf16.msra.mxu1 %v166_v26 }
  0x1d   :  { %168 = vmatprep.subr.bf16.mxu0 %v213_v0  ;;  %190 = vmatprep.subr.bf16.mxu1 %v213_v0 }
  0x20   :  { %170 = vmatpush1.bf16.msra.mxu0 %v169_v29  ;;  %203 = vmatpush1.bf16.msra.mxu1 %v169_v29 }
  0x21   :  { %171 = vmatprep.subr.bf16.mxu0 %v213_v0  ;;  %191 = vmatprep.subr.bf16.mxu1 %v213_v0 }
  0x24   :  { %173 = vmatpush1.bf16.msra.mxu0 %v172_v32  ;;  %204 = vmatpush1.bf16.msra.mxu1 %v172_v32 }
  0x25   :  { %174 = vmatprep.subr.bf16.mxu0 %v213_v0  ;;  %192 = vmatprep.subr.bf16.mxu1 %v213_v0 }
  0x28   :  { %176 = vmatpush1.bf16.msra.mxu0 %v175_v35  ;;  %205 = vmatpush1.bf16.msra.mxu1 %v175_v35 }
  0x29   :  { %177 = vmatprep.subr.bf16.mxu0 %v213_v0  ;;  %193 = vmatprep.subr.bf16.mxu1 %v213_v0 }
  0x2c   :  { %179 = vmatpush1.bf16.msra.mxu0 %v178_v38  ;;  %206 = vmatpush1.bf16.msra.mxu1 %v178_v38 }
  0x2d   :  { %180 = vmatprep.subr.bf16.mxu0 %v213_v0  ;;  %194 = vmatprep.subr.bf16.mxu1 %v213_v0 }
  0x30   :  { %182 = vmatpush1.bf16.msra.mxu0 %v181_v41  ;;  %207 = vmatpush1.bf16.msra.mxu1 %v181_v41 }
  0x31   :  { %110 = vmatprep.subr.mxu0 %v215_v42  ;;  %195 = vmatprep.subr.mxu1 %v215_v42 }
  0x34   :  { %111 = vmatpush1.msra.mxu0 %v42_v43  ;;  %208 = vmatpush1.msra.mxu1 %v42_v43 }
  0x35   :  { %127 = vmatmul.mubr.f32.vlgmr.msra.gmra.mrb[0].mxu0 %v14_v44  ;;  %132 = vmatmul.mubr.f32.vlgmr.msra.gmra.mrb[0].mxu1 %v16_v45 }
  0x86   :  { %v48_v46 = vpop.permute.xlu0 %47 }
  0x8a   :  { %v53_v47 = vpop.permute.xlu0 %52 }
 0x108   :  { %v128_v48 = vpop.f32.mrb[0].mxu0  ;;  %v133_v49 = vpop.f32.mrb[0].mxu1 }
 0x109   :  { %v129_v50 = vadd.f32 %v128_v48, %v48_v46  ;;  %v134_v51 = vadd.f32 %v133_v49, %v53_v47  ;;  %v130_v52 = vpop.f32.mrb[1].mxu0  ;;  %v135_v53 = vpop.f32.mrb[1].mxu1 }
 0x10b   :  { %v137_v54 = vmax.f32 %v129_v50, 0.0  ;;  %v138_v55 = vmax.f32 %v134_v51, 0.0 }
 0x10d   :  { %139 = vst [vmem:[%s362_s3] sm:$0xff] %v137_v54  ;;  %140 = vst [vmem:[%s362_s3 + $0x8] sm:$0xff] %v138_v55 }

// kernel: eonss_forward.12
= control target key start
LH: loop header
LB: loop body
LE: loop exit
PB: predicated region body
PF: predicated region fallthrough
CT: control target
= control target key end

     0   :  { %v35_v0 = vlaneseq  ;;  %v69_v3 = vmov 1966171168   ;;  %s89_s0 = inlined_call_operand.vmem [shape: f32[4,512], index: 0, kind: input, shape index: {}]   ;;  %s90_s1 = inlined_call_operand.vmem [shape: f32[1,512], index: 1, kind: output, shape index: {}]  }
   0x1   :  { %v8_v1 = vld [vmem:[%s89_s0] sm:$0xff]  ;;  %v9_v2 = vld [vmem:[%s89_s0 + $0x8] sm:$0xff]  ;;  %v33_v4 = vunpack.c.l.s4 %v69_v3 }
   0x2   :  { %v64_v5 = vrot.slane %v8_v1, 9  ;;  %v65_v6 = vrot.slane %v9_v2, 9  ;;  %v36_v7 = vshrl.u32 %v35_v0, 7  ;;  %vm57_vm0 = vcmp.lt.s32.totalorder %v35_v0, 512 }
   0x3   :  { %v34_v8 = vunpack.c.0.s8 %v33_v4 }
   0x4   :  { %v18_v9 = vmax.f32 %v8_v1, %v64_v5  ;;  %v19_v10 = vmax.f32 %v9_v2, %v65_v6 }
   0x5   :  { %v37_v13 = vsub.s32 %v34_v8, %v36_v7 }
   0x6   :  { %v66_v11 = vrot.slane %v18_v9, 10  ;;  %v67_v12 = vrot.slane %v19_v10, 10 }
   0x8   :  { %v28_v14 = vmax.f32 %v18_v9, %v66_v11  ;;  %v29_v15 = vmax.f32 %v19_v10, %v67_v12 }
   0xa   :  { %v38_v16 = vrot.slane %v28_v14, %v37_v13  ;;  %v45_v17 = vrot.slane %v29_v15, %v37_v13 }
   0xc   :  { %v46_v18 = vcombine.low %v38_v16, %v45_v17 }
   0xe   :  { %v53_v19 = vrot.slane %v46_v18, %v37_v13 }
  0x10   :  { %59 = vst.msk [vmem:[%s90_s1] sm:$0xf] %vm57_vm0, %v53_v19 }

// kernel: eonss_forward.13
= control target key start
LH: loop header
LB: loop body
LE: loop exit
PB: predicated region body
PF: predicated region fallthrough
CT: control target
= control target key end

     0   :  { %s1406_s0 = inlined_call_operand.vmem [shape: f32[4,144,2], index: 0, kind: input, shape index: {}]   ;;  %s1407_s1 = inlined_call_operand.vmem [shape: f32[32,144], index: 1, kind: input, shape index: {}]   ;;  %s1408_s2 = inlined_call_operand.vmem [shape: f32[32,1], index: 2, kind: input, shape index: {}]   ;;  %s1409_s3 = inlined_call_operand.vmem [shape: f32[16,32], index: 3, kind: input, shape index: {}]   ;;  %s1410_s4 = inlined_call_operand.vmem [shape: f32[16,1], index: 4, kind: input, shape index: {}]   ;;  %s1411_s5 = inlined_call_operand.vmem [shape: f32[1,16], index: 5, kind: input, shape index: {}]   ;;  %s1412_s6 = inlined_call_operand.<no memory space> [shape: f32[1,1], index: 6, kind: input, shape index: {}]   ;;  %s1413_s7 = inlined_call_operand.hbm [shape: f32[1,2], index: 7, kind: output, shape index: {}]  }
   0x1   :  { %v12_v0 = vstv %s1412_s6 }
   0x2   :  { %13 = vst [vmem:[#allocation2] sm:$0x1] %v12_v0 }
   0x3   :  { %v37_v1 = vld [vmem:[%s1406_s0] sm:$0xff]  ;;  %v38_v2 = vld [vmem:[%s1406_s0 + $0x8] sm:$0xff]  ;;  %v725_v3 = vld [vmem:[%s1406_s0 + $0x90] sm:$0xff]  ;;  %v975_v4 = vmov 0.0|0.0   ;;  %v976_v12 = vmov 0   ;;  %vm79_vm0 = vcmask 130048  }
   0x4   :  { %821 = vmatprep.subr.bf16.mxu0 %v975_v4  ;;  %848 = vmatprep.subr.bf16.mxu1 %v975_v4  ;;  %v822_v5 = vpack.c.bf16 %v38_v2, %v37_v1  ;;  %v726_v6 = vld [vmem:[%s1406_s0 + $0x98] sm:$0xff]  ;;  %v39_v7 = vld [vmem:[%s1406_s0 + $0x10] sm:$0xff]  ;;  %v727_v10 = vld [vmem:[%s1406_s0 + $0xa0] sm:$0xff] }
   0x5   :  { %v40_v8 = vld [vmem:[%s1406_s0 + $0x18] sm:$0xff]  ;;  %v849_v9 = vpack.c.bf16 %v726_v6, %v725_v3  ;;  %v728_v11 = vld [vmem:[%s1406_s0 + $0xa8] sm:$0xff]  ;;  %945 = vset.pattern.permute.xlu0 %v976_v12  ;;  %946 = vset.pattern.permute.xlu1 %v976_v12  ;;  %v41_v15 = vld [vmem:[%s1406_s0 + $0x20] sm:$0xff] }
   0x6   :  { %823 = vmatpush1.bf16.msra.mxu0 %v822_v5  ;;  %v825_v13 = vpack.c.bf16 %v40_v8, %v39_v7  ;;  %v852_v14 = vpack.c.bf16 %v728_v11, %v727_v10  ;;  %v42_v16 = vld [vmem:[%s1406_s0 + $0x28] sm:$0xff]  ;;  %v729_v17 = vld [vmem:[%s1406_s0 + $0xb0] sm:$0xff]  ;;  %v730_v18 = vld [vmem:[%s1406_s0 + $0xb8] sm:$0xff] }
   0x7   :  { %850 = vmatpush1.bf16.msra.mxu1 %v849_v9  ;;  %824 = vmatprep.subr.bf16.mxu0 %v975_v4  ;;  %v828_v19 = vpack.c.bf16 %v42_v16, %v41_v15  ;;  %v855_v20 = vpack.c.bf16 %v730_v18, %v729_v17  ;;  %v43_v21 = vld [vmem:[%s1406_s0 + $0x30] sm:$0xff]  ;;  %v44_v22 = vld [vmem:[%s1406_s0 + $0x38] sm:$0xff]  ;;  %v731_v23 = vld [vmem:[%s1406_s0 + $0xc0] sm:$0xff] }
   0x8   :  { %851 = vmatprep.subr.bf16.mxu1 %v975_v4  ;;  %v732_v24 = vld [vmem:[%s1406_s0 + $0xc8] sm:$0xff]  ;;  %v831_v25 = vpack.c.bf16 %v44_v22, %v43_v21  ;;  %v45_v27 = vld [vmem:[%s1406_s0 + $0x40] sm:$0xff]  ;;  %v733_v30 = vld [vmem:[%s1406_s0 + $0xd0] sm:$0xff] }
   0x9   :  { %v858_v26 = vpack.c.bf16 %v732_v24, %v731_v23  ;;  %v46_v28 = vld [vmem:[%s1406_s0 + $0x48] sm:$0xff]  ;;  %v734_v31 = vld [vmem:[%s1406_s0 + $0xd8] sm:$0xff]  ;;  %v47_v34 = vld [vmem:[%s1406_s0 + $0x50] sm:$0xff] }
   0xa   :  { %826 = vmatpush1.bf16.msra.mxu0 %v825_v13  ;;  %v1087_v29 = vld [vmem:[%s1407_s1 + $0x8] sm:$0xff]  ;;  %v834_v32 = vpack.c.bf16 %v46_v28, %v45_v27  ;;  %v861_v33 = vpack.c.bf16 %v734_v31, %v733_v30  ;;  %v48_v35 = vld [vmem:[%s1406_s0 + $0x58] sm:$0xff]  ;;  %v735_v36 = vld [vmem:[%s1406_s0 + $0xe0] sm:$0xff] }
   0xb   :  { %853 = vmatpush1.bf16.msra.mxu1 %v852_v14  ;;  %827 = vmatprep.subr.bf16.mxu0 %v975_v4  ;;  %v736_v37 = vld [vmem:[%s1406_s0 + $0xe8] sm:$0xff]  ;;  %v837_v38 = vpack.c.bf16 %v48_v35, %v47_v34  ;;  %v49_v40 = vld [vmem:[%s1406_s0 + $0x60] sm:$0xff]  ;;  %v737_v42 = vld [vmem:[%s1406_s0 + $0xf0] sm:$0xff] }
   0xc   :  { %854 = vmatprep.subr.bf16.mxu1 %v975_v4  ;;  %721 = vmatprep.mubr.msk.f32.mxu0 %vm79_vm0, %v1087_v29  ;;  %v864_v39 = vpack.c.bf16 %v736_v37, %v735_v36  ;;  %v50_v41 = vld [vmem:[%s1406_s0 + $0x68] sm:$0xff]  ;;  %v738_v43 = vld [vmem:[%s1406_s0 + $0xf8] sm:$0xff]  ;;  %v51_v46 = vld [vmem:[%s1406_s0 + $0x70] sm:$0xff] }
   0xd   :  { %743 = vmatprep.mubr.msk.f32.mxu1 %vm79_vm0, %v1087_v29  ;;  %v840_v44 = vpack.c.bf16 %v50_v41, %v49_v40  ;;  %v867_v45 = vpack.c.bf16 %v738_v43, %v737_v42  ;;  %v52_v47 = vld [vmem:[%s1406_s0 + $0x78] sm:$0xff]  ;;  %v739_v48 = vld [vmem:[%s1406_s0 + $0x100] sm:$0xff]  ;;  %v740_v49 = vld [vmem:[%s1406_s0 + $0x108] sm:$0xff] }
   0xe   :  { %829 = vmatpush1.bf16.msra.mxu0 %v828_v19  ;;  %v55_v50 = vld [vmem:[%s1408_s2] sm:$0xff]  ;;  %v843_v51 = vpack.c.bf16 %v52_v47, %v51_v46  ;;  %v57_v52 = vld [vmem:[%s1408_s2 + $0x10] sm:$0xff]  ;;  %v870_v53 = vpack.c.bf16 %v740_v49, %v739_v48  ;;  %v54_v55 = vld [vmem:[%s1406_s0 + $0x88] sm:$0xff] }
   0xf   :  { %856 = vmatpush1.bf16.msra.mxu1 %v855_v20  ;;  %830 = vmatprep.subr.bf16.mxu0 %v975_v4  ;;  %v53_v54 = vld [vmem:[%s1406_s0 + $0x80] sm:$0xff]  ;;  %v56_v56 = vld [vmem:[%s1408_s2 + $0x8] sm:$0xff]  ;;  %v741_v57 = vld [vmem:[%s1406_s0 + $0x110] sm:$0xff] }
  0x10   :  { %857 = vmatprep.subr.bf16.mxu1 %v975_v4  ;;  %61 = vperm.xlu0 %945, %v55_v50   ;;  %v742_v58 = vld [vmem:[%s1406_s0 + $0x118] sm:$0xff] }
  0x11   :  { %71 = vperm.xlu1 %946, %v57_v52  }
  0x12   :  { %832 = vmatpush1.bf16.msra.mxu0 %v831_v25 }
  0x13   :  { %859 = vmatpush1.bf16.msra.mxu1 %v858_v26  ;;  %833 = vmatprep.subr.bf16.mxu0 %v975_v4 }
  0x14   :  { %860 = vmatprep.subr.bf16.mxu1 %v975_v4 }
  0x16   :  { %835 = vmatpush1.bf16.msra.mxu0 %v834_v32 }
  0x17   :  { %862 = vmatpush1.bf16.msra.mxu1 %v861_v33  ;;  %836 = vmatprep.subr.bf16.mxu0 %v975_v4 }
  0x18   :  { %863 = vmatprep.subr.bf16.mxu1 %v975_v4 }
  0x1a   :  { %838 = vmatpush1.bf16.msra.mxu0 %v837_v38 }
  0x1b   :  { %865 = vmatpush1.bf16.msra.mxu1 %v864_v39  ;;  %839 = vmatprep.subr.bf16.mxu0 %v975_v4 }
  0x1c   :  { %866 = vmatprep.subr.bf16.mxu1 %v975_v4 }
  0x1e   :  { %841 = vmatpush1.bf16.msra.mxu0 %v840_v44 }
  0x1f   :  { %868 = vmatpush1.bf16.msra.mxu1 %v867_v45  ;;  %842 = vmatprep.subr.bf16.mxu0 %v975_v4 }
  0x20   :  { %869 = vmatprep.subr.bf16.mxu1 %v975_v4 }
  0x21   :  { %14 = vsyncpa [#allocation4], 0  ;;  %v58_v59 = vld [vmem:[%s1408_s2 + $0x18] sm:$0xff]  ;;  %v846_v60 = vpack.c.bf16 %v54_v55, %v53_v54  ;;  %66 = vperm.xlu0 %945, %v56_v56   ;;  %v873_v61 = vpack.c.bf16 %v742_v58, %v741_v57  ;;  %v747_v62 = vld [vmem:[%s1406_s0 + $0x120] sm:$0xff]  ;;  %vm531_vm1 = vcmask 261120   ;;  %vm977_vm2 = vmmov 0  }
  0x22   :  { %844 = vmatpush1.bf16.msra.mxu0 %v843_v51  ;;  %v748_v63 = vld [vmem:[%s1406_s0 + $0x128] sm:$0xff]  ;;  %v519_v0 = vld [vmem:[%s1410_s4] sm:$0xff]  ;;  %v769_v1 = vld [vmem:[%s1406_s0 + $0x1b0] sm:$0xff]  ;;  %76 = vperm.xlu1 %946, %v58_v59   ;;  %vm705_vm3 = vcmask 8192  }
  0x23   :  { %871 = vmatpush1.bf16.msra.mxu1 %v870_v53  ;;  %845 = vmatprep.subr.bf16.mxu0 %v975_v4  ;;  %v770_v2 = vld [vmem:[%s1406_s0 + $0x1b8] sm:$0xff]  ;;  %v520_v3 = vld [vmem:[%s1410_s4 + $0x8] sm:$0xff]  ;;  %v1191_v5 = vld [vmem:[%s1407_s1] sm:$0xff]  ;;  %v876_v6 = vpack.c.bf16 %v748_v63, %v747_v62 }
  0x24   :  { %872 = vmatprep.subr.bf16.mxu1 %v975_v4  ;;  %v903_v7 = vpack.c.bf16 %v770_v2, %v769_v1  ;;  %v749_v8 = vld [vmem:[%s1406_s0 + $0x130] sm:$0xff]  ;;  %v750_v9 = vld [vmem:[%s1406_s0 + $0x138] sm:$0xff]  ;;  %v771_v10 = vld [vmem:[%s1406_s0 + $0x1c0] sm:$0xff] }
  0x25   :  { %523 = vperm.xlu0 %945, %v519_v0   ;;  %v772_v11 = vld [vmem:[%s1406_s0 + $0x1c8] sm:$0xff]  ;;  %v1211_v12 = vld [vmem:[%s1407_s1 + $0x18] sm:$0xff]  ;;  %v879_v13 = vpack.c.bf16 %v750_v9, %v749_v8  ;;  %v1217_v14 = vld [vmem:[%s1407_s1 + $0x10] sm:$0xff] }
  0x26   :  { %847 = vmatpush1.bf16.msra.mxu0 %v846_v60  ;;  %528 = vperm.xlu1 %946, %v520_v3   ;;  %v906_v15 = vpack.c.bf16 %v772_v11, %v771_v10  ;;  %v751_v16 = vld [vmem:[%s1406_s0 + $0x140] sm:$0xff]  ;;  %v752_v17 = vld [vmem:[%s1406_s0 + $0x148] sm:$0xff]  ;;  %v773_v18 = vld [vmem:[%s1406_s0 + $0x1d0] sm:$0xff] }
  0x27   :  { %874 = vmatpush1.bf16.msra.mxu1 %v873_v61  ;;  %875 = vmatprep.subr.bf16.mxu0 %v975_v4  ;;  %v774_v19 = vld [vmem:[%s1406_s0 + $0x1d8] sm:$0xff]  ;;  %v1241_v20 = vld [vmem:[%s1407_s1 + $0x28] sm:$0xff]  ;;  %v882_v21 = vpack.c.bf16 %v752_v17, %v751_v16  ;;  %v1247_v22 = vld [vmem:[%s1407_s1 + $0x20] sm:$0xff] }
  0x28   :  { %902 = vmatprep.subr.bf16.mxu1 %v975_v4  ;;  %v909_v23 = vpack.c.bf16 %v774_v19, %v773_v18  ;;  %v753_v24 = vld [vmem:[%s1406_s0 + $0x150] sm:$0xff]  ;;  %v754_v25 = vld [vmem:[%s1406_s0 + $0x158] sm:$0xff]  ;;  %v775_v26 = vld [vmem:[%s1406_s0 + $0x1e0] sm:$0xff] }
  0x29   :  { %157 = vmatmul.mubr.f32.vlgmr.msra.gmra.mrb[0].mxu0 %v1191_v5  ;;  %v776_v27 = vld [vmem:[%s1406_s0 + $0x1e8] sm:$0xff]  ;;  %v1271_v28 = vld [vmem:[%s1407_s1 + $0x38] sm:$0xff]  ;;  %v885_v30 = vpack.c.bf16 %v754_v25, %v753_v24  ;;  %v1277_v31 = vld [vmem:[%s1407_s1 + $0x30] sm:$0xff] }
  0x2a   :  { %265 = vmatmul.mubr.f32.vlgmr.msra.gmra.mrb[0].mxu1 %v1191_v5  ;;  %877 = vmatpush1.bf16.msra.mxu0 %v876_v6  ;;  %v912_v32 = vpack.c.bf16 %v776_v27, %v775_v26  ;;  %v755_v33 = vld [vmem:[%s1406_s0 + $0x160] sm:$0xff]  ;;  %v756_v34 = vld [vmem:[%s1406_s0 + $0x168] sm:$0xff]  ;;  %v777_v35 = vld [vmem:[%s1406_s0 + $0x1f0] sm:$0xff] }
  0x2b   :  { %904 = vmatpush1.bf16.msra.mxu1 %v903_v7  ;;  %878 = vmatprep.subr.bf16.mxu0 %v975_v4  ;;  %v778_v36 = vld [vmem:[%s1406_s0 + $0x1f8] sm:$0xff]  ;;  %v888_v37 = vpack.c.bf16 %v756_v34, %v755_v33  ;;  %v616_v38 = vld [vmem:[#allocation2] sm:$0x1]  ;;  %v757_v40 = vld [vmem:[%s1406_s0 + $0x170] sm:$0xff] }
  0x2c   :  { %905 = vmatprep.subr.bf16.mxu1 %v975_v4  ;;  %722 = vmatprep.mubr.msk.f32.mxu0 %vm79_vm0, %v1211_v12  ;;  %v915_v39 = vpack.c.bf16 %v778_v36, %v777_v35  ;;  %v758_v41 = vld [vmem:[%s1406_s0 + $0x178] sm:$0xff]  ;;  %v779_v42 = vld [vmem:[%s1406_s0 + $0x200] sm:$0xff]  ;;  %v780_v43 = vld [vmem:[%s1406_s0 + $0x208] sm:$0xff] }
  0x2d   :  { %162 = vmatmul.mubr.f32.gmra.mrb[2].mxu0 %v1217_v14  ;;  %744 = vmatprep.mubr.msk.f32.mxu1 %vm79_vm0, %v1211_v12  ;;  %v891_v44 = vpack.c.bf16 %v758_v41, %v757_v40  ;;  %v918_v45 = vpack.c.bf16 %v780_v43, %v779_v42  ;;  %v759_v46 = vld [vmem:[%s1406_s0 + $0x180] sm:$0xff]  ;;  %v760_v47 = vld [vmem:[%s1406_s0 + $0x188] sm:$0xff]  ;;  %v782_v48 = vld [vmem:[%s1406_s0 + $0x218] sm:$0xff] }
  0x2e   :  { %880 = vmatpush1.bf16.msra.mxu0 %v879_v13  ;;  %270 = vmatmul.mubr.f32.gmra.mrb[2].mxu1 %v1217_v14  ;;  %v894_v49 = vpack.c.bf16 %v760_v47, %v759_v46  ;;  %v761_v51 = vld [vmem:[%s1406_s0 + $0x190] sm:$0xff]  ;;  %v762_v52 = vld [vmem:[%s1406_s0 + $0x198] sm:$0xff]  ;;  %v783_v53 = vld [vmem:[%s1406_s0 + $0x220] sm:$0xff] }
  0x2f   :  { %907 = vmatpush1.bf16.msra.mxu1 %v906_v15  ;;  %881 = vmatprep.subr.bf16.mxu0 %v975_v4  ;;  %v784_v54 = vld [vmem:[%s1406_s0 + $0x228] sm:$0xff]  ;;  %v897_v55 = vpack.c.bf16 %v762_v52, %v761_v51  ;;  %v763_v57 = vld [vmem:[%s1406_s0 + $0x1a0] sm:$0xff]  ;;  %v785_v59 = vld [vmem:[%s1406_s0 + $0x230] sm:$0xff] }
  0x30   :  { %908 = vmatprep.subr.bf16.mxu1 %v975_v4  ;;  %723 = vmatprep.mubr.msk.f32.mxu0 %vm79_vm0, %v1241_v20  ;;  %v924_v56 = vpack.c.bf16 %v784_v54, %v783_v53  ;;  %v764_v58 = vld [vmem:[%s1406_s0 + $0x1a8] sm:$0xff]  ;;  %v786_v60 = vld [vmem:[%s1406_s0 + $0x238] sm:$0xff] }
  0x31   :  { %167 = vmatmul.mubr.f32.gmra.mrb[4].mxu0 %v1247_v22  ;;  %745 = vmatprep.mubr.msk.f32.mxu1 %vm79_vm0, %v1241_v20  ;;  %v900_v61 = vpack.c.bf16 %v764_v58, %v763_v57  ;;  %v927_v62 = vpack.c.bf16 %v786_v60, %v785_v59 }
  0x32   :  { %883 = vmatpush1.bf16.msra.mxu0 %v882_v21  ;;  %275 = vmatmul.mubr.f32.gmra.mrb[4].mxu1 %v1247_v22 }
  0x33   :  { %910 = vmatpush1.bf16.msra.mxu1 %v909_v23  ;;  %884 = vmatprep.subr.bf16.mxu0 %v975_v4 }
  0x34   :  { %911 = vmatprep.subr.bf16.mxu1 %v975_v4  ;;  %724 = vmatprep.mubr.msk.f32.mxu0 %vm79_vm0, %v1271_v28 }
  0x35   :  { %172 = vmatmul.mubr.f32.gmra.mrb[6].mxu0 %v1277_v31  ;;  %746 = vmatprep.mubr.msk.f32.mxu1 %vm79_vm0, %v1271_v28 }
  0x36   :  { %886 = vmatpush1.bf16.msra.mxu0 %v885_v30  ;;  %280 = vmatmul.mubr.f32.gmra.mrb[6].mxu1 %v1277_v31 }
  0x37   :  { %913 = vmatpush1.bf16.msra.mxu1 %v912_v32  ;;  %887 = vmatprep.subr.bf16.mxu0 %v975_v4 }
  0x38   :  { %914 = vmatprep.subr.bf16.mxu1 %v975_v4  ;;  %765 = vmatprep.mubr.msk.f32.mxu0 %vm79_vm0, %v1087_v29 }
  0x39   :  { %787 = vmatprep.mubr.msk.f32.mxu1 %vm79_vm0, %v1087_v29  ;;  %619 = vperm.xlu0 %945, %v616_v38   ;;  %v781_v29 = vld [vmem:[%s1406_s0 + $0x210] sm:$0xff] }
  0x3a   :  { %889 = vmatpush1.bf16.msra.mxu0 %v888_v37  ;;  %v921_v50 = vpack.c.bf16 %v782_v48, %v781_v29 }
  0x3b   :  { %916 = vmatpush1.bf16.msra.mxu1 %v915_v39  ;;  %890 = vmatprep.subr.bf16.mxu0 %v975_v4 }
  0x3c   :  { %917 = vmatprep.subr.bf16.mxu1 %v975_v4 }
  0x3e   :  { %892 = vmatpush1.bf16.msra.mxu0 %v891_v44 }
  0x3f   :  { %919 = vmatpush1.bf16.msra.mxu1 %v918_v45  ;;  %893 = vmatprep.subr.bf16.mxu0 %v975_v4 }
  0x40   :  { %920 = vmatprep.subr.bf16.mxu1 %v975_v4 }
  0x42   :  { %895 = vmatpush1.bf16.msra.mxu0 %v894_v49 }
  0x43   :  { %922 = vmatpush1.bf16.msra.mxu1 %v921_v50  ;;  %896 = vmatprep.subr.bf16.mxu0 %v975_v4 }
  0x44   :  { %923 = vmatprep.subr.bf16.mxu1 %v975_v4 }
  0x46   :  { %898 = vmatpush1.bf16.msra.mxu0 %v897_v55 }
  0x47   :  { %925 = vmatpush1.bf16.msra.mxu1 %v924_v56  ;;  %899 = vmatprep.subr.bf16.mxu0 %v975_v4 }
  0x48   :  { %926 = vmatprep.subr.bf16.mxu1 %v975_v4 }
  0x4a   :  { %901 = vmatpush1.bf16.msra.mxu0 %v900_v61 }
  0x4b   :  { %928 = vmatpush1.bf16.msra.mxu1 %v927_v62 }
  0x4c   :  { %937 = vmatprep.subr.bf16.mxu1 %v975_v4  ;;  %v517_v4 = vld [vmem:[%s1409_s3] sm:$0xff] }
  0x4d   :  { %377 = vmatmul.mubr.f32.vlgmr.msra.gmra.mrb[8].mxu0 %v1191_v5 }
  0x4e   :  { %489 = vmatmul.mubr.f32.vlgmr.msra.gmra.mrb[8].mxu1 %v1191_v5  ;;  %766 = vmatprep.mubr.msk.f32.mxu0 %vm79_vm0, %v1211_v12 }
  0x4f   :  { %788 = vmatprep.mubr.msk.f32.mxu1 %vm79_vm0, %v1211_v12 }
  0x51   :  { %382 = vmatmul.mubr.f32.gmra.mrb[10].mxu0 %v1217_v14 }
  0x52   :  { %494 = vmatmul.mubr.f32.gmra.mrb[10].mxu1 %v1217_v14  ;;  %767 = vmatprep.mubr.msk.f32.mxu0 %vm79_vm0, %v1241_v20 }
  0x53   :  { %789 = vmatprep.mubr.msk.f32.mxu1 %vm79_vm0, %v1241_v20 }
  0x55   :  { %387 = vmatmul.mubr.f32.gmra.mrb[12].mxu0 %v1247_v22 }
  0x56   :  { %499 = vmatmul.mubr.f32.gmra.mrb[12].mxu1 %v1247_v22  ;;  %768 = vmatprep.mubr.msk.f32.mxu0 %vm79_vm0, %v1271_v28 }
  0x57   :  { %790 = vmatprep.mubr.msk.f32.mxu1 %vm79_vm0, %v1271_v28 }
  0x59   :  { %392 = vmatmul.mubr.f32.gmra.mrb[14].mxu0 %v1277_v31 }
  0x5a   :  { %504 = vmatmul.mubr.f32.gmra.mrb[14].mxu1 %v1277_v31  ;;  %811 = vmatprep.mubr.msk.f32.mxu0 %vm531_vm1, %v517_v4 }
  0x8f   :  { %v62_v63 = vpop.permute.xlu0 %61 }
  0x90   :  { %v72_v11 = vpop.permute.xlu1 %71 }
  0xa0   :  { %v67_v7 = vpop.permute.xlu0 %66 }
  0xa1   :  { %v77_v27 = vpop.permute.xlu1 %76 }
  0xfc   :  { %v158_v0 = vpop.f32.mrb[0].mxu0 }
  0xfd   :  { %v160_v1 = vpop.f32.mrb[1].mxu0  ;;  %v159_v2 = vadd.f32 %v158_v0, %v62_v63  ;;  %v266_v3 = vpop.f32.mrb[0].mxu1 }
  0xfe   :  { %v267_v5 = vadd.f32 %v266_v3, %v62_v63  ;;  %v268_v6 = vpop.f32.mrb[1].mxu1 }
  0xff   :  { %v177_v8 = vmax.f32 %v159_v2, 0.0 }
 0x100   :  { %v285_v9 = vmax.f32 %v267_v5, 0.0  ;;  %v163_v10 = vpop.f32.mrb[2].mxu0 }
 0x101   :  { %v165_v12 = vpop.f32.mrb[3].mxu0  ;;  %v164_v13 = vadd.f32 %v163_v10, %v67_v7  ;;  %v271_v14 = vpop.f32.mrb[2].mxu1 }
 0x102   :  { %v289_v15 = vmax.f32 %v177_v8, %v285_v9  ;;  %v272_v16 = vadd.f32 %v271_v14, %v67_v7  ;;  %v273_v17 = vpop.f32.mrb[3].mxu1 }
 0x103   :  { %v178_v18 = vmax.f32 %v164_v13, 0.0 }
 0x104   :  { %v286_v19 = vmax.f32 %v272_v16, 0.0  ;;  %v168_v20 = vpop.f32.mrb[4].mxu0 }
 0x105   :  { %v170_v21 = vpop.f32.mrb[5].mxu0  ;;  %v169_v22 = vadd.f32 %v168_v20, %v72_v11  ;;  %v276_v23 = vpop.f32.mrb[4].mxu1 }
 0x106   :  { %v290_v24 = vmax.f32 %v178_v18, %v286_v19  ;;  %v277_v25 = vadd.f32 %v276_v23, %v72_v11  ;;  %v278_v26 = vpop.f32.mrb[5].mxu1  ;;  %v518_v18 = vld [vmem:[%s1409_s3 + $0x8] sm:$0xff]  ;;  %v978_v19 = vmov 0.0   ;;  %v529_v20 = vpop.permute.xlu1 %528  ;;  %s979_s3 = smov [#allocation3]  }
 0x107   :  { %v179_v28 = vmax.f32 %v169_v22, 0.0  ;;  %818 = vmatprep.mubr.msk.f32.mxu1 %vm977_vm2, %v978_v19  ;;  %v524_v22 = vpop.permute.xlu0 %523  ;;  %s713_s26 = sshll.u32 %s979_s3, 4  ;;  %s714_s26 = int_to_ptr.vmem [resolvable:$true] %s713_s26 }
 0x108   :  { %v287_v30 = vmax.f32 %v277_v25, 0.0  ;;  %v173_v31 = vpop.f32.mrb[6].mxu0  ;;  %s955_s27 = scalar_lea.vmem %s714_s26, 32  ;;  %p956_p1 = scmp.lt.s32.totalorder %s714_s26, %s714_s26 }
 0x109   :  { %v175_v32 = vpop.f32.mrb[7].mxu0  ;;  %v174_v33 = vadd.f32 %v173_v31, %v77_v27  ;;  %v281_v34 = vpop.f32.mrb[6].mxu1  ;;  %v622_v31 = vlaneseq }
 0x10a   :  { %v291_v35 = vmax.f32 %v179_v28, %v287_v30  ;;  %v282_v36 = vadd.f32 %v281_v34, %v77_v27  ;;  %v283_v37 = vpop.f32.mrb[7].mxu1  ;;  %v615_v30 = vld [vmem:[%s1411_s5] sm:$0x1]  ;;  %s951_s5 = scalar_lea.vmem %s714_s26, 16 }
 0x10b   :  { %v180_v38 = vmax.f32 %v174_v33, 0.0  ;;  %v623_v32 = vshrl.u32 %v622_v31, 7  ;;  %v620_v34 = vpop.permute.xlu0 %619  ;;  %p952_p0 = scmp.ne.s32.totalorder %s714_s26, %s951_s5  ;;  %p957_p2 = scmp.lt.s32.totalorder %s955_s27, %s951_s5 }
 0x10c   :  { %v288_v39 = vmax.f32 %v282_v36, 0.0 }
 0x10d   :  { %v624_v33 = vsub.s32 0, %v623_v32  ;;  %p958_p3 = por %p957_p2, %p956_p1 }
 0x10e   :  { %v292_v40 = vmax.f32 %v180_v38, %v288_v39 }
 0x10f   :  { %p959_p4 = pnand %p958_p3, %p952_p0 }
 0x120   :  { %v378_v41 = vpop.f32.mrb[8].mxu0 }
 0x121   :  { %v379_v42 = vadd.f32 %v378_v41, %v62_v63  ;;  %v380_v43 = vpop.f32.mrb[9].mxu0  ;;  %v490_v44 = vpop.f32.mrb[8].mxu1 }
 0x122   :  { %v491_v45 = vadd.f32 %v490_v44, %v62_v63  ;;  %v492_v46 = vpop.f32.mrb[9].mxu1 }
 0x123   :  { %v397_v47 = vmax.f32 %v379_v42, 0.0 }
 0x124   :  { %v509_v29 = vmax.f32 %v491_v45, 0.0  ;;  %v383_v48 = vpop.f32.mrb[10].mxu0 }
 0x125   :  { %v401_v49 = vmax.f32 %v289_v15, %v397_v47  ;;  %v384_v50 = vadd.f32 %v383_v48, %v67_v7  ;;  %v495_v51 = vpop.f32.mrb[10].mxu1  ;;  %v385_v52 = vpop.f32.mrb[11].mxu0 }
 0x126   :  { %v496_v53 = vadd.f32 %v495_v51, %v67_v7  ;;  %v497_v54 = vpop.f32.mrb[11].mxu1 }
 0x127   :  { %v513_v55 = vmax.f32 %v401_v49, %v509_v29  ;;  %v398_v56 = vmax.f32 %v384_v50, 0.0 }
 0x128   :  { %v388_v57 = vpop.f32.mrb[12].mxu0  ;;  %v510_v59 = vmax.f32 %v496_v53, 0.0 }
 0x129   :  { %v402_v58 = vmax.f32 %v290_v24, %v398_v56  ;;  %v389_v60 = vadd.f32 %v388_v57, %v72_v11  ;;  %v500_v61 = vpop.f32.mrb[12].mxu1  ;;  %v390_v62 = vpop.f32.mrb[13].mxu0 }
 0x12a   :  { %v501_v4 = vadd.f32 %v500_v61, %v72_v11  ;;  %v502_v63 = vpop.f32.mrb[13].mxu1 }
 0x12b   :  { %v514_v0 = vmax.f32 %v402_v58, %v510_v59  ;;  %v399_v1 = vmax.f32 %v389_v60, 0.0 }
 0x12c   :  { %v393_v2 = vpop.f32.mrb[14].mxu0  ;;  %v511_v5 = vmax.f32 %v501_v4, 0.0 }
 0x12d   :  { %v403_v3 = vmax.f32 %v291_v35, %v399_v1  ;;  %v394_v6 = vadd.f32 %v393_v2, %v77_v27  ;;  %v505_v8 = vpop.f32.mrb[14].mxu1  ;;  %v395_v9 = vpop.f32.mrb[15].mxu0  ;;  %v929_v7 = vpack.c.bf16 %v514_v0, %v513_v55  ;;  %v625_v35 = vrot.slane %v620_v34, %v624_v33 }
 0x12e   :  { %v506_v10 = vadd.f32 %v505_v8, %v77_v27  ;;  %v507_v12 = vpop.f32.mrb[15].mxu1 }
 0x12f   :  { %v515_v13 = vmax.f32 %v403_v3, %v511_v5  ;;  %v400_v14 = vmax.f32 %v394_v6, 0.0  ;;  %930 = vmatprep.subr.bf16.mxu0 %v929_v7 }
 0x130   :  { %932 = vmatpush3.bf16.msra.mxu0 %v929_v7  ;;  %v512_v16 = vmax.f32 %v506_v10, 0.0 }
 0x131   :  { %v404_v15 = vmax.f32 %v292_v40, %v400_v14 }
 0x133   :  { %v516_v17 = vmax.f32 %v404_v15, %v512_v16 }
 0x135   :  { %v933_v11 = vpack.c.bf16 %v516_v17, %v515_v13 }
 0x137   :  { %934 = vmatprep.subr.bf16.mxu0 %v933_v11 }
 0x138   :  { %936 = vmatpush3.bf16.msra.mxu0 %v933_v11 }
 0x13b   :  { %812 = vmatmul.mubr.msk.f32.vlgmr.msra.gmra.mrb[16].mxu0 %vm531_vm1, %v518_v18 }
 0x20e   :  { %v813_v21 = vpop.f32.mrb[16].mxu0 }
 0x20f   :  { %v610_v23 = vadd.f32 %v813_v21, %v529_v20  ;;  %v604_v24 = vpop.f32.mrb[17].mxu0 }
 0x210   :  { %v605_v25 = vadd.f32 %v604_v24, %v524_v22 }
 0x211   :  { %v614_v26 = vmax.f32 %v610_v23, 0.0 }
 0x212   :  { %v613_v27 = vmax.f32 %v605_v25, 0.0 }
 0x214   :  { %v938_v28 = vpack.c.bf16 %v614_v26, %v613_v27 }
 0x216   :  { %939 = vmatpush3.bf16.msra.mxu1 %v938_v28 }
 0x219   :  { %819 = vmatmul.mubr.msk.f32.vlgmr.msra.gmra.mrb[16].mxu1 %vm79_vm0, %v615_v30 }
 0x2ec   :  { %v695_v36 = vpop.f32.mrb[16].mxu1 }
 0x2ed   :  { %v696_v37 = vadd.f32 %v695_v36, %v625_v35  ;;  %v820_v38 = vpop.f32.mrb[17].mxu1 }
 0x2ef   :  { %v699_v39 = vsub.f32 0.0, %v696_v37 }
 0x2f1   :  { %v700_v40 = vmul.f32 1.442695, %v699_v39 }
 0x2f3   :  { %947 = vpow2.f32 %v700_v40 }
 0x2fd   :  { %v948_v41 = vpop.eup %947 }
 0x2fe   :  { %v702_v42 = vadd.f32 1.0, %v948_v41 }
 0x300   :  { %949 = vrcp.f32 %v702_v42 }
 0x30a   :  { %v950_v43 = vpop.eup %949 }
 0x30b   :  { %706 = vst.msk [vmem:[#allocation3] sm:$0x1] %vm705_vm3, %v950_v43 }
 0x30c   :  { %962 = shalt.err (!%p959_p4)
}
 0x30d   :  { %s963_s29 = scalar_lea.hbm %s1413_s7, 16 }
 0x30e   :  { %p964_p5 = scmp.ne.s32.totalorder %s1413_s7, %s963_s29  ;;  %p967_p6 = scmp.lt.u32.totalorder %s963_s29, %s1413_s7 }
 0x310   :  { %p969_p7 = pnand %p967_p6, %p964_p5 }
 0x312   :  { %972 = shalt.err (!%p969_p7)
}
 0x313   :  { %716 = dma.vmem_to_hbm [thread:$0]  %s714_s26, 16, %s1413_s7, [#allocation4]  }
 0x314   :  { %973 = dma.done.wait [#allocation4], 16  }
 0x315   :  { %974 = vsyncadd [#allocation4], 4294967280 }
 0x316   :  { %720 = vsyncpa [#allocation4], 1 }

</bundles_post_ra>
